<compile_context>
chip_gen: v6e
topology: v6e:2x2x1
jax: 0.10.0
libtpu: 0.0.40
codegen_flags: <defaults>
</compile_context>

<pallas_src>
import functools

import jax
import jax.numpy as jnp
from jax.experimental import pallas as pl
from jax.experimental.pallas import tpu as pltpu


def _round_up(a, b):
    return (a + b - 1) // b * b


def _largest_tile(dim, cap):
    """dim % 128 == 0: largest multiple-of-128 divisor of dim that is <= cap."""
    best = 128
    cap = max(cap, 128)
    d = 128
    while d <= min(dim, cap):
        if dim % d == 0:
            best = d
        d += 128
    return best


# ----------------------------------------------------------------------------
# Fused batched matmul + bias (+ReLU) Pallas kernel
#   a: (G, M, K) bf16, w: (G, K, N) bf16, bias: (G, 1, N) f32 -> (G, M, N)
# Grid: (G, M/tm, N/tn, K/tk); f32 VMEM accumulator carried over the K axis.
# ----------------------------------------------------------------------------
def _matmul_bias_kernel(a_ref, b_ref, bias_ref, o_ref, acc_ref, *, apply_relu):
    @pl.when(pl.program_id(3) == 0)
    def _():
        acc_ref[...] = jnp.zeros_like(acc_ref)

    acc_ref[...] += jnp.dot(a_ref[0], b_ref[0],
                            preferred_element_type=jnp.float32)

    @pl.when(pl.program_id(3) == pl.num_programs(3) - 1)
    def _():
        r = acc_ref[...] + bias_ref[0]
        if apply_relu:
            r = jnp.maximum(r, 0.0)
        o_ref[0] = r.astype(o_ref.dtype)


_ACT_BLOCK_BUDGET = 8 * 1024 * 1024   # bytes for a full-M bf16 activation block


def _pick_tiles(M, K, N):
    # M: full-extent block when it fits comfortably (no pad / no slice);
    # fallback tiling at 512 only for very large batches.
    if M * K * 2 <= _ACT_BLOCK_BUDGET:
        tm, Mp = M, M
    else:
        tm = 512
        Mp = _round_up(M, tm)
    # K: multiples of 128 stream in big tiles (<=2048); otherwise one
    # full-extent K block (conv im2col K is always small enough for that).
    tk = _largest_tile(K, 2048) if K % 128 == 0 else K
    # N: FC head (tiny M) keeps >=2 N grid steps for megacore sharding;
    # convs take the whole N extent so activation blocks are read once.
    if N % 128 == 0:
        cap = min(1024, N // 2) if (M <= 64 and N >= 256) else 1024
        tn = _largest_tile(N, cap)
    else:
        tn = N
    return tm, Mp, tk, tn


def pallas_matmul(a, w, bias, *, relu, out_dtype=jnp.bfloat16):
    """Batched fused linear: [relu](a @ w + bias).

    a:    (G, M, K)  activations (bf16; cast here only if needed)
    w:    (G, K, N)  bf16 weights at exact sizes (no pre-padding required)
    bias: (G, N)     float32
    returns (G, M, N) out_dtype
    """
    G, M, K = a.shape
    Gw, Kw, N = w.shape
    assert G == Gw and Kw == K and bias.shape == (G, N)
    if a.dtype != jnp.bfloat16:
        a = a.astype(jnp.bfloat16)

    tm, Mp, tk, tn = _pick_tiles(M, K, N)
    if Mp != M:                         # rare fallback (huge batch): pad M only
        a = jnp.pad(a, ((0, 0), (0, Mp - M), (0, 0)))
    b3 = bias.astype(jnp.float32).reshape(G, 1, N)

    out = pl.pallas_call(
        functools.partial(_matmul_bias_kernel, apply_relu=relu),
        out_shape=jax.ShapeDtypeStruct((G, Mp, N), out_dtype),
        grid_spec=pltpu.PrefetchScalarGridSpec(
            num_scalar_prefetch=0,
            grid=(G, Mp // tm, N // tn, K // tk),
            in_specs=[
                pl.BlockSpec((1, tm, tk), lambda g, i, j, k: (g, i, k)),
                pl.BlockSpec((1, tk, tn), lambda g, i, j, k: (g, k, j)),
                pl.BlockSpec((1, 1, tn), lambda g, i, j, k: (g, 0, j)),
            ],
            out_specs=pl.BlockSpec((1, tm, tn), lambda g, i, j, k: (g, i, j)),
            scratch_shapes=[pltpu.VMEM((tm, tn), jnp.float32)],
        ),
        compiler_params=pltpu.CompilerParams(
            dimension_semantics=("parallel", "parallel", "parallel", "arbitrary"),
            vmem_limit_bytes=48 * 1024 * 1024),
    )(a, w, b3)
    if Mp != M:
        out = out[:, :M, :]
    return out


# ----------------------------------------------------------------------------
# NHWC im2col (bf16), conv (both branches + groups fused into one pallas_call),
# maxpool, LRN
# ----------------------------------------------------------------------------
def _im2col_nhwc(x, kh, kw, stride, pad):
    """x: bf16 NHWC -> (B*Ho*Wo, kh*kw*C) bf16 patches (no extra cast/pad)."""
    B, H, W, C = x.shape
    if pad:
        x = jnp.pad(x, ((0, 0), (pad, pad), (pad, pad), (0, 0)))
    Hp, Wp = H + 2 * pad, W + 2 * pad
    Ho = (Hp - kh) // stride + 1
    Wo = (Wp - kw) // stride + 1
    cols = [x[:, i:i + stride * Ho:stride, j:j + stride * Wo:stride, :]
            for i in range(kh) for j in range(kw)]
    p = jnp.stack(cols, axis=3)                      # (B, Ho, Wo, kh*kw, C)
    return p.reshape(B * Ho * Wo, kh * kw * C), Ho, Wo


def conv_pair(x2b, w, bias, *, k, stride, pad, groups, relu=True):
    """Convolution applied to the concatenated [branch_z; branch_x] batch.

    x2b:  (2B, H, W, Cin) NHWC bf16
    w:    (2*groups, K, Og) bf16, branch-major / group-minor, im2col order
    bias: (2*groups, Og) f32
    returns (2B, Ho, Wo, groups*Og) NHWC bf16
    """
    twoB, H, W, C = x2b.shape
    B = twoB // 2
    Cg = C // groups
    Og = bias.shape[-1]

    patches = []
    for br in range(2):                      # branch_z then branch_x
        xb = x2b[br * B:(br + 1) * B]
        for g in range(groups):
            pg, Ho, Wo = _im2col_nhwc(xb[..., g * Cg:(g + 1) * Cg],
                                      k, k, stride, pad)
            patches.append(pg)
    a = jnp.stack(patches, axis=0)           # (2*groups, B*Ho*Wo, k*k*Cg) bf16

    y = pallas_matmul(a, w, bias, relu=relu)             # (2*groups, M, Og) bf16
    # Interleave groups into PyTorch channel order (group-major); bf16 traffic.
    y = y.reshape(2, groups, B, Ho, Wo, Og)
    y = y.transpose(0, 2, 3, 4, 1, 5).reshape(2 * B, Ho, Wo, groups * Og)
    return y


def maxpool3x3s2(x):  # NHWC, any float dtype (bf16 here)
    return jax.lax.reduce_window(
        x, jnp.array(-jnp.inf, x.dtype), jax.lax.max,
        window_dimensions=(1, 3, 3, 1),
        window_strides=(1, 2, 2, 1),
        padding="VALID")


def lrn(x, size=5, alpha=1e-4, beta=0.75, k=1.0):  # cross-channel LRN, NHWC
    C = x.shape[-1]
    half = size // 2
    xf = x.astype(jnp.float32)               # math in f32; HBM in/out stay bf16
    sq = jnp.pad(xf * xf, ((0, 0), (0, 0), (0, 0), (half, half)))
    s = sum(sq[..., i:i + C] for i in range(size))
    return (xf * (k + (alpha / size) * s) ** (-beta)).astype(x.dtype)


# ----------------------------------------------------------------------------
# CaffeNet (both branches at once) and GOTURN forward
# ----------------------------------------------------------------------------
# (name, kernel, stride, pad, groups) — standard Caffe AlexNet feature extractor
CONV_LAYERS = [
    ("conv1", 11, 4, 0, 1),
    ("conv2", 5, 1, 2, 2),
    ("conv3", 3, 1, 1, 1),
    ("conv4", 3, 1, 1, 2),
    ("conv5", 3, 1, 1, 2),
]

FULL_CFG = dict(input_size=227,
                channels=dict(conv1=96, conv2=256, conv3=384, conv4=384, conv5=256),
                fc_dim=4096)
SMALL_CFG = dict(input_size=67,
                 channels=dict(conv1=16, conv2=32, conv3=48, conv4=48, conv5=32),
                 fc_dim=256)


def caffenet_pair_forward(p, x2b):
    """x2b: (2B, S, S, 3) NHWC bf16 = concat([z, x], batch). Returns pool5 NHWC."""
    x = conv_pair(x2b, *p["conv1"], k=11, stride=4, pad=0, groups=1)
    x = lrn(maxpool3x3s2(x))
    x = conv_pair(x, *p["conv2"], k=5, stride=1, pad=2, groups=2)
    x = lrn(maxpool3x3s2(x))
    x = conv_pair(x, *p["conv3"], k=3, stride=1, pad=1, groups=1)
    x = conv_pair(x, *p["conv4"], k=3, stride=1, pad=1, groups=2)
    x = conv_pair(x, *p["conv5"], k=3, stride=1, pad=1, groups=2)
    x = maxpool3x3s2(x)
    return x


def goturn_forward(params, z, x):
    """z, x: (B, 3, S, S) NCHW float32 (PyTorch layout). Returns (B, 4) float32."""
    assert z.shape == x.shape and z.shape[1] == 3
    B = z.shape[0]
    # NCHW -> NHWC, single bf16 cast at the network input; everything stays bf16.
    z = jnp.transpose(z, (0, 2, 3, 1)).astype(jnp.bfloat16)
    x = jnp.transpose(x, (0, 2, 3, 1)).astype(jnp.bfloat16)
    x2b = jnp.concatenate([z, x], axis=0)             # (2B, S, S, 3)

    feat = caffenet_pair_forward(params["convs"], x2b)   # (2B, Hf, Wf, C5) bf16
    # PyTorch flattens NCHW; transpose back so fc6 sees the same feature order.
    feat = jnp.transpose(feat, (0, 3, 1, 2))          # (2B, C5, Hf, Wf)
    zf = feat[:B].reshape(B, -1)
    xf = feat[B:].reshape(B, -1)
    out = jnp.concatenate([zf, xf], axis=1)[None]     # (1, B, 2*C5*Hf*Wf) bf16

    # fc6/fc7/fc7b: Linear + ReLU (+ Dropout == identity in eval mode)
    out = pallas_matmul(out, *params["fc6"], relu=True)
    out = pallas_matmul(out, *params["fc7"], relu=True)
    out = pallas_matmul(out, *params["fc7b"], relu=True)
    out = pallas_matmul(out, *params["fc8"], relu=False, out_dtype=jnp.float32)
    return out[0]                                     # (B, 4) float32


# ----------------------------------------------------------------------------
# Deterministic parameter init: weights generated directly in im2col order and
# cast to bf16 ONCE here, at their EXACT sizes (no padding, no per-forward work).
# ----------------------------------------------------------------------------
def _caffenet_out_hw(S):
    s = (S - 11) // 4 + 1      # conv1
    s = (s - 3) // 2 + 1       # pool1
    s = (s - 3) // 2 + 1       # pool2 (conv2 is 'same')
    s = (s - 3) // 2 + 1       # pool5 (conv3/4/5 are 'same')
    return s


def init_params(key, cfg):
    chans = cfg["channels"]

    def conv_param(key, in_c, out_c, k, groups):
        Cg, Og = in_c // groups, out_c // groups
        K = k * k * Cg
        key, k1 = jax.random.split(key)
        # (2*groups, K, Og): branch-major (z then x), group-minor, im2col order.
        w = (jax.random.normal(k1, (2 * groups, K, Og), jnp.float32)
             * 0.01).astype(jnp.bfloat16)
        b = jnp.full((2 * groups, Og), 0.1, jnp.float32)
        return key, (w, b)

    def fc_param(key, fan_in, fan_out, std):
        key, k1 = jax.random.split(key)
        w = (jax.random.normal(k1, (1, fan_in, fan_out), jnp.float32)
             * std).astype(jnp.bfloat16)
        b = jnp.full((1, fan_out), 0.1, jnp.float32)
        return key, (w, b)

    params = {"convs": {}}
    in_c = 3
    for name, k, _s, _p, g in CONV_LAYERS:
        out_c = chans[name]
        key, params["convs"][name] = conv_param(key, in_c, out_c, k, g)
        in_c = out_c

    hf = _caffenet_out_hw(cfg["input_size"])
    fc6_in = 2 * chans["conv5"] * hf * hf
    fc = cfg["fc_dim"]
    key, params["fc6"] = fc_param(key, fc6_in, fc, 0.005)
    key, params["fc7"] = fc_param(key, fc, fc, 0.005)
    key, params["fc7b"] = fc_param(key, fc, fc, 0.005)
    key, params["fc8"] = fc_param(key, fc, 4, 0.01)
    return params


# ----------------------------------------------------------------------------
if __name__ == "__main__":
    # Scaled-down GOTURN (same structure, strides, groups; 67x67 input -> 1x1
    # pool5) so the end-to-end sandbox check finishes well inside the time
    # budget.  The full 227x227 network is FULL_CFG and uses the same kernels.
    cfg = SMALL_CFG

    root = jax.random.PRNGKey(0)
    kparam, kz, kx = jax.random.split(root, 3)
    params = init_params(kparam, cfg)

    B, S = 2, cfg["input_size"]
    z = jax.random.normal(kz, (B, 3, S, S), jnp.float32)
    x = jax.random.normal(kx, (B, 3, S, S), jnp.float32)

    fwd = jax.jit(goturn_forward)
    out = jax.block_until_ready(fwd(params, z, x))

    assert out.shape == (B, 4), out.shape
    assert bool(jnp.all(jnp.isfinite(out)))
    print("KERNEL_OK")
</pallas_src>

<mosaic_0001>
module attributes {stable_mosaic.version = 11 : i64} {
  func.func @_matmul_bias_kernel(%arg0: i32, %arg1: i32, %arg2: i32, %arg3: i32, %arg4: memref<1x450x363xbf16, #tpu.memory_space<vmem>>, %arg5: memref<1x363x16xbf16, #tpu.memory_space<vmem>>, %arg6: memref<1x1x16xf32, #tpu.memory_space<vmem>>, %arg7: memref<1x450x16xbf16, #tpu.memory_space<vmem>>, %arg8: memref<450x16xf32, #tpu.memory_space<vmem>>) attributes {dimension_semantics = [#tpu.dimension_semantics<parallel>, #tpu.dimension_semantics<parallel>, #tpu.dimension_semantics<parallel>, #tpu.dimension_semantics<arbitrary>], iteration_bounds = array<i64: 2, 1, 1, 1>, scalar_prefetch = 0 : i64, scratch_operands = 1 : i64, tpu.core_type = #tpu.core_type<tc>, window_params = [{transform_indices = @transform_0, window_bounds = array<i64: 1, 450, 363>}, {transform_indices = @transform_1, window_bounds = array<i64: 1, 363, 16>}, {transform_indices = @transform_2, window_bounds = array<i64: 1, 1, 16>}, {transform_indices = @transform_3, window_bounds = array<i64: 1, 450, 16>}]} {
    %c0_i32 = arith.constant 0 : i32
    %0 = arith.cmpi eq, %arg3, %c0_i32 : i32
    %1 = arith.extui %0 : i1 to i32
    %c0_i32_0 = arith.constant 0 : i32
    %2 = arith.cmpi ne, %1, %c0_i32_0 : i32
    scf.if %2 {
      %cst_12 = arith.constant 0.000000e+00 : f32
      %14 = vector.broadcast %cst_12 : f32 to vector<450x16xf32>
      %c0_13 = arith.constant 0 : index
      %c0_14 = arith.constant 0 : index
      %15 = vector.load %arg8[%c0_13, %c0_14] : memref<450x16xf32, #tpu.memory_space<vmem>>, vector<450x16xf32>
      tpu.vector_store %arg8[%c0_13, %c0_14], %14 {strides = array<i32>} : memref<450x16xf32, #tpu.memory_space<vmem>>, vector<450x16xf32>,
    } else {
    }
    %c0 = arith.constant 0 : index
    %c0_1 = arith.constant 0 : index
    %3 = vector.load %arg8[%c0, %c0_1] : memref<450x16xf32, #tpu.memory_space<vmem>>, vector<450x16xf32>
    %c0_2 = arith.constant 0 : index
    %c0_3 = arith.constant 0 : index
    %c0_4 = arith.constant 0 : index
    %4 = vector.load %arg4[%c0_2, %c0_3, %c0_4] : memref<1x450x363xbf16, #tpu.memory_space<vmem>>, vector<1x450x363xbf16>
    %5 = vector.shape_cast %4 : vector<1x450x363xbf16> to vector<450x363xbf16>
    %c0_5 = arith.constant 0 : index
    %c0_6 = arith.constant 0 : index
    %c0_7 = arith.constant 0 : index
    %6 = vector.load %arg5[%c0_5, %c0_6, %c0_7] : memref<1x363x16xbf16, #tpu.memory_space<vmem>>, vector<1x363x16xbf16>
    %7 = vector.shape_cast %6 : vector<1x363x16xbf16> to vector<363x16xbf16>
    %cst = arith.constant dense<0.000000e+00> : vector<450x16xf32>
    %8 = tpu.matmul %5, %7, %cst {dimension_numbers = #tpu.dot_dimension_numbers<[1], [0], [0], [1], [0, 0, 1, 1], [], []>} : vector<450x363xbf16>, vector<363x16xbf16>, vector<450x16xf32> -> vector<450x16xf32>
    %9 = arith.addf %3, %8 : vector<450x16xf32>
    %c0_8 = arith.constant 0 : index
    %c0_9 = arith.constant 0 : index
    %10 = vector.load %arg8[%c0_8, %c0_9] : memref<450x16xf32, #tpu.memory_space<vmem>>, vector<450x16xf32>
    tpu.vector_store %arg8[%c0_8, %c0_9], %9 {strides = array<i32>} : memref<450x16xf32, #tpu.memory_space<vmem>>, vector<450x16xf32>,
    %c0_i32_10 = arith.constant 0 : i32
    %11 = arith.cmpi eq, %arg3, %c0_i32_10 : i32
    %12 = arith.extui %11 : i1 to i32
    %c0_i32_11 = arith.constant 0 : i32
    %13 = arith.cmpi ne, %12, %c0_i32_11 : i32
    scf.if %13 {
      %c0_12 = arith.constant 0 : index
      %c0_13 = arith.constant 0 : index
      %14 = vector.load %arg8[%c0_12, %c0_13] : memref<450x16xf32, #tpu.memory_space<vmem>>, vector<450x16xf32>
      %c0_14 = arith.constant 0 : index
      %c0_15 = arith.constant 0 : index
      %c0_16 = arith.constant 0 : index
      %15 = vector.load %arg6[%c0_14, %c0_15, %c0_16] : memref<1x1x16xf32, #tpu.memory_space<vmem>>, vector<1x1x16xf32>
      %16 = vector.shape_cast %15 : vector<1x1x16xf32> to vector<1x16xf32>
      %17 = vector.broadcast %16 : vector<1x16xf32> to vector<450x16xf32>
      %18 = arith.addf %14, %17 : vector<450x16xf32>
      %cst_17 = arith.constant 0.000000e+00 : f32
      %19 = vector.broadcast %cst_17 : f32 to vector<450x16xf32>
      %20 = arith.maximumf %18, %19 : vector<450x16xf32>
      %21 = arith.truncf %20 : vector<450x16xf32> to vector<450x16xbf16>
      %c0_18 = arith.constant 0 : index
      %c0_19 = arith.constant 0 : index
      %c0_20 = arith.constant 0 : index
      %22 = vector.load %arg7[%c0_18, %c0_19, %c0_20] : memref<1x450x16xbf16, #tpu.memory_space<vmem>>, vector<1x450x16xbf16>
      %23 = vector.shape_cast %22 : vector<1x450x16xbf16> to vector<450x16xbf16>
      %24 = vector.shape_cast %21 : vector<450x16xbf16> to vector<1x450x16xbf16>
      tpu.vector_store %arg7[%c0_18, %c0_19, %c0_20], %24 {strides = array<i32>} : memref<1x450x16xbf16, #tpu.memory_space<vmem>>, vector<1x450x16xbf16>,
    } else {
    }
    return
  }
  func.func @transform_0(%arg0: i32, %arg1: i32, %arg2: i32, %arg3: i32) -> (i32, i32, i32) {
    %c0_i32 = arith.constant 0 : i32
    return %arg0, %arg1, %arg3 : i32, i32, i32
  }
  func.func @transform_1(%arg0: i32, %arg1: i32, %arg2: i32, %arg3: i32) -> (i32, i32, i32) {
    %c0_i32 = arith.constant 0 : i32
    return %arg0, %arg3, %arg2 : i32, i32, i32
  }
  func.func @transform_2(%arg0: i32, %arg1: i32, %arg2: i32, %arg3: i32) -> (i32, i32, i32) {
    %c0_i32 = arith.constant 0 : i32
    %c0_i32_0 = arith.constant 0 : i32
    return %arg0, %c0_i32, %arg2 : i32, i32, i32
  }
  func.func @transform_3(%arg0: i32, %arg1: i32, %arg2: i32, %arg3: i32) -> (i32, i32, i32) {
    %c0_i32 = arith.constant 0 : i32
    return %arg0, %arg1, %arg2 : i32, i32, i32
  }
}

module attributes {stable_mosaic.version = 11 : i64} {
  func.func @_matmul_bias_kernel(%arg0: i32, %arg1: i32, %arg2: i32, %arg3: i32, %arg4: memref<1x98x200xbf16, #tpu.memory_space<vmem>>, %arg5: memref<1x200x16xbf16, #tpu.memory_space<vmem>>, %arg6: memref<1x1x16xf32, #tpu.memory_space<vmem>>, %arg7: memref<1x98x16xbf16, #tpu.memory_space<vmem>>, %arg8: memref<98x16xf32, #tpu.memory_space<vmem>>) attributes {dimension_semantics = [#tpu.dimension_semantics<parallel>, #tpu.dimension_semantics<parallel>, #tpu.dimension_semantics<parallel>, #tpu.dimension_semantics<arbitrary>], iteration_bounds = array<i64: 4, 1, 1, 1>, scalar_prefetch = 0 : i64, scratch_operands = 1 : i64, tpu.core_type = #tpu.core_type<tc>, window_params = [{transform_indices = @transform_0, window_bounds = array<i64: 1, 98, 200>}, {transform_indices = @transform_1, window_bounds = array<i64: 1, 200, 16>}, {transform_indices = @transform_2, window_bounds = array<i64: 1, 1, 16>}, {transform_indices = @transform_3, window_bounds = array<i64: 1, 98, 16>}]} {
    %c0_i32 = arith.constant 0 : i32
    %0 = arith.cmpi eq, %arg3, %c0_i32 : i32
    %1 = arith.extui %0 : i1 to i32
    %c0_i32_0 = arith.constant 0 : i32
    %2 = arith.cmpi ne, %1, %c0_i32_0 : i32
    scf.if %2 {
      %cst_12 = arith.constant 0.000000e+00 : f32
      %14 = vector.broadcast %cst_12 : f32 to vector<98x16xf32>
      %c0_13 = arith.constant 0 : index
      %c0_14 = arith.constant 0 : index
      %15 = vector.load %arg8[%c0_13, %c0_14] : memref<98x16xf32, #tpu.memory_space<vmem>>, vector<98x16xf32>
      tpu.vector_store %arg8[%c0_13, %c0_14], %14 {strides = array<i32>} : memref<98x16xf32, #tpu.memory_space<vmem>>, vector<98x16xf32>,
    } else {
    }
    %c0 = arith.constant 0 : index
    %c0_1 = arith.constant 0 : index
    %3 = vector.load %arg8[%c0, %c0_1] : memref<98x16xf32, #tpu.memory_space<vmem>>, vector<98x16xf32>
    %c0_2 = arith.constant 0 : index
    %c0_3 = arith.constant 0 : index
    %c0_4 = arith.constant 0 : index
    %4 = vector.load %arg4[%c0_2, %c0_3, %c0_4] : memref<1x98x200xbf16, #tpu.memory_space<vmem>>, vector<1x98x200xbf16>
    %5 = vector.shape_cast %4 : vector<1x98x200xbf16> to vector<98x200xbf16>
    %c0_5 = arith.constant 0 : index
    %c0_6 = arith.constant 0 : index
    %c0_7 = arith.constant 0 : index
    %6 = vector.load %arg5[%c0_5, %c0_6, %c0_7] : memref<1x200x16xbf16, #tpu.memory_space<vmem>>, vector<1x200x16xbf16>
    %7 = vector.shape_cast %6 : vector<1x200x16xbf16> to vector<200x16xbf16>
    %cst = arith.constant dense<0.000000e+00> : vector<98x16xf32>
    %8 = tpu.matmul %5, %7, %cst {dimension_numbers = #tpu.dot_dimension_numbers<[1], [0], [0], [1], [0, 0, 1, 1], [], []>} : vector<98x200xbf16>, vector<200x16xbf16>, vector<98x16xf32> -> vector<98x16xf32>
    %9 = arith.addf %3, %8 : vector<98x16xf32>
    %c0_8 = arith.constant 0 : index
    %c0_9 = arith.constant 0 : index
    %10 = vector.load %arg8[%c0_8, %c0_9] : memref<98x16xf32, #tpu.memory_space<vmem>>, vector<98x16xf32>
    tpu.vector_store %arg8[%c0_8, %c0_9], %9 {strides = array<i32>} : memref<98x16xf32, #tpu.memory_space<vmem>>, vector<98x16xf32>,
    %c0_i32_10 = arith.constant 0 : i32
    %11 = arith.cmpi eq, %arg3, %c0_i32_10 : i32
    %12 = arith.extui %11 : i1 to i32
    %c0_i32_11 = arith.constant 0 : i32
    %13 = arith.cmpi ne, %12, %c0_i32_11 : i32
    scf.if %13 {
      %c0_12 = arith.constant 0 : index
      %c0_13 = arith.constant 0 : index
      %14 = vector.load %arg8[%c0_12, %c0_13] : memref<98x16xf32, #tpu.memory_space<vmem>>, vector<98x16xf32>
      %c0_14 = arith.constant 0 : index
      %c0_15 = arith.constant 0 : index
      %c0_16 = arith.constant 0 : index
      %15 = vector.load %arg6[%c0_14, %c0_15, %c0_16] : memref<1x1x16xf32, #tpu.memory_space<vmem>>, vector<1x1x16xf32>
      %16 = vector.shape_cast %15 : vector<1x1x16xf32> to vector<1x16xf32>
      %17 = vector.broadcast %16 : vector<1x16xf32> to vector<98x16xf32>
      %18 = arith.addf %14, %17 : vector<98x16xf32>
      %cst_17 = arith.constant 0.000000e+00 : f32
      %19 = vector.broadcast %cst_17 : f32 to vector<98x16xf32>
      %20 = arith.maximumf %18, %19 : vector<98x16xf32>
      %21 = arith.truncf %20 : vector<98x16xf32> to vector<98x16xbf16>
      %c0_18 = arith.constant 0 : index
      %c0_19 = arith.constant 0 : index
      %c0_20 = arith.constant 0 : index
      %22 = vector.load %arg7[%c0_18, %c0_19, %c0_20] : memref<1x98x16xbf16, #tpu.memory_space<vmem>>, vector<1x98x16xbf16>
      %23 = vector.shape_cast %22 : vector<1x98x16xbf16> to vector<98x16xbf16>
      %24 = vector.shape_cast %21 : vector<98x16xbf16> to vector<1x98x16xbf16>
      tpu.vector_store %arg7[%c0_18, %c0_19, %c0_20], %24 {strides = array<i32>} : memref<1x98x16xbf16, #tpu.memory_space<vmem>>, vector<1x98x16xbf16>,
    } else {
    }
    return
  }
  func.func @transform_0(%arg0: i32, %arg1: i32, %arg2: i32, %arg3: i32) -> (i32, i32, i32) {
    %c0_i32 = arith.constant 0 : i32
    return %arg0, %arg1, %arg3 : i32, i32, i32
  }
  func.func @transform_1(%arg0: i32, %arg1: i32, %arg2: i32, %arg3: i32) -> (i32, i32, i32) {
    %c0_i32 = arith.constant 0 : i32
    return %arg0, %arg3, %arg2 : i32, i32, i32
  }
  func.func @transform_2(%arg0: i32, %arg1: i32, %arg2: i32, %arg3: i32) -> (i32, i32, i32) {
    %c0_i32 = arith.constant 0 : i32
    %c0_i32_0 = arith.constant 0 : i32
    return %arg0, %c0_i32, %arg2 : i32, i32, i32
  }
  func.func @transform_3(%arg0: i32, %arg1: i32, %arg2: i32, %arg3: i32) -> (i32, i32, i32) {
    %c0_i32 = arith.constant 0 : i32
    return %arg0, %arg1, %arg2 : i32, i32, i32
  }
}

module attributes {stable_mosaic.version = 11 : i64} {
  func.func @_matmul_bias_kernel(%arg0: i32, %arg1: i32, %arg2: i32, %arg3: i32, %arg4: memref<1x18x288xbf16, #tpu.memory_space<vmem>>, %arg5: memref<1x288x48xbf16, #tpu.memory_space<vmem>>, %arg6: memref<1x1x48xf32, #tpu.memory_space<vmem>>, %arg7: memref<1x18x48xbf16, #tpu.memory_space<vmem>>, %arg8: memref<18x48xf32, #tpu.memory_space<vmem>>) attributes {dimension_semantics = [#tpu.dimension_semantics<parallel>, #tpu.dimension_semantics<parallel>, #tpu.dimension_semantics<parallel>, #tpu.dimension_semantics<arbitrary>], iteration_bounds = array<i64: 2, 1, 1, 1>, scalar_prefetch = 0 : i64, scratch_operands = 1 : i64, tpu.core_type = #tpu.core_type<tc>, window_params = [{transform_indices = @transform_0, window_bounds = array<i64: 1, 18, 288>}, {transform_indices = @transform_1, window_bounds = array<i64: 1, 288, 48>}, {transform_indices = @transform_2, window_bounds = array<i64: 1, 1, 48>}, {transform_indices = @transform_3, window_bounds = array<i64: 1, 18, 48>}]} {
    %c0_i32 = arith.constant 0 : i32
    %0 = arith.cmpi eq, %arg3, %c0_i32 : i32
    %1 = arith.extui %0 : i1 to i32
    %c0_i32_0 = arith.constant 0 : i32
    %2 = arith.cmpi ne, %1, %c0_i32_0 : i32
    scf.if %2 {
      %cst_12 = arith.constant 0.000000e+00 : f32
      %14 = vector.broadcast %cst_12 : f32 to vector<18x48xf32>
      %c0_13 = arith.constant 0 : index
      %c0_14 = arith.constant 0 : index
      %15 = vector.load %arg8[%c0_13, %c0_14] : memref<18x48xf32, #tpu.memory_space<vmem>>, vector<18x48xf32>
      tpu.vector_store %arg8[%c0_13, %c0_14], %14 {strides = array<i32>} : memref<18x48xf32, #tpu.memory_space<vmem>>, vector<18x48xf32>,
    } else {
    }
    %c0 = arith.constant 0 : index
    %c0_1 = arith.constant 0 : index
    %3 = vector.load %arg8[%c0, %c0_1] : memref<18x48xf32, #tpu.memory_space<vmem>>, vector<18x48xf32>
    %c0_2 = arith.constant 0 : index
    %c0_3 = arith.constant 0 : index
    %c0_4 = arith.constant 0 : index
    %4 = vector.load %arg4[%c0_2, %c0_3, %c0_4] : memref<1x18x288xbf16, #tpu.memory_space<vmem>>, vector<1x18x288xbf16>
    %5 = vector.shape_cast %4 : vector<1x18x288xbf16> to vector<18x288xbf16>
    %c0_5 = arith.constant 0 : index
    %c0_6 = arith.constant 0 : index
    %c0_7 = arith.constant 0 : index
    %6 = vector.load %arg5[%c0_5, %c0_6, %c0_7] : memref<1x288x48xbf16, #tpu.memory_space<vmem>>, vector<1x288x48xbf16>
    %7 = vector.shape_cast %6 : vector<1x288x48xbf16> to vector<288x48xbf16>
    %cst = arith.constant dense<0.000000e+00> : vector<18x48xf32>
    %8 = tpu.matmul %5, %7, %cst {dimension_numbers = #tpu.dot_dimension_numbers<[1], [0], [0], [1], [0, 0, 1, 1], [], []>} : vector<18x288xbf16>, vector<288x48xbf16>, vector<18x48xf32> -> vector<18x48xf32>
    %9 = arith.addf %3, %8 : vector<18x48xf32>
    %c0_8 = arith.constant 0 : index
    %c0_9 = arith.constant 0 : index
    %10 = vector.load %arg8[%c0_8, %c0_9] : memref<18x48xf32, #tpu.memory_space<vmem>>, vector<18x48xf32>
    tpu.vector_store %arg8[%c0_8, %c0_9], %9 {strides = array<i32>} : memref<18x48xf32, #tpu.memory_space<vmem>>, vector<18x48xf32>,
    %c0_i32_10 = arith.constant 0 : i32
    %11 = arith.cmpi eq, %arg3, %c0_i32_10 : i32
    %12 = arith.extui %11 : i1 to i32
    %c0_i32_11 = arith.constant 0 : i32
    %13 = arith.cmpi ne, %12, %c0_i32_11 : i32
    scf.if %13 {
      %c0_12 = arith.constant 0 : index
      %c0_13 = arith.constant 0 : index
      %14 = vector.load %arg8[%c0_12, %c0_13] : memref<18x48xf32, #tpu.memory_space<vmem>>, vector<18x48xf32>
      %c0_14 = arith.constant 0 : index
      %c0_15 = arith.constant 0 : index
      %c0_16 = arith.constant 0 : index
      %15 = vector.load %arg6[%c0_14, %c0_15, %c0_16] : memref<1x1x48xf32, #tpu.memory_space<vmem>>, vector<1x1x48xf32>
      %16 = vector.shape_cast %15 : vector<1x1x48xf32> to vector<1x48xf32>
      %17 = vector.broadcast %16 : vector<1x48xf32> to vector<18x48xf32>
      %18 = arith.addf %14, %17 : vector<18x48xf32>
      %cst_17 = arith.constant 0.000000e+00 : f32
      %19 = vector.broadcast %cst_17 : f32 to vector<18x48xf32>
      %20 = arith.maximumf %18, %19 : vector<18x48xf32>
      %21 = arith.truncf %20 : vector<18x48xf32> to vector<18x48xbf16>
      %c0_18 = arith.constant 0 : index
      %c0_19 = arith.constant 0 : index
      %c0_20 = arith.constant 0 : index
      %22 = vector.load %arg7[%c0_18, %c0_19, %c0_20] : memref<1x18x48xbf16, #tpu.memory_space<vmem>>, vector<1x18x48xbf16>
      %23 = vector.shape_cast %22 : vector<1x18x48xbf16> to vector<18x48xbf16>
      %24 = vector.shape_cast %21 : vector<18x48xbf16> to vector<1x18x48xbf16>
      tpu.vector_store %arg7[%c0_18, %c0_19, %c0_20], %24 {strides = array<i32>} : memref<1x18x48xbf16, #tpu.memory_space<vmem>>, vector<1x18x48xbf16>,
    } else {
    }
    return
  }
  func.func @transform_0(%arg0: i32, %arg1: i32, %arg2: i32, %arg3: i32) -> (i32, i32, i32) {
    %c0_i32 = arith.constant 0 : i32
    return %arg0, %arg1, %arg3 : i32, i32, i32
  }
  func.func @transform_1(%arg0: i32, %arg1: i32, %arg2: i32, %arg3: i32) -> (i32, i32, i32) {
    %c0_i32 = arith.constant 0 : i32
    return %arg0, %arg3, %arg2 : i32, i32, i32
  }
  func.func @transform_2(%arg0: i32, %arg1: i32, %arg2: i32, %arg3: i32) -> (i32, i32, i32) {
    %c0_i32 = arith.constant 0 : i32
    %c0_i32_0 = arith.constant 0 : i32
    return %arg0, %c0_i32, %arg2 : i32, i32, i32
  }
  func.func @transform_3(%arg0: i32, %arg1: i32, %arg2: i32, %arg3: i32) -> (i32, i32, i32) {
    %c0_i32 = arith.constant 0 : i32
    return %arg0, %arg1, %arg2 : i32, i32, i32
  }
}

module attributes {stable_mosaic.version = 11 : i64} {
  func.func @_matmul_bias_kernel(%arg0: i32, %arg1: i32, %arg2: i32, %arg3: i32, %arg4: memref<1x18x216xbf16, #tpu.memory_space<vmem>>, %arg5: memref<1x216x24xbf16, #tpu.memory_space<vmem>>, %arg6: memref<1x1x24xf32, #tpu.memory_space<vmem>>, %arg7: memref<1x18x24xbf16, #tpu.memory_space<vmem>>, %arg8: memref<18x24xf32, #tpu.memory_space<vmem>>) attributes {dimension_semantics = [#tpu.dimension_semantics<parallel>, #tpu.dimension_semantics<parallel>, #tpu.dimension_semantics<parallel>, #tpu.dimension_semantics<arbitrary>], iteration_bounds = array<i64: 4, 1, 1, 1>, scalar_prefetch = 0 : i64, scratch_operands = 1 : i64, tpu.core_type = #tpu.core_type<tc>, window_params = [{transform_indices = @transform_0, window_bounds = array<i64: 1, 18, 216>}, {transform_indices = @transform_1, window_bounds = array<i64: 1, 216, 24>}, {transform_indices = @transform_2, window_bounds = array<i64: 1, 1, 24>}, {transform_indices = @transform_3, window_bounds = array<i64: 1, 18, 24>}]} {
    %c0_i32 = arith.constant 0 : i32
    %0 = arith.cmpi eq, %arg3, %c0_i32 : i32
    %1 = arith.extui %0 : i1 to i32
    %c0_i32_0 = arith.constant 0 : i32
    %2 = arith.cmpi ne, %1, %c0_i32_0 : i32
    scf.if %2 {
      %cst_12 = arith.constant 0.000000e+00 : f32
      %14 = vector.broadcast %cst_12 : f32 to vector<18x24xf32>
      %c0_13 = arith.constant 0 : index
      %c0_14 = arith.constant 0 : index
      %15 = vector.load %arg8[%c0_13, %c0_14] : memref<18x24xf32, #tpu.memory_space<vmem>>, vector<18x24xf32>
      tpu.vector_store %arg8[%c0_13, %c0_14], %14 {strides = array<i32>} : memref<18x24xf32, #tpu.memory_space<vmem>>, vector<18x24xf32>,
    } else {
    }
    %c0 = arith.constant 0 : index
    %c0_1 = arith.constant 0 : index
    %3 = vector.load %arg8[%c0, %c0_1] : memref<18x24xf32, #tpu.memory_space<vmem>>, vector<18x24xf32>
    %c0_2 = arith.constant 0 : index
    %c0_3 = arith.constant 0 : index
    %c0_4 = arith.constant 0 : index
    %4 = vector.load %arg4[%c0_2, %c0_3, %c0_4] : memref<1x18x216xbf16, #tpu.memory_space<vmem>>, vector<1x18x216xbf16>
    %5 = vector.shape_cast %4 : vector<1x18x216xbf16> to vector<18x216xbf16>
    %c0_5 = arith.constant 0 : index
    %c0_6 = arith.constant 0 : index
    %c0_7 = arith.constant 0 : index
    %6 = vector.load %arg5[%c0_5, %c0_6, %c0_7] : memref<1x216x24xbf16, #tpu.memory_space<vmem>>, vector<1x216x24xbf16>
    %7 = vector.shape_cast %6 : vector<1x216x24xbf16> to vector<216x24xbf16>
    %cst = arith.constant dense<0.000000e+00> : vector<18x24xf32>
    %8 = tpu.matmul %5, %7, %cst {dimension_numbers = #tpu.dot_dimension_numbers<[1], [0], [0], [1], [0, 0, 1, 1], [], []>} : vector<18x216xbf16>, vector<216x24xbf16>, vector<18x24xf32> -> vector<18x24xf32>
    %9 = arith.addf %3, %8 : vector<18x24xf32>
    %c0_8 = arith.constant 0 : index
    %c0_9 = arith.constant 0 : index
    %10 = vector.load %arg8[%c0_8, %c0_9] : memref<18x24xf32, #tpu.memory_space<vmem>>, vector<18x24xf32>
    tpu.vector_store %arg8[%c0_8, %c0_9], %9 {strides = array<i32>} : memref<18x24xf32, #tpu.memory_space<vmem>>, vector<18x24xf32>,
    %c0_i32_10 = arith.constant 0 : i32
    %11 = arith.cmpi eq, %arg3, %c0_i32_10 : i32
    %12 = arith.extui %11 : i1 to i32
    %c0_i32_11 = arith.constant 0 : i32
    %13 = arith.cmpi ne, %12, %c0_i32_11 : i32
    scf.if %13 {
      %c0_12 = arith.constant 0 : index
      %c0_13 = arith.constant 0 : index
      %14 = vector.load %arg8[%c0_12, %c0_13] : memref<18x24xf32, #tpu.memory_space<vmem>>, vector<18x24xf32>
      %c0_14 = arith.constant 0 : index
      %c0_15 = arith.constant 0 : index
      %c0_16 = arith.constant 0 : index
      %15 = vector.load %arg6[%c0_14, %c0_15, %c0_16] : memref<1x1x24xf32, #tpu.memory_space<vmem>>, vector<1x1x24xf32>
      %16 = vector.shape_cast %15 : vector<1x1x24xf32> to vector<1x24xf32>
      %17 = vector.broadcast %16 : vector<1x24xf32> to vector<18x24xf32>
      %18 = arith.addf %14, %17 : vector<18x24xf32>
      %cst_17 = arith.constant 0.000000e+00 : f32
      %19 = vector.broadcast %cst_17 : f32 to vector<18x24xf32>
      %20 = arith.maximumf %18, %19 : vector<18x24xf32>
      %21 = arith.truncf %20 : vector<18x24xf32> to vector<18x24xbf16>
      %c0_18 = arith.constant 0 : index
      %c0_19 = arith.constant 0 : index
      %c0_20 = arith.constant 0 : index
      %22 = vector.load %arg7[%c0_18, %c0_19, %c0_20] : memref<1x18x24xbf16, #tpu.memory_space<vmem>>, vector<1x18x24xbf16>
      %23 = vector.shape_cast %22 : vector<1x18x24xbf16> to vector<18x24xbf16>
      %24 = vector.shape_cast %21 : vector<18x24xbf16> to vector<1x18x24xbf16>
      tpu.vector_store %arg7[%c0_18, %c0_19, %c0_20], %24 {strides = array<i32>} : memref<1x18x24xbf16, #tpu.memory_space<vmem>>, vector<1x18x24xbf16>,
    } else {
    }
    return
  }
  func.func @transform_0(%arg0: i32, %arg1: i32, %arg2: i32, %arg3: i32) -> (i32, i32, i32) {
    %c0_i32 = arith.constant 0 : i32
    return %arg0, %arg1, %arg3 : i32, i32, i32
  }
  func.func @transform_1(%arg0: i32, %arg1: i32, %arg2: i32, %arg3: i32) -> (i32, i32, i32) {
    %c0_i32 = arith.constant 0 : i32
    return %arg0, %arg3, %arg2 : i32, i32, i32
  }
  func.func @transform_2(%arg0: i32, %arg1: i32, %arg2: i32, %arg3: i32) -> (i32, i32, i32) {
    %c0_i32 = arith.constant 0 : i32
    %c0_i32_0 = arith.constant 0 : i32
    return %arg0, %c0_i32, %arg2 : i32, i32, i32
  }
  func.func @transform_3(%arg0: i32, %arg1: i32, %arg2: i32, %arg3: i32) -> (i32, i32, i32) {
    %c0_i32 = arith.constant 0 : i32
    return %arg0, %arg1, %arg2 : i32, i32, i32
  }
}

module attributes {stable_mosaic.version = 11 : i64} {
  func.func @_matmul_bias_kernel(%arg0: i32, %arg1: i32, %arg2: i32, %arg3: i32, %arg4: memref<1x18x216xbf16, #tpu.memory_space<vmem>>, %arg5: memref<1x216x16xbf16, #tpu.memory_space<vmem>>, %arg6: memref<1x1x16xf32, #tpu.memory_space<vmem>>, %arg7: memref<1x18x16xbf16, #tpu.memory_space<vmem>>, %arg8: memref<18x16xf32, #tpu.memory_space<vmem>>) attributes {dimension_semantics = [#tpu.dimension_semantics<parallel>, #tpu.dimension_semantics<parallel>, #tpu.dimension_semantics<parallel>, #tpu.dimension_semantics<arbitrary>], iteration_bounds = array<i64: 4, 1, 1, 1>, scalar_prefetch = 0 : i64, scratch_operands = 1 : i64, tpu.core_type = #tpu.core_type<tc>, window_params = [{transform_indices = @transform_0, window_bounds = array<i64: 1, 18, 216>}, {transform_indices = @transform_1, window_bounds = array<i64: 1, 216, 16>}, {transform_indices = @transform_2, window_bounds = array<i64: 1, 1, 16>}, {transform_indices = @transform_3, window_bounds = array<i64: 1, 18, 16>}]} {
    %c0_i32 = arith.constant 0 : i32
    %0 = arith.cmpi eq, %arg3, %c0_i32 : i32
    %1 = arith.extui %0 : i1 to i32
    %c0_i32_0 = arith.constant 0 : i32
    %2 = arith.cmpi ne, %1, %c0_i32_0 : i32
    scf.if %2 {
      %cst_12 = arith.constant 0.000000e+00 : f32
      %14 = vector.broadcast %cst_12 : f32 to vector<18x16xf32>
      %c0_13 = arith.constant 0 : index
      %c0_14 = arith.constant 0 : index
      %15 = vector.load %arg8[%c0_13, %c0_14] : memref<18x16xf32, #tpu.memory_space<vmem>>, vector<18x16xf32>
      tpu.vector_store %arg8[%c0_13, %c0_14], %14 {strides = array<i32>} : memref<18x16xf32, #tpu.memory_space<vmem>>, vector<18x16xf32>,
    } else {
    }
    %c0 = arith.constant 0 : index
    %c0_1 = arith.constant 0 : index
    %3 = vector.load %arg8[%c0, %c0_1] : memref<18x16xf32, #tpu.memory_space<vmem>>, vector<18x16xf32>
    %c0_2 = arith.constant 0 : index
    %c0_3 = arith.constant 0 : index
    %c0_4 = arith.constant 0 : index
    %4 = vector.load %arg4[%c0_2, %c0_3, %c0_4] : memref<1x18x216xbf16, #tpu.memory_space<vmem>>, vector<1x18x216xbf16>
    %5 = vector.shape_cast %4 : vector<1x18x216xbf16> to vector<18x216xbf16>
    %c0_5 = arith.constant 0 : index
    %c0_6 = arith.constant 0 : index
    %c0_7 = arith.constant 0 : index
    %6 = vector.load %arg5[%c0_5, %c0_6, %c0_7] : memref<1x216x16xbf16, #tpu.memory_space<vmem>>, vector<1x216x16xbf16>
    %7 = vector.shape_cast %6 : vector<1x216x16xbf16> to vector<216x16xbf16>
    %cst = arith.constant dense<0.000000e+00> : vector<18x16xf32>
    %8 = tpu.matmul %5, %7, %cst {dimension_numbers = #tpu.dot_dimension_numbers<[1], [0], [0], [1], [0, 0, 1, 1], [], []>} : vector<18x216xbf16>, vector<216x16xbf16>, vector<18x16xf32> -> vector<18x16xf32>
    %9 = arith.addf %3, %8 : vector<18x16xf32>
    %c0_8 = arith.constant 0 : index
    %c0_9 = arith.constant 0 : index
    %10 = vector.load %arg8[%c0_8, %c0_9] : memref<18x16xf32, #tpu.memory_space<vmem>>, vector<18x16xf32>
    tpu.vector_store %arg8[%c0_8, %c0_9], %9 {strides = array<i32>} : memref<18x16xf32, #tpu.memory_space<vmem>>, vector<18x16xf32>,
    %c0_i32_10 = arith.constant 0 : i32
    %11 = arith.cmpi eq, %arg3, %c0_i32_10 : i32
    %12 = arith.extui %11 : i1 to i32
    %c0_i32_11 = arith.constant 0 : i32
    %13 = arith.cmpi ne, %12, %c0_i32_11 : i32
    scf.if %13 {
      %c0_12 = arith.constant 0 : index
      %c0_13 = arith.constant 0 : index
      %14 = vector.load %arg8[%c0_12, %c0_13] : memref<18x16xf32, #tpu.memory_space<vmem>>, vector<18x16xf32>
      %c0_14 = arith.constant 0 : index
      %c0_15 = arith.constant 0 : index
      %c0_16 = arith.constant 0 : index
      %15 = vector.load %arg6[%c0_14, %c0_15, %c0_16] : memref<1x1x16xf32, #tpu.memory_space<vmem>>, vector<1x1x16xf32>
      %16 = vector.shape_cast %15 : vector<1x1x16xf32> to vector<1x16xf32>
      %17 = vector.broadcast %16 : vector<1x16xf32> to vector<18x16xf32>
      %18 = arith.addf %14, %17 : vector<18x16xf32>
      %cst_17 = arith.constant 0.000000e+00 : f32
      %19 = vector.broadcast %cst_17 : f32 to vector<18x16xf32>
      %20 = arith.maximumf %18, %19 : vector<18x16xf32>
      %21 = arith.truncf %20 : vector<18x16xf32> to vector<18x16xbf16>
      %c0_18 = arith.constant 0 : index
      %c0_19 = arith.constant 0 : index
      %c0_20 = arith.constant 0 : index
      %22 = vector.load %arg7[%c0_18, %c0_19, %c0_20] : memref<1x18x16xbf16, #tpu.memory_space<vmem>>, vector<1x18x16xbf16>
      %23 = vector.shape_cast %22 : vector<1x18x16xbf16> to vector<18x16xbf16>
      %24 = vector.shape_cast %21 : vector<18x16xbf16> to vector<1x18x16xbf16>
      tpu.vector_store %arg7[%c0_18, %c0_19, %c0_20], %24 {strides = array<i32>} : memref<1x18x16xbf16, #tpu.memory_space<vmem>>, vector<1x18x16xbf16>,
    } else {
    }
    return
  }
  func.func @transform_0(%arg0: i32, %arg1: i32, %arg2: i32, %arg3: i32) -> (i32, i32, i32) {
    %c0_i32 = arith.constant 0 : i32
    return %arg0, %arg1, %arg3 : i32, i32, i32
  }
  func.func @transform_1(%arg0: i32, %arg1: i32, %arg2: i32, %arg3: i32) -> (i32, i32, i32) {
    %c0_i32 = arith.constant 0 : i32
    return %arg0, %arg3, %arg2 : i32, i32, i32
  }
  func.func @transform_2(%arg0: i32, %arg1: i32, %arg2: i32, %arg3: i32) -> (i32, i32, i32) {
    %c0_i32 = arith.constant 0 : i32
    %c0_i32_0 = arith.constant 0 : i32
    return %arg0, %c0_i32, %arg2 : i32, i32, i32
  }
  func.func @transform_3(%arg0: i32, %arg1: i32, %arg2: i32, %arg3: i32) -> (i32, i32, i32) {
    %c0_i32 = arith.constant 0 : i32
    return %arg0, %arg1, %arg2 : i32, i32, i32
  }
}

module attributes {stable_mosaic.version = 11 : i64} {
  func.func @_matmul_bias_kernel(%arg0: i32, %arg1: i32, %arg2: i32, %arg3: i32, %arg4: memref<1x2x256xbf16, #tpu.memory_space<vmem>>, %arg5: memref<1x256x128xbf16, #tpu.memory_space<vmem>>, %arg6: memref<1x1x128xf32, #tpu.memory_space<vmem>>, %arg7: memref<1x2x128xbf16, #tpu.memory_space<vmem>>, %arg8: memref<2x128xf32, #tpu.memory_space<vmem>>) attributes {dimension_semantics = [#tpu.dimension_semantics<parallel>, #tpu.dimension_semantics<parallel>, #tpu.dimension_semantics<parallel>, #tpu.dimension_semantics<arbitrary>], iteration_bounds = array<i64: 1, 1, 2, 1>, scalar_prefetch = 0 : i64, scratch_operands = 1 : i64, tpu.core_type = #tpu.core_type<tc>, window_params = [{transform_indices = @transform_0, window_bounds = array<i64: 1, 2, 256>}, {transform_indices = @transform_1, window_bounds = array<i64: 1, 256, 128>}, {transform_indices = @transform_2, window_bounds = array<i64: 1, 1, 128>}, {transform_indices = @transform_3, window_bounds = array<i64: 1, 2, 128>}]} {
    %c0_i32 = arith.constant 0 : i32
    %0 = arith.cmpi eq, %arg3, %c0_i32 : i32
    %1 = arith.extui %0 : i1 to i32
    %c0_i32_0 = arith.constant 0 : i32
    %2 = arith.cmpi ne, %1, %c0_i32_0 : i32
    scf.if %2 {
      %cst_12 = arith.constant 0.000000e+00 : f32
      %14 = vector.broadcast %cst_12 : f32 to vector<2x128xf32>
      %c0_13 = arith.constant 0 : index
      %c0_14 = arith.constant 0 : index
      %15 = vector.load %arg8[%c0_13, %c0_14] : memref<2x128xf32, #tpu.memory_space<vmem>>, vector<2x128xf32>
      tpu.vector_store %arg8[%c0_13, %c0_14], %14 {strides = array<i32>} : memref<2x128xf32, #tpu.memory_space<vmem>>, vector<2x128xf32>,
    } else {
    }
    %c0 = arith.constant 0 : index
    %c0_1 = arith.constant 0 : index
    %3 = vector.load %arg8[%c0, %c0_1] : memref<2x128xf32, #tpu.memory_space<vmem>>, vector<2x128xf32>
    %c0_2 = arith.constant 0 : index
    %c0_3 = arith.constant 0 : index
    %c0_4 = arith.constant 0 : index
    %4 = vector.load %arg4[%c0_2, %c0_3, %c0_4] : memref<1x2x256xbf16, #tpu.memory_space<vmem>>, vector<1x2x256xbf16>
    %5 = vector.shape_cast %4 : vector<1x2x256xbf16> to vector<2x256xbf16>
    %c0_5 = arith.constant 0 : index
    %c0_6 = arith.constant 0 : index
    %c0_7 = arith.constant 0 : index
    %6 = vector.load %arg5[%c0_5, %c0_6, %c0_7] : memref<1x256x128xbf16, #tpu.memory_space<vmem>>, vector<1x256x128xbf16>
    %7 = vector.shape_cast %6 : vector<1x256x128xbf16> to vector<256x128xbf16>
    %cst = arith.constant dense<0.000000e+00> : vector<2x128xf32>
    %8 = tpu.matmul %5, %7, %cst {dimension_numbers = #tpu.dot_dimension_numbers<[1], [0], [0], [1], [0, 0, 1, 1], [], []>} : vector<2x256xbf16>, vector<256x128xbf16>, vector<2x128xf32> -> vector<2x128xf32>
    %9 = arith.addf %3, %8 : vector<2x128xf32>
    %c0_8 = arith.constant 0 : index
    %c0_9 = arith.constant 0 : index
    %10 = vector.load %arg8[%c0_8, %c0_9] : memref<2x128xf32, #tpu.memory_space<vmem>>, vector<2x128xf32>
    tpu.vector_store %arg8[%c0_8, %c0_9], %9 {strides = array<i32>} : memref<2x128xf32, #tpu.memory_space<vmem>>, vector<2x128xf32>,
    %c0_i32_10 = arith.constant 0 : i32
    %11 = arith.cmpi eq, %arg3, %c0_i32_10 : i32
    %12 = arith.extui %11 : i1 to i32
    %c0_i32_11 = arith.constant 0 : i32
    %13 = arith.cmpi ne, %12, %c0_i32_11 : i32
    scf.if %13 {
      %c0_12 = arith.constant 0 : index
      %c0_13 = arith.constant 0 : index
      %14 = vector.load %arg8[%c0_12, %c0_13] : memref<2x128xf32, #tpu.memory_space<vmem>>, vector<2x128xf32>
      %c0_14 = arith.constant 0 : index
      %c0_15 = arith.constant 0 : index
      %c0_16 = arith.constant 0 : index
      %15 = vector.load %arg6[%c0_14, %c0_15, %c0_16] : memref<1x1x128xf32, #tpu.memory_space<vmem>>, vector<1x1x128xf32>
      %16 = vector.shape_cast %15 : vector<1x1x128xf32> to vector<1x128xf32>
      %17 = vector.broadcast %16 : vector<1x128xf32> to vector<2x128xf32>
      %18 = arith.addf %14, %17 : vector<2x128xf32>
      %cst_17 = arith.constant 0.000000e+00 : f32
      %19 = vector.broadcast %cst_17 : f32 to vector<2x128xf32>
      %20 = arith.maximumf %18, %19 : vector<2x128xf32>
      %21 = arith.truncf %20 : vector<2x128xf32> to vector<2x128xbf16>
      %c0_18 = arith.constant 0 : index
      %c0_19 = arith.constant 0 : index
      %c0_20 = arith.constant 0 : index
      %22 = vector.load %arg7[%c0_18, %c0_19, %c0_20] : memref<1x2x128xbf16, #tpu.memory_space<vmem>>, vector<1x2x128xbf16>
      %23 = vector.shape_cast %22 : vector<1x2x128xbf16> to vector<2x128xbf16>
      %24 = vector.shape_cast %21 : vector<2x128xbf16> to vector<1x2x128xbf16>
      tpu.vector_store %arg7[%c0_18, %c0_19, %c0_20], %24 {strides = array<i32>} : memref<1x2x128xbf16, #tpu.memory_space<vmem>>, vector<1x2x128xbf16>,
    } else {
    }
    return
  }
  func.func @transform_0(%arg0: i32, %arg1: i32, %arg2: i32, %arg3: i32) -> (i32, i32, i32) {
    %c0_i32 = arith.constant 0 : i32
    return %arg0, %arg1, %arg3 : i32, i32, i32
  }
  func.func @transform_1(%arg0: i32, %arg1: i32, %arg2: i32, %arg3: i32) -> (i32, i32, i32) {
    %c0_i32 = arith.constant 0 : i32
    return %arg0, %arg3, %arg2 : i32, i32, i32
  }
  func.func @transform_2(%arg0: i32, %arg1: i32, %arg2: i32, %arg3: i32) -> (i32, i32, i32) {
    %c0_i32 = arith.constant 0 : i32
    %c0_i32_0 = arith.constant 0 : i32
    return %arg0, %c0_i32, %arg2 : i32, i32, i32
  }
  func.func @transform_3(%arg0: i32, %arg1: i32, %arg2: i32, %arg3: i32) -> (i32, i32, i32) {
    %c0_i32 = arith.constant 0 : i32
    return %arg0, %arg1, %arg2 : i32, i32, i32
  }
}

module attributes {stable_mosaic.version = 11 : i64} {
  func.func @_matmul_bias_kernel(%arg0: i32, %arg1: i32, %arg2: i32, %arg3: i32, %arg4: memref<1x2x64xbf16, #tpu.memory_space<vmem>>, %arg5: memref<1x64x128xbf16, #tpu.memory_space<vmem>>, %arg6: memref<1x1x128xf32, #tpu.memory_space<vmem>>, %arg7: memref<1x2x128xbf16, #tpu.memory_space<vmem>>, %arg8: memref<2x128xf32, #tpu.memory_space<vmem>>) attributes {dimension_semantics = [#tpu.dimension_semantics<parallel>, #tpu.dimension_semantics<parallel>, #tpu.dimension_semantics<parallel>, #tpu.dimension_semantics<arbitrary>], iteration_bounds = array<i64: 1, 1, 2, 1>, scalar_prefetch = 0 : i64, scratch_operands = 1 : i64, tpu.core_type = #tpu.core_type<tc>, window_params = [{transform_indices = @transform_0, window_bounds = array<i64: 1, 2, 64>}, {transform_indices = @transform_1, window_bounds = array<i64: 1, 64, 128>}, {transform_indices = @transform_2, window_bounds = array<i64: 1, 1, 128>}, {transform_indices = @transform_3, window_bounds = array<i64: 1, 2, 128>}]} {
    %c0_i32 = arith.constant 0 : i32
    %0 = arith.cmpi eq, %arg3, %c0_i32 : i32
    %1 = arith.extui %0 : i1 to i32
    %c0_i32_0 = arith.constant 0 : i32
    %2 = arith.cmpi ne, %1, %c0_i32_0 : i32
    scf.if %2 {
      %cst_12 = arith.constant 0.000000e+00 : f32
      %14 = vector.broadcast %cst_12 : f32 to vector<2x128xf32>
      %c0_13 = arith.constant 0 : index
      %c0_14 = arith.constant 0 : index
      %15 = vector.load %arg8[%c0_13, %c0_14] : memref<2x128xf32, #tpu.memory_space<vmem>>, vector<2x128xf32>
      tpu.vector_store %arg8[%c0_13, %c0_14], %14 {strides = array<i32>} : memref<2x128xf32, #tpu.memory_space<vmem>>, vector<2x128xf32>,
    } else {
    }
    %c0 = arith.constant 0 : index
    %c0_1 = arith.constant 0 : index
    %3 = vector.load %arg8[%c0, %c0_1] : memref<2x128xf32, #tpu.memory_space<vmem>>, vector<2x128xf32>
    %c0_2 = arith.constant 0 : index
    %c0_3 = arith.constant 0 : index
    %c0_4 = arith.constant 0 : index
    %4 = vector.load %arg4[%c0_2, %c0_3, %c0_4] : memref<1x2x64xbf16, #tpu.memory_space<vmem>>, vector<1x2x64xbf16>
    %5 = vector.shape_cast %4 : vector<1x2x64xbf16> to vector<2x64xbf16>
    %c0_5 = arith.constant 0 : index
    %c0_6 = arith.constant 0 : index
    %c0_7 = arith.constant 0 : index
    %6 = vector.load %arg5[%c0_5, %c0_6, %c0_7] : memref<1x64x128xbf16, #tpu.memory_space<vmem>>, vector<1x64x128xbf16>
    %7 = vector.shape_cast %6 : vector<1x64x128xbf16> to vector<64x128xbf16>
    %cst = arith.constant dense<0.000000e+00> : vector<2x128xf32>
    %8 = tpu.matmul %5, %7, %cst {dimension_numbers = #tpu.dot_dimension_numbers<[1], [0], [0], [1], [0, 0, 1, 1], [], []>} : vector<2x64xbf16>, vector<64x128xbf16>, vector<2x128xf32> -> vector<2x128xf32>
    %9 = arith.addf %3, %8 : vector<2x128xf32>
    %c0_8 = arith.constant 0 : index
    %c0_9 = arith.constant 0 : index
    %10 = vector.load %arg8[%c0_8, %c0_9] : memref<2x128xf32, #tpu.memory_space<vmem>>, vector<2x128xf32>
    tpu.vector_store %arg8[%c0_8, %c0_9], %9 {strides = array<i32>} : memref<2x128xf32, #tpu.memory_space<vmem>>, vector<2x128xf32>,
    %c0_i32_10 = arith.constant 0 : i32
    %11 = arith.cmpi eq, %arg3, %c0_i32_10 : i32
    %12 = arith.extui %11 : i1 to i32
    %c0_i32_11 = arith.constant 0 : i32
    %13 = arith.cmpi ne, %12, %c0_i32_11 : i32
    scf.if %13 {
      %c0_12 = arith.constant 0 : index
      %c0_13 = arith.constant 0 : index
      %14 = vector.load %arg8[%c0_12, %c0_13] : memref<2x128xf32, #tpu.memory_space<vmem>>, vector<2x128xf32>
      %c0_14 = arith.constant 0 : index
      %c0_15 = arith.constant 0 : index
      %c0_16 = arith.constant 0 : index
      %15 = vector.load %arg6[%c0_14, %c0_15, %c0_16] : memref<1x1x128xf32, #tpu.memory_space<vmem>>, vector<1x1x128xf32>
      %16 = vector.shape_cast %15 : vector<1x1x128xf32> to vector<1x128xf32>
      %17 = vector.broadcast %16 : vector<1x128xf32> to vector<2x128xf32>
      %18 = arith.addf %14, %17 : vector<2x128xf32>
      %cst_17 = arith.constant 0.000000e+00 : f32
      %19 = vector.broadcast %cst_17 : f32 to vector<2x128xf32>
      %20 = arith.maximumf %18, %19 : vector<2x128xf32>
      %21 = arith.truncf %20 : vector<2x128xf32> to vector<2x128xbf16>
      %c0_18 = arith.constant 0 : index
      %c0_19 = arith.constant 0 : index
      %c0_20 = arith.constant 0 : index
      %22 = vector.load %arg7[%c0_18, %c0_19, %c0_20] : memref<1x2x128xbf16, #tpu.memory_space<vmem>>, vector<1x2x128xbf16>
      %23 = vector.shape_cast %22 : vector<1x2x128xbf16> to vector<2x128xbf16>
      %24 = vector.shape_cast %21 : vector<2x128xbf16> to vector<1x2x128xbf16>
      tpu.vector_store %arg7[%c0_18, %c0_19, %c0_20], %24 {strides = array<i32>} : memref<1x2x128xbf16, #tpu.memory_space<vmem>>, vector<1x2x128xbf16>,
    } else {
    }
    return
  }
  func.func @transform_0(%arg0: i32, %arg1: i32, %arg2: i32, %arg3: i32) -> (i32, i32, i32) {
    %c0_i32 = arith.constant 0 : i32
    return %arg0, %arg1, %arg3 : i32, i32, i32
  }
  func.func @transform_1(%arg0: i32, %arg1: i32, %arg2: i32, %arg3: i32) -> (i32, i32, i32) {
    %c0_i32 = arith.constant 0 : i32
    return %arg0, %arg3, %arg2 : i32, i32, i32
  }
  func.func @transform_2(%arg0: i32, %arg1: i32, %arg2: i32, %arg3: i32) -> (i32, i32, i32) {
    %c0_i32 = arith.constant 0 : i32
    %c0_i32_0 = arith.constant 0 : i32
    return %arg0, %c0_i32, %arg2 : i32, i32, i32
  }
  func.func @transform_3(%arg0: i32, %arg1: i32, %arg2: i32, %arg3: i32) -> (i32, i32, i32) {
    %c0_i32 = arith.constant 0 : i32
    return %arg0, %arg1, %arg2 : i32, i32, i32
  }
}

module attributes {stable_mosaic.version = 11 : i64} {
  func.func @_matmul_bias_kernel(%arg0: i32, %arg1: i32, %arg2: i32, %arg3: i32, %arg4: memref<1x2x256xbf16, #tpu.memory_space<vmem>>, %arg5: memref<1x256x4xbf16, #tpu.memory_space<vmem>>, %arg6: memref<1x1x4xf32, #tpu.memory_space<vmem>>, %arg7: memref<1x2x4xf32, #tpu.memory_space<vmem>>, %arg8: memref<2x4xf32, #tpu.memory_space<vmem>>) attributes {dimension_semantics = [#tpu.dimension_semantics<parallel>, #tpu.dimension_semantics<parallel>, #tpu.dimension_semantics<parallel>, #tpu.dimension_semantics<arbitrary>], iteration_bounds = array<i64: 1, 1, 1, 1>, scalar_prefetch = 0 : i64, scratch_operands = 1 : i64, tpu.core_type = #tpu.core_type<tc>, window_params = [{transform_indices = @transform_0, window_bounds = array<i64: 1, 2, 256>}, {transform_indices = @transform_1, window_bounds = array<i64: 1, 256, 4>}, {transform_indices = @transform_2, window_bounds = array<i64: 1, 1, 4>}, {transform_indices = @transform_3, window_bounds = array<i64: 1, 2, 4>}]} {
    %c0_i32 = arith.constant 0 : i32
    %0 = arith.cmpi eq, %arg3, %c0_i32 : i32
    %1 = arith.extui %0 : i1 to i32
    %c0_i32_0 = arith.constant 0 : i32
    %2 = arith.cmpi ne, %1, %c0_i32_0 : i32
    scf.if %2 {
      %cst_12 = arith.constant 0.000000e+00 : f32
      %14 = vector.broadcast %cst_12 : f32 to vector<2x4xf32>
      %c0_13 = arith.constant 0 : index
      %c0_14 = arith.constant 0 : index
      %15 = vector.load %arg8[%c0_13, %c0_14] : memref<2x4xf32, #tpu.memory_space<vmem>>, vector<2x4xf32>
      tpu.vector_store %arg8[%c0_13, %c0_14], %14 {strides = array<i32>} : memref<2x4xf32, #tpu.memory_space<vmem>>, vector<2x4xf32>,
    } else {
    }
    %c0 = arith.constant 0 : index
    %c0_1 = arith.constant 0 : index
    %3 = vector.load %arg8[%c0, %c0_1] : memref<2x4xf32, #tpu.memory_space<vmem>>, vector<2x4xf32>
    %c0_2 = arith.constant 0 : index
    %c0_3 = arith.constant 0 : index
    %c0_4 = arith.constant 0 : index
    %4 = vector.load %arg4[%c0_2, %c0_3, %c0_4] : memref<1x2x256xbf16, #tpu.memory_space<vmem>>, vector<1x2x256xbf16>
    %5 = vector.shape_cast %4 : vector<1x2x256xbf16> to vector<2x256xbf16>
    %c0_5 = arith.constant 0 : index
    %c0_6 = arith.constant 0 : index
    %c0_7 = arith.constant 0 : index
    %6 = vector.load %arg5[%c0_5, %c0_6, %c0_7] : memref<1x256x4xbf16, #tpu.memory_space<vmem>>, vector<1x256x4xbf16>
    %7 = vector.shape_cast %6 : vector<1x256x4xbf16> to vector<256x4xbf16>
    %cst = arith.constant dense<0.000000e+00> : vector<2x4xf32>
    %8 = tpu.matmul %5, %7, %cst {dimension_numbers = #tpu.dot_dimension_numbers<[1], [0], [0], [1], [0, 0, 1, 1], [], []>} : vector<2x256xbf16>, vector<256x4xbf16>, vector<2x4xf32> -> vector<2x4xf32>
    %9 = arith.addf %3, %8 : vector<2x4xf32>
    %c0_8 = arith.constant 0 : index
    %c0_9 = arith.constant 0 : index
    %10 = vector.load %arg8[%c0_8, %c0_9] : memref<2x4xf32, #tpu.memory_space<vmem>>, vector<2x4xf32>
    tpu.vector_store %arg8[%c0_8, %c0_9], %9 {strides = array<i32>} : memref<2x4xf32, #tpu.memory_space<vmem>>, vector<2x4xf32>,
    %c0_i32_10 = arith.constant 0 : i32
    %11 = arith.cmpi eq, %arg3, %c0_i32_10 : i32
    %12 = arith.extui %11 : i1 to i32
    %c0_i32_11 = arith.constant 0 : i32
    %13 = arith.cmpi ne, %12, %c0_i32_11 : i32
    scf.if %13 {
      %c0_12 = arith.constant 0 : index
      %c0_13 = arith.constant 0 : index
      %14 = vector.load %arg8[%c0_12, %c0_13] : memref<2x4xf32, #tpu.memory_space<vmem>>, vector<2x4xf32>
      %c0_14 = arith.constant 0 : index
      %c0_15 = arith.constant 0 : index
      %c0_16 = arith.constant 0 : index
      %15 = vector.load %arg6[%c0_14, %c0_15, %c0_16] : memref<1x1x4xf32, #tpu.memory_space<vmem>>, vector<1x1x4xf32>
      %16 = vector.shape_cast %15 : vector<1x1x4xf32> to vector<1x4xf32>
      %17 = vector.broadcast %16 : vector<1x4xf32> to vector<2x4xf32>
      %18 = arith.addf %14, %17 : vector<2x4xf32>
      %c0_17 = arith.constant 0 : index
      %c0_18 = arith.constant 0 : index
      %c0_19 = arith.constant 0 : index
      %19 = vector.load %arg7[%c0_17, %c0_18, %c0_19] : memref<1x2x4xf32, #tpu.memory_space<vmem>>, vector<1x2x4xf32>
      %20 = vector.shape_cast %19 : vector<1x2x4xf32> to vector<2x4xf32>
      %21 = vector.shape_cast %18 : vector<2x4xf32> to vector<1x2x4xf32>
      tpu.vector_store %arg7[%c0_17, %c0_18, %c0_19], %21 {strides = array<i32>} : memref<1x2x4xf32, #tpu.memory_space<vmem>>, vector<1x2x4xf32>,
    } else {
    }
    return
  }
  func.func @transform_0(%arg0: i32, %arg1: i32, %arg2: i32, %arg3: i32) -> (i32, i32, i32) {
    %c0_i32 = arith.constant 0 : i32
    return %arg0, %arg1, %arg3 : i32, i32, i32
  }
  func.func @transform_1(%arg0: i32, %arg1: i32, %arg2: i32, %arg3: i32) -> (i32, i32, i32) {
    %c0_i32 = arith.constant 0 : i32
    return %arg0, %arg3, %arg2 : i32, i32, i32
  }
  func.func @transform_2(%arg0: i32, %arg1: i32, %arg2: i32, %arg3: i32) -> (i32, i32, i32) {
    %c0_i32 = arith.constant 0 : i32
    %c0_i32_0 = arith.constant 0 : i32
    return %arg0, %c0_i32, %arg2 : i32, i32, i32
  }
  func.func @transform_3(%arg0: i32, %arg1: i32, %arg2: i32, %arg3: i32) -> (i32, i32, i32) {
    %c0_i32 = arith.constant 0 : i32
    return %arg0, %arg1, %arg2 : i32, i32, i32
  }
}

</mosaic_0001>

<bundles_post_ra>
// kernel: goturn_forward.9
= control target key start
LH: loop header
LB: loop body
LE: loop exit
PB: predicated region body
PF: predicated region fallthrough
CT: control target
= control target key end

     0   :  { %s3165_s12 = smov 0   ;;  %s3167_s13 = smov 0   ;;  %s3950_s0 = inlined_call_operand.vmem [shape: bf16[2,450,363], index: 0, kind: input, shape index: {}]   ;;  %s3951_s1 = inlined_call_operand.vmem [shape: bf16[2,363,16], index: 1, kind: input, shape index: {}]   ;;  %s3952_s2 = inlined_call_operand.vmem [shape: f32[2,1,16], index: 2, kind: input, shape index: {}]   ;;  %s3953_s3 = inlined_call_operand.vmem [shape: bf16[2,450,16], index: 3, kind: output, shape index: {}]  }
   0x1   :  { %s3169_s14 = smov 0  }
   0x2 LB: > { %s39_s15 = sadd.s32 1, %s3135_s13  ;;  %p2525_p0 = scmp.ge.s32.totalorder %s3139_s14, 1  ;;  %s3139_s14 = sphi %s3169_s14, %s13_s14   ;;  %s3135_s13 = sphi %s3167_s13, %s3955_s13   ;;  %s3131_s12 = sphi %s3165_s12, %s3954_s12  }
   0x3   : > { %p41_p1 = scmp.ge.s32.totalorder %s39_s15, 2  ;;  %p217_p2 = scmp.lt.s32.totalorder %s3139_s14, 3 }
   0x5   : > { %s3957_s15 = smov (%p41_p1, %s39_s15), 0  ;;  %p218_p3 = pnand %p2525_p0, %p217_p2 }
   0x6   : > { %p277_p4 = scmp.lt.s32.totalorder (!%p218_p3), %s3131_s12, 1 }
   0x7   : > { %221 = sbr.rel (%p218_p3) target bundleno = 516 (0x204), region = 32 }
   0xc   : > { %v3141_v0 = vmov 0   ;;  %v3142_v1 = vmov 0.0   ;;  %s3959_s12 = smov (!%p277_p4, %s3131_s12), 1  ;;  %vm3143_vm0 = vmmov 0   ;;  %vm1259_vm1 = vcmask 1044480  }
   0xd   : > { %1266 = vmatprep.subr.bf16.mxu0 %v3141_v0  ;;  %2821 = vmatprep.subr.bf16.mxu1 %v3142_v1  ;;  %s2952_s16 = smul.u32 184, %s3959_s12  ;;  %vm1260_vm2 = vcmask 1045504   ;;  %v3144_v4 = vmov 65535   ;;  %vm1171_vm3 = vcmask 875520   ;;  %vm328_vm4 = vcmask 130048   ;;  %s3543_s26 = scalar_lea.vmem %s3952_s2, %s3959_s12 }
   0xe   : > { %2835 = vmatprep.mubr.msk.bf16.mxu1 %vm3143_vm0, %v3142_v1  ;;  %v1261_v5 = vsel %vm1259_vm1, 4294967295, %v3144_v4  ;;  %s2951_s20 = smul.u32 684, %s3959_s12  ;;  %329 = vst.msk [vmem:[#allocation2] sm:$0xff] %vm328_vm4, %v3142_v1  ;;  %330 = vst.msk [vmem:[#allocation2 + $0x8] sm:$0xff] %vm328_vm4, %v3142_v1  ;;  %vm2320_vm5 = vcmask 125952   ;;  %vm385_vm6 = vcmask 123904  }
   0xf   : > { %s3193_s19 = scalar_lea.vmem %s3951_s1, %s2952_s16  ;;  %v1262_v7 = vsel %vm1260_vm2, %v1261_v5, 0  ;;  %331 = vst.msk [vmem:[#allocation2 + $0x10] sm:$0xff] %vm328_vm4, %v3142_v1  ;;  %332 = vst.msk [vmem:[#allocation2 + $0x18] sm:$0xff] %vm328_vm4, %v3142_v1  ;;  %s2953_s27 = smul.u32 228, %s3959_s12  ;;  %vm2377_vm7 = vcmask 122880  }
  0x10   : > { %v2982_v2 = vld [vmem:[%s3193_s19 + $0x38] sm:$0xff]   ;;  %v2983_v3 = vld [vmem:[%s3193_s19 + $0x30] sm:$0xff]   ;;  %v2984_v6 = vld [vmem:[%s3193_s19 + $0x28] sm:$0xff]   ;;  %s3217_s23 = scalar_lea.vmem %s3950_s0, %s2951_s20  ;;  %333 = vst.msk [vmem:[#allocation2 + $0x20] sm:$0xff] %vm328_vm4, %v3142_v1 }
  0x11   : > { %1267 = vmatpush1.bf16.msra.mxu0 %v2982_v2  ;;  %v2990_v8 = vld [vmem:[%s3193_s19 + $0xb0] sm:$0x3f]   ;;  %v2985_v9 = vld [vmem:[%s3193_s19 + $0x20] sm:$0xff]   ;;  %v2992_v11 = vld [vmem:[%s3193_s19 + $0xa8] sm:$0xff]   ;;  %334 = vst.msk [vmem:[#allocation2 + $0x28] sm:$0xff] %vm328_vm4, %v3142_v1  ;;  %s3563_s30 = scalar_lea.vmem %s3953_s3, %s2953_s27 }
  0x12   : > { %1268 = vmatprep.subr.bf16.mxu0 %v3141_v0  ;;  %v1264_v10 = vand.u32 %v2990_v8, %v1262_v7  ;;  %v2986_v12 = vld [vmem:[%s3193_s19 + $0x18] sm:$0xff]   ;;  %v2994_v13 = vld [vmem:[%s3193_s19 + $0xa0] sm:$0xff]   ;;  %v2987_v14 = vld [vmem:[%s3193_s19 + $0x10] sm:$0xff]   ;;  %335 = vst.msk [vmem:[#allocation2 + $0x30] sm:$0xff] %vm328_vm4, %v3142_v1 }
  0x13   : > { %v2996_v15 = vld [vmem:[%s3193_s19 + $0x98] sm:$0xff]   ;;  %v2988_v16 = vld [vmem:[%s3193_s19 + $0x8] sm:$0xff]   ;;  %v2998_v17 = vld [vmem:[%s3193_s19 + $0x90] sm:$0xff]   ;;  %336 = vst.msk [vmem:[#allocation2 + $0x38] sm:$0xff] %vm328_vm4, %v3142_v1 }
  0x14   : > { %2822 = vmatpush3.bf16.msra.mxu1 %v1264_v10  ;;  %v3008_v18 = vld [vmem:[%s3217_s23 + $0x4] ss:$12 sps:$4 sm:$0xff]   ;;  %v3000_v20 = vld [vmem:[%s3193_s19 + $0x88] sm:$0xff]   ;;  %v2991_v21 = vld [vmem:[%s3193_s19 + $0x78] sm:$0xff]   ;;  %337 = vst.msk [vmem:[#allocation2 + $0x40] sm:$0xff] %vm328_vm4, %v3142_v1 }
  0x15   : > { %1269 = vmatpush1.bf16.msra.mxu0 %v2983_v3  ;;  %2823 = vmatprep.subr.bf16.mxu1 %v3142_v1  ;;  %v2989_v19 = vld [vmem:[%s3193_s19] sm:$0xff]   ;;  %v2993_v23 = vld [vmem:[%s3193_s19 + $0x70] sm:$0xff]   ;;  %v2995_v25 = vld [vmem:[%s3193_s19 + $0x68] sm:$0xff]   ;;  %338 = vst.msk [vmem:[#allocation2 + $0x48] sm:$0xff] %vm328_vm4, %v3142_v1 }
  0x16   : > { %1270 = vmatprep.subr.bf16.mxu0 %v3141_v0  ;;  %1298 = vmatprep.mubr.bf16.mxu0 %v3008_v18  ;;  %v3002_v22 = vld [vmem:[%s3193_s19 + $0x80] sm:$0xff]   ;;  %v3004_v24 = vld [vmem:[%s3217_s23 + $0x8] ss:$12 sps:$4 sm:$0xff]   ;;  %v2999_v28 = vld [vmem:[%s3193_s19 + $0x58] sm:$0xff]   ;;  %339 = vst.msk [vmem:[#allocation2 + $0x50] sm:$0xff] %vm328_vm4, %v3142_v1 }
  0x17   : > { %v2997_v26 = vld [vmem:[%s3193_s19 + $0x60] sm:$0xff]   ;;  %v3001_v29 = vld [vmem:[%s3193_s19 + $0x50] sm:$0xff]   ;;  %v3003_v31 = vld [vmem:[%s3193_s19 + $0x48] sm:$0xff]   ;;  %340 = vst.msk [vmem:[#allocation2 + $0x58] sm:$0xff] %vm328_vm4, %v3142_v1 }
  0x18   : > { %2824 = vmatpush3.bf16.msra.mxu1 %v2992_v11  ;;  %v3009_v27 = vld [vmem:[%s3217_s23 + $0x20] ss:$12 sps:$4 sm:$0xff]   ;;  %v3013_v30 = vld [vmem:[%s3217_s23 + $0x38] ss:$12 sps:$4 sm:$0xff]   ;;  %v3017_v33 = vld [vmem:[%s3217_s23 + $0x50] ss:$12 sps:$4 sm:$0xff]  }
  0x19   : > { %1271 = vmatpush1.bf16.msra.mxu0 %v2984_v6  ;;  %2825 = vmatprep.subr.bf16.mxu1 %v3142_v1  ;;  %v3005_v32 = vld [vmem:[%s3193_s19 + $0x40] sm:$0xff]   ;;  %v3010_v35 = vld [vmem:[%s3217_s23 + $0x1c] ss:$12 sps:$4 sm:$0xff]   ;;  %v3018_v41 = vld [vmem:[%s3217_s23 + $0x4c] ss:$12 sps:$4 sm:$0xff]   ;;  %341 = vst.msk [vmem:[#allocation2 + $0x60] sm:$0xff] %vm328_vm4, %v3142_v1 }
  0x1a   : > { %1272 = vmatprep.subr.bf16.mxu0 %v3141_v0  ;;  %v3006_v34 = vld [vmem:[%s3217_s23] ss:$12 sps:$4 sm:$0xff]   ;;  %v3021_v36 = vld [vmem:[%s3217_s23 + $0x68] ss:$12 sps:$4 sm:$0xff]   ;;  %v3012_v37 = vld [vmem:[%s3217_s23 + $0x18] ss:$12 sps:$4 sm:$0xff]  }
  0x1b   : > { %v3014_v38 = vld [vmem:[%s3217_s23 + $0x34] ss:$12 sps:$4 sm:$0xff]   ;;  %v3016_v40 = vld [vmem:[%s3217_s23 + $0x30] ss:$12 sps:$4 sm:$0xff]   ;;  %v3029_v42 = vld [vmem:[%s3217_s23 + $0x98] ss:$12 sps:$4 sm:$0xff]  }
  0x1c   : > { %2826 = vmatpush3.bf16.msra.mxu1 %v2994_v13  ;;  %v3025_v39 = vld [vmem:[%s3217_s23 + $0x80] ss:$12 sps:$4 sm:$0xff]   ;;  %v3020_v43 = vld [vmem:[%s3217_s23 + $0x48] ss:$12 sps:$4 sm:$0xff]   ;;  %v3022_v44 = vld [vmem:[%s3217_s23 + $0x64] ss:$12 sps:$4 sm:$0xff]  }
  0x1d   : > { %1273 = vmatpush1.bf16.msra.mxu0 %v2985_v9  ;;  %2827 = vmatprep.subr.bf16.mxu1 %v3142_v1  ;;  %v3033_v45 = vld [vmem:[%s3217_s23 + $0xb0] ss:$12 sps:$4 sm:$0xff]   ;;  %v3024_v46 = vld [vmem:[%s3217_s23 + $0x60] ss:$12 sps:$4 sm:$0xff]   ;;  %v3037_v48 = vld [vmem:[%s3217_s23 + $0xc8] ss:$12 sps:$4 sm:$0xff]  }
  0x1e   : > { %1274 = vmatprep.subr.bf16.mxu0 %v3141_v0  ;;  %v3026_v47 = vld [vmem:[%s3217_s23 + $0x7c] ss:$12 sps:$4 sm:$0xff]   ;;  %v3028_v49 = vld [vmem:[%s3217_s23 + $0x78] ss:$12 sps:$4 sm:$0xff]   ;;  %v3030_v50 = vld [vmem:[%s3217_s23 + $0x94] ss:$12 sps:$4 sm:$0xff]  }
  0x1f   : > { %v3041_v51 = vld [vmem:[%s3217_s23 + $0xe0] ss:$12 sps:$4 sm:$0xff]   ;;  %v3032_v52 = vld [vmem:[%s3217_s23 + $0x90] ss:$12 sps:$4 sm:$0xff]   ;;  %v3045_v54 = vld [vmem:[%s3217_s23 + $0xf8] ss:$12 sps:$4 sm:$0xff]  }
  0x20   : > { %2828 = vmatpush3.bf16.msra.mxu1 %v2996_v15  ;;  %v3034_v53 = vld [vmem:[%s3217_s23 + $0xac] ss:$12 sps:$4 sm:$0xff]   ;;  %v3036_v55 = vld [vmem:[%s3217_s23 + $0xa8] ss:$12 sps:$4 sm:$0xff]   ;;  %v3038_v56 = vld [vmem:[%s3217_s23 + $0xc4] ss:$12 sps:$4 sm:$0xff]  }
  0x21   : > { %1275 = vmatpush1.bf16.msra.mxu0 %v2986_v12  ;;  %2829 = vmatprep.subr.bf16.mxu1 %v3142_v1  ;;  %v3049_v57 = vld [vmem:[%s3217_s23 + $0x110] ss:$12 sps:$4 sm:$0xff]   ;;  %342 = vst.msk [vmem:[#allocation2 + $0x68] sm:$0xff] %vm328_vm4, %v3142_v1  ;;  %343 = vst.msk [vmem:[#allocation2 + $0x70] sm:$0xff] %vm328_vm4, %v3142_v1  ;;  %v3040_v58 = vld [vmem:[%s3217_s23 + $0xc0] ss:$12 sps:$4 sm:$0xff]  }
  0x22   : > { %1276 = vmatprep.subr.bf16.mxu0 %v3141_v0  ;;  %344 = vst.msk [vmem:[#allocation2 + $0x78] sm:$0xff] %vm328_vm4, %v3142_v1  ;;  %345 = vst.msk [vmem:[#allocation2 + $0x80] sm:$0xff] %vm328_vm4, %v3142_v1  ;;  %v3042_v59 = vld [vmem:[%s3217_s23 + $0xdc] ss:$12 sps:$4 sm:$0xff]   ;;  %v3044_v61 = vld [vmem:[%s3217_s23 + $0xd8] ss:$12 sps:$4 sm:$0xff]  }
  0x23   : > { %346 = vst.msk [vmem:[#allocation2 + $0x88] sm:$0xff] %vm328_vm4, %v3142_v1  ;;  %347 = vst.msk [vmem:[#allocation2 + $0x90] sm:$0xff] %vm328_vm4, %v3142_v1  ;;  %v3053_v60 = vld [vmem:[%s3217_s23 + $0x128] ss:$12 sps:$4 sm:$0xff]   ;;  %v3057_v63 = vld [vmem:[%s3217_s23 + $0x140] ss:$12 sps:$4 sm:$0xff]  }
  0x24   : > { %2830 = vmatpush3.bf16.msra.mxu1 %v2998_v17  ;;  %348 = vst.msk [vmem:[#allocation2 + $0x98] sm:$0xff] %vm328_vm4, %v3142_v1  ;;  %349 = vst.msk [vmem:[#allocation2 + $0xa0] sm:$0xff] %vm328_vm4, %v3142_v1  ;;  %v3046_v62 = vld [vmem:[%s3217_s23 + $0xf4] ss:$12 sps:$4 sm:$0xff]   ;;  %v3050_v2 = vld [vmem:[%s3217_s23 + $0x10c] ss:$12 sps:$4 sm:$0xff]  }
  0x25   : > { %1277 = vmatpush1.bf16.msra.mxu0 %v2987_v14  ;;  %2831 = vmatprep.subr.bf16.mxu1 %v3142_v1  ;;  %350 = vst.msk [vmem:[#allocation2 + $0xa8] sm:$0xff] %vm328_vm4, %v3142_v1  ;;  %351 = vst.msk [vmem:[#allocation2 + $0xb0] sm:$0xff] %vm328_vm4, %v3142_v1  ;;  %v3061_v3 = vld [vmem:[%s3217_s23 + $0x158] ss:$12 sps:$4 sm:$0xff]   ;;  %v3052_v4 = vld [vmem:[%s3217_s23 + $0x108] ss:$12 sps:$4 sm:$0xff]  }
  0x26   : > { %1278 = vmatprep.subr.bf16.mxu0 %v3141_v0  ;;  %352 = vst.msk [vmem:[#allocation2 + $0xb8] sm:$0xff] %vm328_vm4, %v3142_v1  ;;  %353 = vst.msk [vmem:[#allocation2 + $0xc0] sm:$0xff] %vm328_vm4, %v3142_v1  ;;  %v3054_v5 = vld [vmem:[%s3217_s23 + $0x124] ss:$12 sps:$4 sm:$0xff]   ;;  %v3056_v7 = vld [vmem:[%s3217_s23 + $0x120] ss:$12 sps:$4 sm:$0xff]  }
  0x27   : > { %354 = vst.msk [vmem:[#allocation2 + $0xc8] sm:$0xff] %vm328_vm4, %v3142_v1  ;;  %355 = vst.msk [vmem:[#allocation2 + $0xd0] sm:$0xff] %vm328_vm4, %v3142_v1  ;;  %v3065_v6 = vld [vmem:[%s3217_s23 + $0x170] ss:$12 sps:$4 sm:$0xff]   ;;  %v3069_v9 = vld [vmem:[%s3217_s23 + $0x188] ss:$12 sps:$4 sm:$0xff]  }
  0x28   : > { %2832 = vmatpush3.bf16.msra.mxu1 %v3000_v20  ;;  %356 = vst.msk [vmem:[#allocation2 + $0xd8] sm:$0xff] %vm328_vm4, %v3142_v1  ;;  %357 = vst.msk [vmem:[#allocation2 + $0xe0] sm:$0xff] %vm328_vm4, %v3142_v1  ;;  %v3058_v8 = vld [vmem:[%s3217_s23 + $0x13c] ss:$12 sps:$4 sm:$0xff]   ;;  %v3060_v10 = vld [vmem:[%s3217_s23 + $0x138] ss:$12 sps:$4 sm:$0xff]  }
  0x29   : > { %1279 = vmatpush1.bf16.msra.mxu0 %v2988_v16  ;;  %2833 = vmatprep.subr.bf16.mxu1 %v3142_v1  ;;  %358 = vst.msk [vmem:[#allocation2 + $0xe8] sm:$0xff] %vm328_vm4, %v3142_v1  ;;  %359 = vst.msk [vmem:[#allocation2 + $0xf0] sm:$0xff] %vm328_vm4, %v3142_v1  ;;  %v3062_v11 = vld [vmem:[%s3217_s23 + $0x154] ss:$12 sps:$4 sm:$0xff]   ;;  %v3064_v13 = vld [vmem:[%s3217_s23 + $0x150] ss:$12 sps:$4 sm:$0xff]  }
  0x2a   : > { %1280 = vmatprep.subr.bf16.mxu0 %v3141_v0  ;;  %360 = vst.msk [vmem:[#allocation2 + $0xf8] sm:$0xff] %vm328_vm4, %v3142_v1  ;;  %361 = vst.msk [vmem:[#allocation2 + $0x100] sm:$0xff] %vm328_vm4, %v3142_v1  ;;  %v3073_v12 = vld [vmem:[%s3217_s23 + $0x1a0] ss:$12 sps:$4 sm:$0xff]   ;;  %v3077_v15 = vld [vmem:[%s3217_s23 + $0x1b8] ss:$12 sps:$4 sm:$0xff]  }
  0x2b   : > { %362 = vst.msk [vmem:[#allocation2 + $0x108] sm:$0xff] %vm328_vm4, %v3142_v1  ;;  %363 = vst.msk [vmem:[#allocation2 + $0x110] sm:$0xff] %vm328_vm4, %v3142_v1  ;;  %v3066_v14 = vld [vmem:[%s3217_s23 + $0x16c] ss:$12 sps:$4 sm:$0xff]   ;;  %v3068_v16 = vld [vmem:[%s3217_s23 + $0x168] ss:$12 sps:$4 sm:$0xff]  }
  0x2c   : > { %2834 = vmatpush3.bf16.msra.mxu1 %v3002_v22  ;;  %364 = vst.msk [vmem:[#allocation2 + $0x118] sm:$0xff] %vm328_vm4, %v3142_v1  ;;  %365 = vst.msk [vmem:[#allocation2 + $0x120] sm:$0xff] %vm328_vm4, %v3142_v1  ;;  %v3070_v17 = vld [vmem:[%s3217_s23 + $0x184] ss:$12 sps:$4 sm:$0xff]   ;;  %v3074_v20 = vld [vmem:[%s3217_s23 + $0x19c] ss:$12 sps:$4 sm:$0xff]  }
  0x2d   : > { %1281 = vmatpush1.bf16.msra.mxu0 %v2989_v19  ;;  %366 = vst.msk [vmem:[#allocation2 + $0x128] sm:$0xff] %vm328_vm4, %v3142_v1  ;;  %367 = vst.msk [vmem:[#allocation2 + $0x130] sm:$0xff] %vm328_vm4, %v3142_v1  ;;  %v3081_v18 = vld [vmem:[%s3217_s23 + $0x1d0] ss:$12 sps:$4 sm:$0xff]   ;;  %v3072_v19 = vld [vmem:[%s3217_s23 + $0x180] ss:$12 sps:$4 sm:$0xff]  }
  0x2e   : > { %1282 = vmatprep.subr.bf16.mxu0 %v3141_v0  ;;  %368 = vst.msk [vmem:[#allocation2 + $0x138] sm:$0xff] %vm328_vm4, %v3142_v1  ;;  %369 = vst.msk [vmem:[#allocation2 + $0x140] sm:$0xff] %vm328_vm4, %v3142_v1  ;;  %v3076_v22 = vld [vmem:[%s3217_s23 + $0x198] ss:$12 sps:$4 sm:$0xff]  }
  0x2f   : > { %2836 = vmatmul.mubr.msk.bf16.vlgmr.msra.gmra.mxu1 %vm1171_vm3, %v3004_v24  ;;  %370 = vst.msk [vmem:[#allocation2 + $0x148] sm:$0xff] %vm328_vm4, %v3142_v1  ;;  %371 = vst.msk [vmem:[#allocation2 + $0x150] sm:$0xff] %vm328_vm4, %v3142_v1  ;;  %v3089_v24 = vld [vmem:[%s3217_s23 + $0x200] ss:$12 sps:$4 sm:$0xff]  }
  0x30   : > { %2839 = vmatprep.mubr.msk.bf16.mxu1 %vm3143_vm0, %v3142_v1  ;;  %372 = vst.msk [vmem:[#allocation2 + $0x158] sm:$0xff] %vm328_vm4, %v3142_v1  ;;  %373 = vst.msk [vmem:[#allocation2 + $0x160] sm:$0xff] %vm328_vm4, %v3142_v1 }
  0x31   : > { %1283 = vmatpush2.bf16.msra.mxu0 %v2991_v21  ;;  %374 = vst.msk [vmem:[#allocation2 + $0x168] sm:$0xff] %vm328_vm4, %v3142_v1  ;;  %375 = vst.msk [vmem:[#allocation2 + $0x170] sm:$0xff] %vm328_vm4, %v3142_v1  ;;  %v3085_v21 = vld [vmem:[%s3217_s23 + $0x1e8] ss:$12 sps:$4 sm:$0xff]  }
  0x32   : > { %1284 = vmatprep.subr.bf16.mxu0 %v3141_v0  ;;  %376 = vst.msk [vmem:[#allocation2 + $0x178] sm:$0xff] %vm328_vm4, %v3142_v1  ;;  %377 = vst.msk [vmem:[#allocation2 + $0x180] sm:$0xff] %vm328_vm4, %v3142_v1 }
  0x33   : > { %378 = vst.msk [vmem:[#allocation2 + $0x188] sm:$0xff] %vm328_vm4, %v3142_v1  ;;  %379 = vst.msk [vmem:[#allocation2 + $0x190] sm:$0xff] %vm328_vm4, %v3142_v1 }
  0x34   : > { %380 = vst.msk [vmem:[#allocation2 + $0x198] sm:$0xff] %vm328_vm4, %v3142_v1  ;;  %381 = vst.msk [vmem:[#allocation2 + $0x1a0] sm:$0xff] %vm328_vm4, %v3142_v1 }
  0x35   : > { %1285 = vmatpush2.bf16.msra.mxu0 %v2993_v23  ;;  %382 = vst.msk [vmem:[#allocation2 + $0x1a8] sm:$0xff] %vm328_vm4, %v3142_v1  ;;  %383 = vst.msk [vmem:[#allocation2 + $0x1b0] sm:$0xff] %vm328_vm4, %v3142_v1  ;;  %v3078_v23 = vld [vmem:[%s3217_s23 + $0x1b4] ss:$12 sps:$4 sm:$0xff]  }
  0x36   : > { %1286 = vmatprep.subr.bf16.mxu0 %v3141_v0  ;;  %384 = vst.msk [vmem:[#allocation2 + $0x1b8] sm:$0xff] %vm328_vm4, %v3142_v1 }
  0x37   : > { %2840 = vmatmul.mubr.msk.bf16.gmra.mxu1 %vm1171_vm3, %v3009_v27  ;;  %v3093_v27 = vld [vmem:[%s3217_s23 + $0x218] ss:$12 sps:$4 sm:$0xff]   ;;  %386 = vst.msk [vmem:[#allocation2 + $0x1c0] sm:$0x3] %vm385_vm6, %v3142_v1 }
  0x38   : > { %2843 = vmatprep.mubr.msk.bf16.mxu1 %vm3143_vm0, %v3142_v1 }
  0x39   : > { %1287 = vmatpush2.bf16.msra.mxu0 %v2995_v25  ;;  %v3080_v25 = vld [vmem:[%s3217_s23 + $0x1b0] ss:$12 sps:$4 sm:$0xff]  }
  0x3a   : > { %1288 = vmatprep.subr.bf16.mxu0 %v3141_v0 }
  0x3d   : > { %1289 = vmatpush2.bf16.msra.mxu0 %v2997_v26  ;;  %v3082_v26 = vld [vmem:[%s3217_s23 + $0x1cc] ss:$12 sps:$4 sm:$0xff]  }
  0x3e   : > { %1290 = vmatprep.subr.bf16.mxu0 %v3141_v0 }
  0x3f   : > { %2844 = vmatmul.mubr.msk.bf16.gmra.mxu1 %vm1171_vm3, %v3013_v30  ;;  %v3097_v30 = vld [vmem:[%s3217_s23 + $0x230] ss:$12 sps:$4 sm:$0xff]  }
  0x40   : > { %2847 = vmatprep.mubr.msk.bf16.mxu1 %vm3143_vm0, %v3142_v1 }
  0x41   : > { %1291 = vmatpush2.bf16.msra.mxu0 %v2999_v28  ;;  %v3084_v28 = vld [vmem:[%s3217_s23 + $0x1c8] ss:$12 sps:$4 sm:$0xff]  }
  0x42   : > { %1292 = vmatprep.subr.bf16.mxu0 %v3141_v0 }
  0x45   : > { %1293 = vmatpush2.bf16.msra.mxu0 %v3001_v29  ;;  %v3086_v29 = vld [vmem:[%s3217_s23 + $0x1e4] ss:$12 sps:$4 sm:$0xff]  }
  0x46   : > { %1294 = vmatprep.subr.bf16.mxu0 %v3141_v0 }
  0x47   : > { %2848 = vmatmul.mubr.msk.bf16.gmra.mxu1 %vm1171_vm3, %v3017_v33  ;;  %v3101_v33 = vld [vmem:[%s3217_s23 + $0x248] ss:$12 sps:$4 sm:$0xff]  }
  0x48   : > { %2851 = vmatprep.mubr.msk.bf16.mxu1 %vm3143_vm0, %v3142_v1 }
  0x49   : > { %1295 = vmatpush2.bf16.msra.mxu0 %v3003_v31  ;;  %v3088_v31 = vld [vmem:[%s3217_s23 + $0x1e0] ss:$12 sps:$4 sm:$0xff]  }
  0x4a   : > { %1296 = vmatprep.subr.bf16.mxu0 %v3141_v0  ;;  %v3048_v0 = vld [vmem:[%s3217_s23 + $0xf0] ss:$12 sps:$4 sm:$0xff]  }
  0x4d   : > { %1297 = vmatpush2.bf16.msra.mxu0 %v3005_v32  ;;  %v3090_v32 = vld [vmem:[%s3217_s23 + $0x1fc] ss:$12 sps:$4 sm:$0xff]  }
  0x4f   : > { %2852 = vmatmul.mubr.msk.bf16.gmra.mxu1 %vm1171_vm3, %v3021_v36 }
  0x50   : > { %1299 = vmatmul.mubr.bf16.vlgmr.msra.gmra.mxu0 %v3006_v34  ;;  %2855 = vmatprep.mubr.msk.bf16.mxu1 %vm3143_vm0, %v3142_v1  ;;  %v3092_v34 = vld [vmem:[%s3217_s23 + $0x1f8] ss:$12 sps:$4 sm:$0xff]  }
  0x51   : > { %1306 = vmatprep.mubr.bf16.mxu0 %v3010_v35  ;;  %v3094_v35 = vld [vmem:[%s3217_s23 + $0x214] ss:$12 sps:$4 sm:$0xff]  }
  0x57   : > { %2856 = vmatmul.mubr.msk.bf16.gmra.mxu1 %vm1171_vm3, %v3025_v39  ;;  %v3104_v39 = vld [vmem:[%s3217_s23 + $0x260] ss:$12 sps:$4 sm:$0xff]  }
  0x58   : > { %1307 = vmatmul.mubr.bf16.gmra.mxu0 %v3012_v37  ;;  %2859 = vmatprep.mubr.msk.bf16.mxu1 %vm3143_vm0, %v3142_v1 }
  0x59   : > { %1314 = vmatprep.mubr.bf16.mxu0 %v3014_v38 }
  0x5f   : > { %2860 = vmatmul.mubr.msk.bf16.gmra.mxu1 %vm1171_vm3, %v3029_v42  ;;  %v3098_v42 = vld [vmem:[%s3217_s23 + $0x22c] ss:$12 sps:$4 sm:$0xff]  }
  0x60   : > { %1315 = vmatmul.mubr.bf16.gmra.mxu0 %v3016_v40  ;;  %2863 = vmatprep.mubr.msk.bf16.mxu1 %vm3143_vm0, %v3142_v1  ;;  %v3096_v40 = vld [vmem:[%s3217_s23 + $0x210] ss:$12 sps:$4 sm:$0xff]  }
  0x61   : > { %1322 = vmatprep.mubr.bf16.mxu0 %v3018_v41 }
  0x67   : > { %2864 = vmatmul.mubr.msk.bf16.gmra.mxu1 %vm1171_vm3, %v3033_v45 }
  0x68   : > { %1323 = vmatmul.mubr.bf16.gmra.mxu0 %v3020_v43  ;;  %2867 = vmatprep.mubr.msk.bf16.mxu1 %vm3143_vm0, %v3142_v1 }
  0x69   : > { %1330 = vmatprep.mubr.bf16.mxu0 %v3022_v44 }
  0x6f   : > { %2868 = vmatmul.mubr.msk.bf16.gmra.mxu1 %vm1171_vm3, %v3037_v48 }
  0x70   : > { %1331 = vmatmul.mubr.bf16.gmra.mxu0 %v3024_v46  ;;  %2871 = vmatprep.mubr.msk.bf16.mxu1 %vm3143_vm0, %v3142_v1  ;;  %v3107_v46 = vld [vmem:[%s3217_s23 + $0x278] ss:$12 sps:$4 sm:$0xff]  }
  0x71   : > { %1338 = vmatprep.mubr.bf16.mxu0 %v3026_v47  ;;  %v3100_v47 = vld [vmem:[%s3217_s23 + $0x228] ss:$12 sps:$4 sm:$0xff]  }
  0x77   : > { %2872 = vmatmul.mubr.msk.bf16.gmra.mxu1 %vm1171_vm3, %v3041_v51 }
  0x78   : > { %1339 = vmatmul.mubr.bf16.gmra.mxu0 %v3028_v49  ;;  %2875 = vmatprep.mubr.msk.bf16.mxu1 %vm3143_vm0, %v3142_v1  ;;  %v3102_v49 = vld [vmem:[%s3217_s23 + $0x244] ss:$12 sps:$4 sm:$0xff]  }
  0x79   : > { %1346 = vmatprep.mubr.bf16.mxu0 %v3030_v50 }
  0x7f   : > { %2876 = vmatmul.mubr.msk.bf16.gmra.mxu1 %vm1171_vm3, %v3045_v54 }
  0x80   : > { %1347 = vmatmul.mubr.bf16.gmra.mxu0 %v3032_v52  ;;  %2879 = vmatprep.mubr.msk.bf16.mxu1 %vm3143_vm0, %v3142_v1  ;;  %v540_v52 = vld [vmem:[%s3217_s23 + $0x240] sm:$0xff] }
  0x81   : > { %1354 = vmatprep.mubr.bf16.mxu0 %v3034_v53  ;;  %v542_v53 = vld [vmem:[%s3217_s23 + $0x24c] sm:$0xff] }
  0x87   : > { %2880 = vmatmul.mubr.msk.bf16.gmra.mxu1 %vm1171_vm3, %v3049_v57 }
  0x88   : > { %1355 = vmatmul.mubr.bf16.gmra.mxu0 %v3036_v55  ;;  %2883 = vmatprep.mubr.msk.bf16.mxu1 %vm3143_vm0, %v3142_v1  ;;  %v3110_v55 = vld [vmem:[%s3217_s23 + $0x290] ss:$12 sps:$4 sm:$0xff]  }
  0x89   : > { %1362 = vmatprep.mubr.bf16.mxu0 %v3038_v56  ;;  %v2601_v56 = vcombine.low %v540_v52, %v542_v53 }
  0x8f   : > { %2884 = vmatmul.mubr.msk.bf16.gmra.mxu1 %vm1171_vm3, %v3053_v60  ;;  %v387_v60 = vld [vmem:[#allocation2] sm:$0xff] }
  0x90   : > { %1363 = vmatmul.mubr.bf16.gmra.mxu0 %v3040_v58  ;;  %2887 = vmatprep.mubr.msk.bf16.mxu1 %vm3143_vm0, %v3142_v1  ;;  %v3105_v58 = vld [vmem:[%s3217_s23 + $0x25c] ss:$12 sps:$4 sm:$0xff]  }
  0x91   : > { %1370 = vmatprep.mubr.bf16.mxu0 %v3042_v59 }
  0x97   : > { %2888 = vmatmul.mubr.msk.bf16.gmra.mxu1 %vm1171_vm3, %v3057_v63 }
  0x98   : > { %1371 = vmatmul.mubr.bf16.gmra.mxu0 %v3044_v61  ;;  %2891 = vmatprep.mubr.msk.bf16.mxu1 %vm3143_vm0, %v3142_v1 }
  0x99   : > { %1378 = vmatprep.mubr.bf16.mxu0 %v3046_v62 }
  0x9f   : > { %2892 = vmatmul.mubr.msk.bf16.gmra.mxu1 %vm1171_vm3, %v3061_v3 }
  0xa0   : > { %1379 = vmatmul.mubr.bf16.gmra.mxu0 %v3048_v0  ;;  %2895 = vmatprep.mubr.msk.bf16.mxu1 %vm3143_vm0, %v3142_v1  ;;  %v544_v0 = vld [vmem:[%s3217_s23 + $0x258] sm:$0xff] }
  0xa1   : > { %1386 = vmatprep.mubr.bf16.mxu0 %v3050_v2  ;;  %v546_v2 = vld [vmem:[%s3217_s23 + $0x264] sm:$0xff] }
  0xa7   : > { %2896 = vmatmul.mubr.msk.bf16.gmra.mxu1 %vm1171_vm3, %v3065_v6 }
  0xa8   : > { %1387 = vmatmul.mubr.bf16.gmra.mxu0 %v3052_v4  ;;  %2899 = vmatprep.mubr.msk.bf16.mxu1 %vm3143_vm0, %v3142_v1 }
  0xa9   : > { %1394 = vmatprep.mubr.bf16.mxu0 %v3054_v5  ;;  %v3113_v5 = vld [vmem:[%s3217_s23 + $0x2a8] ss:$0 sps:$4 sm:$0x11]  }
  0xaf   : > { %2900 = vmatmul.mubr.msk.bf16.gmra.mxu1 %vm1171_vm3, %v3069_v9  ;;  %v2604_v9 = vcombine.low %v544_v0, %v546_v2 }
  0xb0   : > { %1395 = vmatmul.mubr.bf16.gmra.mxu0 %v3056_v7  ;;  %2903 = vmatprep.mubr.msk.bf16.mxu1 %vm3143_vm0, %v3142_v1  ;;  %v388_v7 = vld [vmem:[#allocation2 + $0x8] sm:$0xff] }
  0xb1   : > { %1402 = vmatprep.mubr.bf16.mxu0 %v3058_v8 }
  0xb7   : > { %2904 = vmatmul.mubr.msk.bf16.gmra.mxu1 %vm1171_vm3, %v3073_v12  ;;  %v3108_v12 = vld [vmem:[%s3217_s23 + $0x274] ss:$12 sps:$4 sm:$0xff]  }
  0xb8   : > { %1403 = vmatmul.mubr.bf16.gmra.mxu0 %v3060_v10  ;;  %2907 = vmatprep.mubr.msk.bf16.mxu1 %vm3143_vm0, %v3142_v1 }
  0xb9   : > { %1410 = vmatprep.mubr.bf16.mxu0 %v3062_v11 }
  0xbf   : > { %2908 = vmatmul.mubr.msk.bf16.gmra.mxu1 %vm1171_vm3, %v3077_v15 }
  0xc0   : > { %1411 = vmatmul.mubr.bf16.gmra.mxu0 %v3064_v13  ;;  %2911 = vmatprep.mubr.msk.bf16.mxu1 %vm3143_vm0, %v3142_v1 }
  0xc1   : > { %1418 = vmatprep.mubr.bf16.mxu0 %v3066_v14 }
  0xc7   : > { %2912 = vmatmul.mubr.msk.bf16.gmra.mxu1 %vm1171_vm3, %v3081_v18 }
  0xc8   : > { %1419 = vmatmul.mubr.bf16.gmra.mxu0 %v3068_v16  ;;  %2915 = vmatprep.mubr.msk.bf16.mxu1 %vm3143_vm0, %v3142_v1  ;;  %v389_v16 = vld [vmem:[#allocation2 + $0x10] sm:$0xff] }
  0xc9   : > { %1426 = vmatprep.mubr.bf16.mxu0 %v3070_v17 }
  0xcf   : > { %2916 = vmatmul.mubr.msk.bf16.gmra.mxu1 %vm1171_vm3, %v3085_v21  ;;  %v550_v21 = vld [vmem:[%s3217_s23 + $0x27c] sm:$0xff] }
  0xd0   : > { %1427 = vmatmul.mubr.bf16.gmra.mxu0 %v3072_v19  ;;  %2919 = vmatprep.mubr.msk.bf16.mxu1 %vm3143_vm0, %v3142_v1 }
  0xd1   : > { %1434 = vmatprep.mubr.bf16.mxu0 %v3074_v20  ;;  %v548_v20 = vld [vmem:[%s3217_s23 + $0x270] sm:$0xff] }
  0xd7   : > { %2920 = vmatmul.mubr.msk.bf16.gmra.mxu1 %vm1171_vm3, %v3089_v24 }
  0xd8   : > { %1435 = vmatmul.mubr.bf16.gmra.mxu0 %v3076_v22  ;;  %2923 = vmatprep.mubr.msk.bf16.mxu1 %vm3143_vm0, %v3142_v1  ;;  %v3549_v22 = vld [vmem:[%s3543_s26] ss:$0 sm:$0xff] }
  0xd9   : > { %1442 = vmatprep.mubr.bf16.mxu0 %v3078_v23 }
  0xdf   : > { %2924 = vmatmul.mubr.msk.bf16.gmra.mxu1 %vm1171_vm3, %v3093_v27  ;;  %v390_v27 = vld [vmem:[#allocation2 + $0x18] sm:$0xff] }
  0xe0   : > { %1443 = vmatmul.mubr.bf16.gmra.mxu0 %v3080_v25  ;;  %2927 = vmatprep.mubr.msk.bf16.mxu1 %vm3143_vm0, %v3142_v1 }
  0xe1   : > { %1450 = vmatprep.mubr.bf16.mxu0 %v3082_v26 }
  0xe7   : > { %2928 = vmatmul.mubr.msk.bf16.gmra.mxu1 %vm1171_vm3, %v3097_v30 }
  0xe8   : > { %1451 = vmatmul.mubr.bf16.gmra.mxu0 %v3084_v28  ;;  %2931 = vmatprep.mubr.msk.bf16.mxu1 %vm3143_vm0, %v3142_v1 }
  0xe9   : > { %1458 = vmatprep.mubr.bf16.mxu0 %v3086_v29  ;;  %v2607_v29 = vcombine.low %v548_v20, %v550_v21 }
  0xef   : > { %v1564_v36 = vpop.f32.mrf.mxu1  ;;  %2932 = vmatmul.mubr.msk.bf16.gmra.mxu1 %vm1171_vm3, %v3101_v33  ;;  %v3111_v33 = vld [vmem:[%s3217_s23 + $0x28c] ss:$12 sps:$4 sm:$0xff]  }
  0xf0   : > { %1459 = vmatmul.mubr.bf16.gmra.mxu0 %v3088_v31  ;;  %2935 = vmatprep.mubr.msk.bf16.mxu1 %vm3143_vm0, %v3142_v1 }
  0xf1   : > { %1466 = vmatprep.mubr.bf16.mxu0 %v3090_v32  ;;  %v2837_v37 = vpop.f32.mrf.mxu1 }
  0xf3   : > { %v1567_v38 = vpop.f32.mrf.mxu1 }
  0xf5   : > { %v2838_v41 = vpop.f32.mrf.mxu1 }
  0xf7   : > { %v1572_v43 = vpop.f32.mrf.mxu1  ;;  %2936 = vmatmul.mubr.msk.bf16.gmra.mxu1 %vm1171_vm3, %v3104_v39  ;;  %v391_v39 = vld [vmem:[#allocation2 + $0x20] sm:$0xff] }
  0xf8   : > { %1467 = vmatmul.mubr.bf16.gmra.mxu0 %v3092_v34  ;;  %2939 = vmatprep.mubr.msk.bf16.mxu1 %vm3143_vm0, %v3142_v1 }
  0xf9   : > { %1474 = vmatprep.mubr.bf16.mxu0 %v3094_v35  ;;  %v2841_v44 = vpop.f32.mrf.mxu1 }
  0xfb   : > { %v3508_v45 = vpop.f32.mrf.mxu1 }
  0xfd   : > { %v2842_v48 = vpop.f32.mrf.mxu1 }
  0xfe   : > { %v556_v48 = vld [vmem:[%s3217_s23 + $0x2a0] sm:$0x11] }
  0xff   : > { %v3513_v50 = vpop.f32.mrf.mxu1  ;;  %2940 = vmatmul.mubr.msk.bf16.gmra.mxu1 %vm1171_vm3, %v3107_v46  ;;  %v554_v46 = vld [vmem:[%s3217_s23 + $0x294] sm:$0xff] }
 0x100   : > { %1475 = vmatmul.mubr.bf16.gmra.mxu0 %v3096_v40  ;;  %2943 = vmatprep.mubr.msk.bf16.mxu1 %vm3143_vm0, %v3142_v1 }
 0x101   : > { %1482 = vmatprep.mubr.bf16.mxu0 %v3098_v42  ;;  %v2845_v51 = vpop.f32.mrf.mxu1 }
 0x103   : > { %v3520_v54 = vpop.f32.mrf.mxu1 }
 0x105   : > { %v2846_v57 = vpop.f32.mrf.mxu1 }
 0x107   : > { %v3524_v59 = vpop.f32.mrf.mxu1  ;;  %2944 = vmatmul.mubr.msk.bf16.gmra.mxu1 %vm1171_vm3, %v3110_v55  ;;  %v392_v55 = vld [vmem:[#allocation2 + $0x28] sm:$0xff] }
 0x108   : > { %1483 = vmatmul.mubr.bf16.gmra.mxu0 %v3100_v47  ;;  %2947 = vmatprep.mubr.msk.bf16.mxu1 %vm3143_vm0, %v3142_v1 }
 0x109   : > { %1490 = vmatprep.mubr.bf16.mxu0 %v3102_v49  ;;  %v2849_v62 = vpop.f32.mrf.mxu1 }
 0x10a   : > { %v2614_v62 = vcombine.high %v556_v48, %v556_v48 }
 0x10b   : > { %v3531_v4 = vpop.f32.mrf.mxu1 }
 0x10d   : > { %v2850_v10 = vpop.f32.mrf.mxu1 }
 0x10f   : > { %v3536_v14 = vpop.f32.mrf.mxu1  ;;  %2948 = vmatmul.mubr.msk.bf16.gmra.mxu1 %vm1171_vm3, %v3113_v5 }
 0x110   : > { %v1300_v61 = vpop.f32.mrf.mxu0  ;;  %1491 = vmatmul.mubr.bf16.gmra.mxu0 %v2601_v56 }
 0x111   : > { %v1565_v63 = vadd.f32 %v1564_v36, %v1300_v61  ;;  %1498 = vmatprep.mubr.bf16.mxu0 %v3105_v58  ;;  %v2853_v18 = vpop.f32.mrf.mxu1 }
 0x112   : > { %v1302_v3 = vpop.f32.mrf.mxu0 }
 0x113   : > { %v1794_v6 = vadd.f32 %v1565_v63, %v387_v60  ;;  %v3551_v24 = vpop.f32.mrf.mxu1 }
 0x114   : > { %v1303_v8 = vpop.f32.mrf.mxu0 }
 0x115   : > { %1852 = vst.msk [vmem:[#allocation2] sm:$0xff] %vm328_vm4, %v1794_v6  ;;  %v1568_v11 = vadd.f32 %v1567_v38, %v1303_v8  ;;  %v2854_v30 = vpop.f32.mrf.mxu1  ;;  %v393_v6 = vld [vmem:[#allocation2 + $0x30] sm:$0xff] }
 0x116   : > { %v1305_v13 = vpop.f32.mrf.mxu0  ;;  %v395_v30 = vld [vmem:[#allocation2 + $0x40] sm:$0xff] }
 0x117   : > { %v1795_v15 = vadd.f32 %v1568_v11, %v388_v7  ;;  %v3558_v35 = vpop.f32.mrf.mxu1 }
 0x118   : > { %v1308_v17 = vpop.f32.mrf.mxu0  ;;  %1499 = vmatmul.mubr.bf16.gmra.mxu0 %v2604_v9 }
 0x119   : > { %1853 = vst.msk [vmem:[#allocation2 + $0x8] sm:$0xff] %vm328_vm4, %v1795_v15  ;;  %v1573_v19 = vadd.f32 %v1572_v43, %v1308_v17  ;;  %1506 = vmatprep.mubr.bf16.mxu0 %v3108_v12  ;;  %v2857_v41 = vpop.f32.mrf.mxu1  ;;  %v394_v17 = vld [vmem:[#allocation2 + $0x38] sm:$0xff] }
 0x11a   : > { %v1310_v23 = vpop.f32.mrf.mxu0  ;;  %v396_v41 = vld [vmem:[#allocation2 + $0x48] sm:$0xff] }
 0x11b   : > { %v1796_v25 = vadd.f32 %v1573_v19, %v389_v16  ;;  %v3571_v49 = vpop.f32.mrf.mxu1  ;;  %v2613_v19 = vcombine.low %v556_v48, %v556_v48 }
 0x11c   : > { %v1913_v26 = vld [vmem:[#allocation2] sm:$0xff]  ;;  %v1311_v28 = vpop.f32.mrf.mxu0 }
 0x11d   : > { %v1977_v31 = vadd.f32 %v3549_v22, %v1913_v26  ;;  %1854 = vst.msk [vmem:[#allocation2 + $0x10] sm:$0xff] %vm328_vm4, %v1796_v25  ;;  %v1576_v32 = vadd.f32 %v3508_v45, %v1311_v28  ;;  %v552_v45 = vld [vmem:[%s3217_s23 + $0x288] sm:$0xff]  ;;  %v2858_v58 = vpop.f32.mrf.mxu1 }
 0x11e   : > { %v1313_v34 = vpop.f32.mrf.mxu0  ;;  %v2610_v57 = vcombine.low %v552_v45, %v554_v46 }
 0x11f   : > { %v2034_v36 = vmax.f32 %v1977_v31, 0.0  ;;  %v1797_v37 = vadd.f32 %v1576_v32, %v390_v27  ;;  %v3578_v0 = vpop.f32.mrf.mxu1 }
 0x120   : > { %v1914_v38 = vld [vmem:[#allocation2 + $0x8] sm:$0xff]  ;;  %v1316_v40 = vpop.f32.mrf.mxu0  ;;  %1507 = vmatmul.mubr.bf16.gmra.mxu0 %v2607_v29 }
 0x121   : > { %v2728_v42 = vpack.c.bf16 %v2034_v36, %v2034_v36  ;;  %v1978_v43 = vadd.f32 %v3549_v22, %v1914_v38  ;;  %1855 = vst.msk [vmem:[#allocation2 + $0x18] sm:$0xff] %vm328_vm4, %v1797_v37  ;;  %v1581_v44 = vadd.f32 %v3513_v50, %v1316_v40  ;;  %1514 = vmatprep.mubr.bf16.mxu0 %v3111_v33  ;;  %v2861_v8 = vpop.f32.mrf.mxu1 }
 0x122   : > { %v1318_v47 = vpop.f32.mrf.mxu0 }
 0x123   : > { %2321 = vst.msk [vmem:[%s3563_s30] sm:$0xf] %vm2320_vm5, %v2728_v42  ;;  %v2035_v51 = vmax.f32 %v1978_v43, 0.0  ;;  %v1798_v52 = vadd.f32 %v1581_v44, %v391_v39  ;;  %v3585_v12 = vpop.f32.mrf.mxu1 }
 0x124   : > { %v1915_v53 = vld [vmem:[#allocation2 + $0x10] sm:$0xff]  ;;  %v1319_v56 = vpop.f32.mrf.mxu0 }
 0x125   : > { %v2729_v60 = vpack.c.bf16 %v2035_v51, %v2035_v51  ;;  %v1979_v50 = vadd.f32 %v3549_v22, %v1915_v53  ;;  %1856 = vst.msk [vmem:[#allocation2 + $0x20] sm:$0xff] %vm328_vm4, %v1798_v52  ;;  %v1584_v61 = vadd.f32 %v3520_v54, %v1319_v56  ;;  %v2862_v20 = vpop.f32.mrf.mxu1  ;;  %v397_v53 = vld [vmem:[#allocation2 + $0x50] sm:$0xff] }
 0x126   : > { %v1321_v63 = vpop.f32.mrf.mxu0 }
 0x127   : > { %2322 = vst.msk [vmem:[%s3563_s30 + $0x4] sm:$0xf] %vm2320_vm5, %v2729_v60  ;;  %v2036_v2 = vmax.f32 %v1979_v50, 0.0  ;;  %v1799_v3 = vadd.f32 %v1584_v61, %v392_v55  ;;  %v3592_v26 = vpop.f32.mrf.mxu1 }
 0x128   : > { %v1916_v5 = vld [vmem:[#allocation2 + $0x18] sm:$0xff]  ;;  %v1324_v7 = vpop.f32.mrf.mxu0  ;;  %1515 = vmatmul.mubr.bf16.gmra.mxu0 %v2610_v57 }
 0x129   : > { %v2730_v9 = vpack.c.bf16 %v2036_v2, %v2036_v2  ;;  %v1980_v10 = vadd.f32 %v3549_v22, %v1916_v5  ;;  %1857 = vst.msk [vmem:[#allocation2 + $0x28] sm:$0xff] %vm328_vm4, %v1799_v3  ;;  %v1589_v54 = vadd.f32 %v3524_v59, %v1324_v7  ;;  %1522 = vmatprep.mubr.bf16.mxu0 %v2614_v62  ;;  %v2865_v32 = vpop.f32.mrf.mxu1  ;;  %v398_v2 = vld [vmem:[#allocation2 + $0x58] sm:$0xff] }
 0x12a   : > { %v1326_v11 = vpop.f32.mrf.mxu0 }
 0x12b   : > { %2323 = vst.msk [vmem:[%s3563_s30 + $0x8] sm:$0xf] %vm2320_vm5, %v2730_v9  ;;  %v2037_v13 = vmax.f32 %v1980_v10, 0.0  ;;  %v1800_v15 = vadd.f32 %v1589_v54, %v393_v6  ;;  %v3599_v37 = vpop.f32.mrf.mxu1 }
 0x12c   : > { %v1917_v16 = vld [vmem:[#allocation2 + $0x20] sm:$0xff]  ;;  %v1327_v18 = vpop.f32.mrf.mxu0 }
 0x12d   : > { %v2731_v21 = vpack.c.bf16 %v2037_v13, %v2037_v13  ;;  %v1981_v23 = vadd.f32 %v3549_v22, %v1917_v16  ;;  %1858 = vst.msk [vmem:[#allocation2 + $0x30] sm:$0xff] %vm328_vm4, %v1800_v15  ;;  %v1592_v59 = vadd.f32 %v3531_v4, %v1327_v18  ;;  %v2866_v43 = vpop.f32.mrf.mxu1  ;;  %v399_v13 = vld [vmem:[#allocation2 + $0x60] sm:$0xff] }
 0x12e   : > { %v1329_v25 = vpop.f32.mrf.mxu0 }
 0x12f   : > { %2324 = vst.msk [vmem:[%s3563_s30 + $0xc] sm:$0xf] %vm2320_vm5, %v2731_v21  ;;  %v2038_v27 = vmax.f32 %v1981_v23, 0.0  ;;  %v1801_v28 = vadd.f32 %v1592_v59, %v394_v17  ;;  %v3606_v47 = vpop.f32.mrf.mxu1  ;;  %v400_v25 = vld [vmem:[#allocation2 + $0x68] sm:$0xff] }
 0x130   : > { %v1918_v29 = vld [vmem:[#allocation2 + $0x28] sm:$0xff]  ;;  %v1332_v31 = vpop.f32.mrf.mxu0  ;;  %1523 = vmatmul.mubr.bf16.gmra.mxu0 %v2613_v19 }
 0x131   : > { %v2732_v33 = vpack.c.bf16 %v2038_v27, %v2038_v27  ;;  %v1982_v34 = vadd.f32 %v3549_v22, %v1918_v29  ;;  %1859 = vst.msk [vmem:[#allocation2 + $0x38] sm:$0xff] %vm328_vm4, %v1801_v28  ;;  %v1597_v4 = vadd.f32 %v3536_v14, %v1332_v31  ;;  %v2869_v56 = vpop.f32.mrf.mxu1 }
 0x132   : > { %v1334_v36 = vpop.f32.mrf.mxu0 }
 0x133   : > { %2325 = vst.msk [vmem:[%s3563_s30 + $0x10] sm:$0xf] %vm2320_vm5, %v2732_v33  ;;  %v2039_v38 = vmax.f32 %v1982_v34, 0.0  ;;  %v1802_v39 = vadd.f32 %v1597_v4, %v395_v30  ;;  %v3613_v50 = vpop.f32.mrf.mxu1  ;;  %v401_v36 = vld [vmem:[#allocation2 + $0x70] sm:$0xff] }
 0x134   : > { %v1919_v40 = vld [vmem:[#allocation2 + $0x30] sm:$0xff]  ;;  %v1335_v42 = vpop.f32.mrf.mxu0 }
 0x135   : > { %v2733_v44 = vpack.c.bf16 %v2039_v38, %v2039_v38  ;;  %v1983_v45 = vadd.f32 %v3549_v22, %v1919_v40  ;;  %1860 = vst.msk [vmem:[#allocation2 + $0x40] sm:$0xff] %vm328_vm4, %v1802_v39  ;;  %v1600_v46 = vadd.f32 %v3551_v24, %v1335_v42  ;;  %v2870_v5 = vpop.f32.mrf.mxu1 }
 0x136   : > { %v1337_v14 = vpop.f32.mrf.mxu0 }
 0x137   : > { %2326 = vst.msk [vmem:[%s3563_s30 + $0x14] sm:$0xf] %vm2320_vm5, %v2733_v44  ;;  %v2040_v48 = vmax.f32 %v1983_v45, 0.0  ;;  %v1803_v51 = vadd.f32 %v1600_v46, %v396_v41  ;;  %v3620_v9 = vpop.f32.mrf.mxu1  ;;  %v402_v14 = vld [vmem:[#allocation2 + $0x78] sm:$0xff] }
 0x138   : > { %v1920_v52 = vld [vmem:[#allocation2 + $0x38] sm:$0xff]  ;;  %v1340_v55 = vpop.f32.mrf.mxu0 }
 0x139   : > { %v2734_v57 = vpack.c.bf16 %v2040_v48, %v2040_v48  ;;  %v1984_v58 = vadd.f32 %v3549_v22, %v1920_v52  ;;  %1861 = vst.msk [vmem:[#allocation2 + $0x48] sm:$0xff] %vm328_vm4, %v1803_v51  ;;  %v1605_v60 = vadd.f32 %v3558_v35, %v1340_v55  ;;  %v2873_v16 = vpop.f32.mrf.mxu1 }
 0x13a   : > { %v1342_v24 = vpop.f32.mrf.mxu0 }
 0x13b   : > { %2327 = vst.msk [vmem:[%s3563_s30 + $0x18] sm:$0xf] %vm2320_vm5, %v2734_v57  ;;  %v2041_v61 = vmax.f32 %v1984_v58, 0.0  ;;  %v1804_v62 = vadd.f32 %v1605_v60, %v397_v53  ;;  %v3627_v20 = vpop.f32.mrf.mxu1  ;;  %v403_v24 = vld [vmem:[#allocation2 + $0x80] sm:$0xff] }
 0x13c   : > { %v1921_v63 = vld [vmem:[#allocation2 + $0x40] sm:$0xff]  ;;  %v1343_v3 = vpop.f32.mrf.mxu0 }
 0x13d   : > { %v2735_v6 = vpack.c.bf16 %v2041_v61, %v2041_v61  ;;  %v1985_v7 = vadd.f32 %v3549_v22, %v1921_v63  ;;  %1862 = vst.msk [vmem:[#allocation2 + $0x50] sm:$0xff] %vm328_vm4, %v1804_v62  ;;  %v1608_v8 = vadd.f32 %v3571_v49, %v1343_v3  ;;  %v2874_v28 = vpop.f32.mrf.mxu1 }
 0x13e   : > { %v1345_v35 = vpop.f32.mrf.mxu0 }
 0x13f   : > { %2328 = vst.msk [vmem:[%s3563_s30 + $0x1c] sm:$0xf] %vm2320_vm5, %v2735_v6  ;;  %v2042_v10 = vmax.f32 %v1985_v7, 0.0  ;;  %v1805_v54 = vadd.f32 %v1608_v8, %v398_v2  ;;  %v3634_v32 = vpop.f32.mrf.mxu1  ;;  %v404_v35 = vld [vmem:[#allocation2 + $0x88] sm:$0xff] }
 0x140   : > { %v1922_v11 = vld [vmem:[#allocation2 + $0x48] sm:$0xff]  ;;  %v1348_v15 = vpop.f32.mrf.mxu0 }
 0x141   : > { %v2736_v17 = vpack.c.bf16 %v2042_v10, %v2042_v10  ;;  %v1986_v18 = vadd.f32 %v3549_v22, %v1922_v11  ;;  %1863 = vst.msk [vmem:[#allocation2 + $0x58] sm:$0xff] %vm328_vm4, %v1805_v54  ;;  %v1613_v19 = vadd.f32 %v3578_v0, %v1348_v15  ;;  %v2877_v39 = vpop.f32.mrf.mxu1 }
 0x142   : > { %v1350_v49 = vpop.f32.mrf.mxu0 }
 0x143   : > { %2329 = vst.msk [vmem:[%s3563_s30 + $0x20] sm:$0xf] %vm2320_vm5, %v2736_v17  ;;  %v2043_v21 = vmax.f32 %v1986_v18, 0.0  ;;  %v1806_v23 = vadd.f32 %v1613_v19, %v399_v13  ;;  %v3641_v43 = vpop.f32.mrf.mxu1  ;;  %v405_v49 = vld [vmem:[#allocation2 + $0x90] sm:$0xff] }
 0x144   : > { %v1923_v59 = vld [vmem:[#allocation2 + $0x50] sm:$0xff]  ;;  %v1351_v27 = vpop.f32.mrf.mxu0 }
 0x145   : > { %v2737_v29 = vpack.c.bf16 %v2043_v21, %v2043_v21  ;;  %v1987_v30 = vadd.f32 %v3549_v22, %v1923_v59  ;;  %1864 = vst.msk [vmem:[#allocation2 + $0x60] sm:$0xff] %vm328_vm4, %v1806_v23  ;;  %v1616_v31 = vadd.f32 %v3585_v12, %v1351_v27  ;;  %v2878_v51 = vpop.f32.mrf.mxu1 }
 0x146   : > { %v1353_v0 = vpop.f32.mrf.mxu0 }
 0x147   : > { %2330 = vst.msk [vmem:[%s3563_s30 + $0x24] sm:$0xf] %vm2320_vm5, %v2737_v29  ;;  %v2044_v33 = vmax.f32 %v1987_v30, 0.0  ;;  %v1807_v34 = vadd.f32 %v1616_v31, %v400_v25  ;;  %v3648_v56 = vpop.f32.mrf.mxu1  ;;  %v406_v0 = vld [vmem:[#allocation2 + $0x98] sm:$0xff] }
 0x148   : > { %v1924_v4 = vld [vmem:[#allocation2 + $0x58] sm:$0xff]  ;;  %v1356_v38 = vpop.f32.mrf.mxu0 }
 0x149   : > { %v2738_v40 = vpack.c.bf16 %v2044_v33, %v2044_v33  ;;  %v1988_v41 = vadd.f32 %v3549_v22, %v1924_v4  ;;  %1865 = vst.msk [vmem:[#allocation2 + $0x68] sm:$0xff] %vm328_vm4, %v1807_v34  ;;  %v1621_v42 = vadd.f32 %v3592_v26, %v1356_v38  ;;  %v2881_v62 = vpop.f32.mrf.mxu1 }
 0x14a   : > { %v1358_v12 = vpop.f32.mrf.mxu0 }
 0x14b   : > { %2331 = vst.msk [vmem:[%s3563_s30 + $0x28] sm:$0xf] %vm2320_vm5, %v2738_v40  ;;  %v2045_v44 = vmax.f32 %v1988_v41, 0.0  ;;  %v1808_v45 = vadd.f32 %v1621_v42, %v401_v36  ;;  %v3655_v5 = vpop.f32.mrf.mxu1  ;;  %v407_v12 = vld [vmem:[#allocation2 + $0xa0] sm:$0xff] }
 0x14c   : > { %v1925_v46 = vld [vmem:[#allocation2 + $0x60] sm:$0xff]  ;;  %v1359_v48 = vpop.f32.mrf.mxu0 }
 0x14d   : > { %v2739_v52 = vpack.c.bf16 %v2045_v44, %v2045_v44  ;;  %v1989_v53 = vadd.f32 %v3549_v22, %v1925_v46  ;;  %1866 = vst.msk [vmem:[#allocation2 + $0x70] sm:$0xff] %vm328_vm4, %v1808_v45  ;;  %v1624_v55 = vadd.f32 %v3599_v37, %v1359_v48  ;;  %v2882_v54 = vpop.f32.mrf.mxu1 }
 0x14e   : > { %v1361_v26 = vpop.f32.mrf.mxu0 }
 0x14f   : > { %2332 = vst.msk [vmem:[%s3563_s30 + $0x2c] sm:$0xf] %vm2320_vm5, %v2739_v52  ;;  %v2046_v57 = vmax.f32 %v1989_v53, 0.0  ;;  %v1809_v58 = vadd.f32 %v1624_v55, %v402_v14  ;;  %v3662_v16 = vpop.f32.mrf.mxu1  ;;  %v408_v26 = vld [vmem:[#allocation2 + $0xa8] sm:$0xff] }
 0x150   : > { %v1926_v60 = vld [vmem:[#allocation2 + $0x68] sm:$0xff]  ;;  %v1364_v61 = vpop.f32.mrf.mxu0 }
 0x151   : > { %v2740_v63 = vpack.c.bf16 %v2046_v57, %v2046_v57  ;;  %v1990_v2 = vadd.f32 %v3549_v22, %v1926_v60  ;;  %1867 = vst.msk [vmem:[#allocation2 + $0x78] sm:$0xff] %vm328_vm4, %v1809_v58  ;;  %v1629_v3 = vadd.f32 %v3606_v47, %v1364_v61  ;;  %v2885_v23 = vpop.f32.mrf.mxu1 }
 0x152   : > { %v1366_v37 = vpop.f32.mrf.mxu0 }
 0x153   : > { %2333 = vst.msk [vmem:[%s3563_s30 + $0x30] sm:$0xf] %vm2320_vm5, %v2740_v63  ;;  %v2047_v6 = vmax.f32 %v1990_v2, 0.0  ;;  %v1810_v7 = vadd.f32 %v1629_v3, %v403_v24  ;;  %v3669_v28 = vpop.f32.mrf.mxu1  ;;  %v409_v37 = vld [vmem:[#allocation2 + $0xb0] sm:$0xff] }
 0x154   : > { %v1927_v8 = vld [vmem:[#allocation2 + $0x70] sm:$0xff]  ;;  %v1367_v10 = vpop.f32.mrf.mxu0 }
 0x155   : > { %v2741_v11 = vpack.c.bf16 %v2047_v6, %v2047_v6  ;;  %v1991_v13 = vadd.f32 %v3549_v22, %v1927_v8  ;;  %1868 = vst.msk [vmem:[#allocation2 + $0x80] sm:$0xff] %vm328_vm4, %v1810_v7  ;;  %v1632_v15 = vadd.f32 %v3613_v50, %v1367_v10  ;;  %v2886_v34 = vpop.f32.mrf.mxu1 }
 0x156   : > { %v1369_v47 = vpop.f32.mrf.mxu0 }
 0x157   : > { %2334 = vst.msk [vmem:[%s3563_s30 + $0x34] sm:$0xf] %vm2320_vm5, %v2741_v11  ;;  %v2048_v17 = vmax.f32 %v1991_v13, 0.0  ;;  %v1811_v18 = vadd.f32 %v1632_v15, %v404_v35  ;;  %v3676_v39 = vpop.f32.mrf.mxu1  ;;  %v410_v47 = vld [vmem:[#allocation2 + $0xb8] sm:$0xff] }
 0x158   : > { %v1928_v19 = vld [vmem:[#allocation2 + $0x78] sm:$0xff]  ;;  %v1372_v21 = vpop.f32.mrf.mxu0 }
 0x159   : > { %v2742_v59 = vpack.c.bf16 %v2048_v17, %v2048_v17  ;;  %v1992_v25 = vadd.f32 %v3549_v22, %v1928_v19  ;;  %1869 = vst.msk [vmem:[#allocation2 + $0x88] sm:$0xff] %vm328_vm4, %v1811_v18  ;;  %v1637_v27 = vadd.f32 %v3620_v9, %v1372_v21  ;;  %v2889_v45 = vpop.f32.mrf.mxu1 }
 0x15a   : > { %v1374_v50 = vpop.f32.mrf.mxu0 }
 0x15b   : > { %2335 = vst.msk [vmem:[%s3563_s30 + $0x38] sm:$0xf] %vm2320_vm5, %v2742_v59  ;;  %v2049_v29 = vmax.f32 %v1992_v25, 0.0  ;;  %v1812_v30 = vadd.f32 %v1637_v27, %v405_v49  ;;  %v3683_v51 = vpop.f32.mrf.mxu1  ;;  %v411_v27 = vld [vmem:[#allocation2 + $0xc0] sm:$0xff] }
 0x15c   : > { %v1929_v31 = vld [vmem:[#allocation2 + $0x80] sm:$0xff]  ;;  %v1375_v33 = vpop.f32.mrf.mxu0 }
 0x15d   : > { %v2743_v4 = vpack.c.bf16 %v2049_v29, %v2049_v29  ;;  %v1993_v36 = vadd.f32 %v3549_v22, %v1929_v31  ;;  %1870 = vst.msk [vmem:[#allocation2 + $0x90] sm:$0xff] %vm328_vm4, %v1812_v30  ;;  %v1640_v38 = vadd.f32 %v3627_v20, %v1375_v33  ;;  %v2890_v58 = vpop.f32.mrf.mxu1 }
 0x15e   : > { %v1377_v9 = vpop.f32.mrf.mxu0 }
 0x15f   : > { %2336 = vst.msk [vmem:[%s3563_s30 + $0x3c] sm:$0xf] %vm2320_vm5, %v2743_v4  ;;  %v2050_v40 = vmax.f32 %v1993_v36, 0.0  ;;  %v1813_v41 = vadd.f32 %v1640_v38, %v406_v0  ;;  %v3690_v62 = vpop.f32.mrf.mxu1  ;;  %v412_v38 = vld [vmem:[#allocation2 + $0xc8] sm:$0xff] }
 0x160   : > { %v1930_v42 = vld [vmem:[#allocation2 + $0x88] sm:$0xff]  ;;  %v1380_v44 = vpop.f32.mrf.mxu0 }
 0x161   : > { %v2744_v46 = vpack.c.bf16 %v2050_v40, %v2050_v40  ;;  %v1994_v14 = vadd.f32 %v3549_v22, %v1930_v42  ;;  %1871 = vst.msk [vmem:[#allocation2 + $0x98] sm:$0xff] %vm328_vm4, %v1813_v41  ;;  %v1645_v48 = vadd.f32 %v3634_v32, %v1380_v44  ;;  %v2893_v7 = vpop.f32.mrf.mxu1 }
 0x162   : > { %v1382_v20 = vpop.f32.mrf.mxu0 }
 0x163   : > { %2337 = vst.msk [vmem:[%s3563_s30 + $0x40] sm:$0xf] %vm2320_vm5, %v2744_v46  ;;  %v2051_v52 = vmax.f32 %v1994_v14, 0.0  ;;  %v1814_v53 = vadd.f32 %v1645_v48, %v407_v12  ;;  %v3697_v54 = vpop.f32.mrf.mxu1  ;;  %v413_v48 = vld [vmem:[#allocation2 + $0xd0] sm:$0xff] }
 0x164   : > { %v1931_v55 = vld [vmem:[#allocation2 + $0x90] sm:$0xff]  ;;  %v1383_v57 = vpop.f32.mrf.mxu0 }
 0x165   : > { %v2745_v60 = vpack.c.bf16 %v2051_v52, %v2051_v52  ;;  %v1995_v24 = vadd.f32 %v3549_v22, %v1931_v55  ;;  %1872 = vst.msk [vmem:[#allocation2 + $0xa0] sm:$0xff] %vm328_vm4, %v1814_v53  ;;  %v1648_v61 = vadd.f32 %v3641_v43, %v1383_v57  ;;  %v2894_v18 = vpop.f32.mrf.mxu1 }
 0x166   : > { %v1385_v32 = vpop.f32.mrf.mxu0 }
 0x167   : > { %2338 = vst.msk [vmem:[%s3563_s30 + $0x44] sm:$0xf] %vm2320_vm5, %v2745_v60  ;;  %v2052_v63 = vmax.f32 %v1995_v24, 0.0  ;;  %v1815_v2 = vadd.f32 %v1648_v61, %v408_v26  ;;  %v3706_v23 = vpop.f32.mrf.mxu1  ;;  %v414_v61 = vld [vmem:[#allocation2 + $0xd8] sm:$0xff] }
 0x168   : > { %v1932_v3 = vld [vmem:[#allocation2 + $0x98] sm:$0xff]  ;;  %v1388_v6 = vpop.f32.mrf.mxu0 }
 0x169   : > { %v2746_v8 = vpack.c.bf16 %v2052_v63, %v2052_v63  ;;  %v1996_v35 = vadd.f32 %v3549_v22, %v1932_v3  ;;  %1873 = vst.msk [vmem:[#allocation2 + $0xa8] sm:$0xff] %vm328_vm4, %v1815_v2  ;;  %v1653_v10 = vadd.f32 %v3648_v56, %v1388_v6  ;;  %v2897_v29 = vpop.f32.mrf.mxu1 }
 0x16a   : > { %v1390_v43 = vpop.f32.mrf.mxu0 }
 0x16b   : > { %2339 = vst.msk [vmem:[%s3563_s30 + $0x48] sm:$0xf] %vm2320_vm5, %v2746_v8  ;;  %v2053_v11 = vmax.f32 %v1996_v35, 0.0  ;;  %v1816_v13 = vadd.f32 %v1653_v10, %v409_v37  ;;  %v3713_v33 = vpop.f32.mrf.mxu1  ;;  %v415_v10 = vld [vmem:[#allocation2 + $0xe0] sm:$0xff] }
 0x16c   : > { %v1933_v15 = vld [vmem:[#allocation2 + $0xa0] sm:$0xff]  ;;  %v1391_v17 = vpop.f32.mrf.mxu0 }
 0x16d   : > { %v2747_v19 = vpack.c.bf16 %v2053_v11, %v2053_v11  ;;  %v1997_v49 = vadd.f32 %v3549_v22, %v1933_v15  ;;  %1874 = vst.msk [vmem:[#allocation2 + $0xb0] sm:$0xff] %vm328_vm4, %v1816_v13  ;;  %v1656_v56 = vadd.f32 %v3655_v5, %v1391_v17  ;;  %v2898_v40 = vpop.f32.mrf.mxu1 }
 0x16e   : > { %v1393_v21 = vpop.f32.mrf.mxu0 }
 0x16f   : > { %2340 = vst.msk [vmem:[%s3563_s30 + $0x4c] sm:$0xf] %vm2320_vm5, %v2747_v19  ;;  %v2054_v59 = vmax.f32 %v1997_v49, 0.0  ;;  %v1817_v25 = vadd.f32 %v1656_v56, %v410_v47  ;;  %v3720_v44 = vpop.f32.mrf.mxu1  ;;  %v416_v56 = vld [vmem:[#allocation2 + $0xe8] sm:$0xff] }
 0x170   : > { %v1934_v1 = vld [vmem:[#allocation2 + $0xa8] sm:$0xff]  ;;  %v1396_v50 = vpop.f32.mrf.mxu0 }
 0x171   : > { %v2748_v30 = vpack.c.bf16 %v2054_v59, %v2054_v59  ;;  %v1998_v31 = vadd.f32 %v3549_v22, %v1934_v1  ;;  %1875 = vst.msk [vmem:[#allocation2 + $0xb8] sm:$0xff] %vm328_vm4, %v1817_v25  ;;  %v1661_v0 = vadd.f32 %v3662_v16, %v1396_v50  ;;  %v2901_v52 = vpop.f32.mrf.mxu1 }
 0x172   : > { %v1398_v5 = vpop.f32.mrf.mxu0 }
 0x173   : > { %2341 = vst.msk [vmem:[%s3563_s30 + $0x50] sm:$0xf] %vm2320_vm5, %v2748_v30  ;;  %v2055_v34 = vmax.f32 %v1998_v31, 0.0  ;;  %v1818_v4 = vadd.f32 %v1661_v0, %v411_v27  ;;  %v3727_v57 = vpop.f32.mrf.mxu1  ;;  %v417_v0 = vld [vmem:[#allocation2 + $0xf0] sm:$0xff] }
 0x174   : > { %v1935_v36 = vld [vmem:[#allocation2 + $0xb0] sm:$0xff]  ;;  %v1399_v9 = vpop.f32.mrf.mxu0 }
 0x175   : > { %v2749_v41 = vpack.c.bf16 %v2055_v34, %v2055_v34  ;;  %v1999_v42 = vadd.f32 %v3549_v22, %v1935_v36  ;;  %1876 = vst.msk [vmem:[#allocation2 + $0xc0] sm:$0xff] %vm328_vm4, %v1818_v4  ;;  %v1664_v12 = vadd.f32 %v3669_v28, %v1399_v9  ;;  %v2902_v63 = vpop.f32.mrf.mxu1 }
 0x176   : > { %v1401_v16 = vpop.f32.mrf.mxu0 }
 0x177   : > { %2342 = vst.msk [vmem:[%s3563_s30 + $0x54] sm:$0xf] %vm2320_vm5, %v2749_v41  ;;  %v2056_v45 = vmax.f32 %v1999_v42, 0.0  ;;  %v1819_v46 = vadd.f32 %v1664_v12, %v412_v38  ;;  %v3734_v6 = vpop.f32.mrf.mxu1  ;;  %v418_v12 = vld [vmem:[#allocation2 + $0xf8] sm:$0xff] }
 0x178   : > { %v1936_v14 = vld [vmem:[#allocation2 + $0xb8] sm:$0xff]  ;;  %v1404_v20 = vpop.f32.mrf.mxu0 }
 0x179   : > { %v2750_v53 = vpack.c.bf16 %v2056_v45, %v2056_v45  ;;  %v2000_v55 = vadd.f32 %v3549_v22, %v1936_v14  ;;  %1877 = vst.msk [vmem:[#allocation2 + $0xc8] sm:$0xff] %vm328_vm4, %v1819_v46  ;;  %v1669_v26 = vadd.f32 %v3676_v39, %v1404_v20  ;;  %v2905_v11 = vpop.f32.mrf.mxu1 }
 0x17a   : > { %v1406_v28 = vpop.f32.mrf.mxu0 }
 0x17b   : > { %2343 = vst.msk [vmem:[%s3563_s30 + $0x58] sm:$0xf] %vm2320_vm5, %v2750_v53  ;;  %v2057_v58 = vmax.f32 %v2000_v55, 0.0  ;;  %v1820_v60 = vadd.f32 %v1669_v26, %v413_v48  ;;  %v3741_v17 = vpop.f32.mrf.mxu1  ;;  %v419_v26 = vld [vmem:[#allocation2 + $0x100] sm:$0xff] }
 0x17c   : > { %v1937_v24 = vld [vmem:[#allocation2 + $0xc0] sm:$0xff]  ;;  %v1407_v32 = vpop.f32.mrf.mxu0 }
 0x17d   : > { %v2751_v2 = vpack.c.bf16 %v2057_v58, %v2057_v58  ;;  %v2001_v3 = vadd.f32 %v3549_v22, %v1937_v24  ;;  %1878 = vst.msk [vmem:[#allocation2 + $0xd0] sm:$0xff] %vm328_vm4, %v1820_v60  ;;  %v1672_v37 = vadd.f32 %v3683_v51, %v1407_v32  ;;  %v2906_v59 = vpop.f32.mrf.mxu1 }
 0x17e   : > { %v1409_v39 = vpop.f32.mrf.mxu0 }
 0x17f   : > { %2344 = vst.msk [vmem:[%s3563_s30 + $0x5c] sm:$0xf] %vm2320_vm5, %v2751_v2  ;;  %v2058_v7 = vmax.f32 %v2001_v3, 0.0  ;;  %v1821_v8 = vadd.f32 %v1672_v37, %v414_v61  ;;  %v3748_v50 = vpop.f32.mrf.mxu1  ;;  %v420_v37 = vld [vmem:[#allocation2 + $0x108] sm:$0xff] }
 0x180   : > { %v1938_v35 = vld [vmem:[#allocation2 + $0xc8] sm:$0xff]  ;;  %v1412_v43 = vpop.f32.mrf.mxu0 }
 0x181   : > { %v2752_v13 = vpack.c.bf16 %v2058_v7, %v2058_v7  ;;  %v2002_v15 = vadd.f32 %v3549_v22, %v1938_v35  ;;  %1879 = vst.msk [vmem:[#allocation2 + $0xd8] sm:$0xff] %vm328_vm4, %v1821_v8  ;;  %v1677_v47 = vadd.f32 %v3690_v62, %v1412_v43  ;;  %v2909_v34 = vpop.f32.mrf.mxu1 }
 0x182   : > { %v1414_v51 = vpop.f32.mrf.mxu0 }
 0x183   : > { %2345 = vst.msk [vmem:[%s3563_s30 + $0x60] sm:$0xf] %vm2320_vm5, %v2752_v13  ;;  %v2059_v18 = vmax.f32 %v2002_v15, 0.0  ;;  %v1822_v19 = vadd.f32 %v1677_v47, %v415_v10  ;;  %v3755_v9 = vpop.f32.mrf.mxu1  ;;  %v421_v47 = vld [vmem:[#allocation2 + $0x110] sm:$0xff] }
 0x184   : > { %v1939_v49 = vld [vmem:[#allocation2 + $0xd0] sm:$0xff]  ;;  %v1415_v21 = vpop.f32.mrf.mxu0 }
 0x185   : > { %v2753_v25 = vpack.c.bf16 %v2059_v18, %v2059_v18  ;;  %v2003_v1 = vadd.f32 %v3549_v22, %v1939_v49  ;;  %1880 = vst.msk [vmem:[#allocation2 + $0xe0] sm:$0xff] %vm328_vm4, %v1822_v19  ;;  %v1680_v27 = vadd.f32 %v3697_v54, %v1415_v21  ;;  %v2910_v45 = vpop.f32.mrf.mxu1 }
 0x186   : > { %v1417_v62 = vpop.f32.mrf.mxu0 }
 0x187   : > { %2346 = vst.msk [vmem:[%s3563_s30 + $0x64] sm:$0xf] %vm2320_vm5, %v2753_v25  ;;  %v2060_v29 = vmax.f32 %v2003_v1, 0.0  ;;  %v1823_v30 = vadd.f32 %v1680_v27, %v416_v56  ;;  %v3762_v20 = vpop.f32.mrf.mxu1  ;;  %v422_v27 = vld [vmem:[#allocation2 + $0x118] sm:$0xff] }
 0x188   : > { %v1940_v31 = vld [vmem:[#allocation2 + $0xd8] sm:$0xff]  ;;  %v1420_v5 = vpop.f32.mrf.mxu0 }
 0x189   : > { %v2754_v4 = vpack.c.bf16 %v2060_v29, %v2060_v29  ;;  %v2004_v36 = vadd.f32 %v3549_v22, %v1940_v31  ;;  %1881 = vst.msk [vmem:[#allocation2 + $0xe8] sm:$0xff] %vm328_vm4, %v1823_v30  ;;  %v1685_v38 = vadd.f32 %v3706_v23, %v1420_v5  ;;  %v2913_v58 = vpop.f32.mrf.mxu1 }
 0x18a   : > { %v1422_v54 = vpop.f32.mrf.mxu0 }
 0x18b   : > { %2347 = vst.msk [vmem:[%s3563_s30 + $0x68] sm:$0xf] %vm2320_vm5, %v2754_v4  ;;  %v2061_v40 = vmax.f32 %v2004_v36, 0.0  ;;  %v1824_v41 = vadd.f32 %v1685_v38, %v417_v0  ;;  %v3769_v32 = vpop.f32.mrf.mxu1  ;;  %v423_v38 = vld [vmem:[#allocation2 + $0x120] sm:$0xff] }
 0x18c   : > { %v1941_v42 = vld [vmem:[#allocation2 + $0xe0] sm:$0xff]  ;;  %v1423_v16 = vpop.f32.mrf.mxu0 }
 0x18d   : > { %v2755_v46 = vpack.c.bf16 %v2061_v40, %v2061_v40  ;;  %v2005_v14 = vadd.f32 %v3549_v22, %v1941_v42  ;;  %1882 = vst.msk [vmem:[#allocation2 + $0xf0] sm:$0xff] %vm328_vm4, %v1824_v41  ;;  %v1688_v48 = vadd.f32 %v3713_v33, %v1423_v16  ;;  %v2914_v7 = vpop.f32.mrf.mxu1 }
 0x18e   : > { %v1425_v23 = vpop.f32.mrf.mxu0 }
 0x18f   : > { %2348 = vst.msk [vmem:[%s3563_s30 + $0x6c] sm:$0xf] %vm2320_vm5, %v2755_v46  ;;  %v2062_v52 = vmax.f32 %v2005_v14, 0.0  ;;  %v1825_v53 = vadd.f32 %v1688_v48, %v418_v12  ;;  %v3776_v43 = vpop.f32.mrf.mxu1  ;;  %v424_v48 = vld [vmem:[#allocation2 + $0x128] sm:$0xff] }
 0x190   : > { %v1942_v55 = vld [vmem:[#allocation2 + $0xe8] sm:$0xff]  ;;  %v1428_v28 = vpop.f32.mrf.mxu0 }
 0x191   : > { %v2756_v60 = vpack.c.bf16 %v2062_v52, %v2062_v52  ;;  %v2006_v24 = vadd.f32 %v3549_v22, %v1942_v55  ;;  %1883 = vst.msk [vmem:[#allocation2 + $0xf8] sm:$0xff] %vm328_vm4, %v1825_v53  ;;  %v1693_v61 = vadd.f32 %v3720_v44, %v1428_v28  ;;  %v2917_v18 = vpop.f32.mrf.mxu1 }
 0x192   : > { %v1430_v33 = vpop.f32.mrf.mxu0 }
 0x193   : > { %2349 = vst.msk [vmem:[%s3563_s30 + $0x70] sm:$0xf] %vm2320_vm5, %v2756_v60  ;;  %v2063_v63 = vmax.f32 %v2006_v24, 0.0  ;;  %v1826_v2 = vadd.f32 %v1693_v61, %v419_v26  ;;  %v3783_v21 = vpop.f32.mrf.mxu1  ;;  %v425_v61 = vld [vmem:[#allocation2 + $0x130] sm:$0xff] }
 0x194   : > { %v1943_v3 = vld [vmem:[#allocation2 + $0xf0] sm:$0xff]  ;;  %v1431_v39 = vpop.f32.mrf.mxu0 }
 0x195   : > { %v2757_v8 = vpack.c.bf16 %v2063_v63, %v2063_v63  ;;  %v2007_v35 = vadd.f32 %v3549_v22, %v1943_v3  ;;  %1884 = vst.msk [vmem:[#allocation2 + $0x100] sm:$0xff] %vm328_vm4, %v1826_v2  ;;  %v1696_v10 = vadd.f32 %v3727_v57, %v1431_v39  ;;  %v2918_v29 = vpop.f32.mrf.mxu1 }
 0x196   : > { %v1433_v44 = vpop.f32.mrf.mxu0 }
 0x197   : > { %2350 = vst.msk [vmem:[%s3563_s30 + $0x74] sm:$0xf] %vm2320_vm5, %v2757_v8  ;;  %v2064_v11 = vmax.f32 %v2007_v35, 0.0  ;;  %v1827_v13 = vadd.f32 %v1696_v10, %v420_v37  ;;  %v3790_v5 = vpop.f32.mrf.mxu1  ;;  %v426_v10 = vld [vmem:[#allocation2 + $0x138] sm:$0xff] }
 0x198   : > { %v1944_v15 = vld [vmem:[#allocation2 + $0xf8] sm:$0xff]  ;;  %v1436_v51 = vpop.f32.mrf.mxu0 }
 0x199   : > { %v2758_v19 = vpack.c.bf16 %v2064_v11, %v2064_v11  ;;  %v2008_v49 = vadd.f32 %v3549_v22, %v1944_v15  ;;  %1885 = vst.msk [vmem:[#allocation2 + $0x108] sm:$0xff] %vm328_vm4, %v1827_v13  ;;  %v1701_v56 = vadd.f32 %v3734_v6, %v1436_v51  ;;  %v2921_v40 = vpop.f32.mrf.mxu1 }
 0x19a   : > { %v1438_v57 = vpop.f32.mrf.mxu0 }
 0x19b   : > { %2351 = vst.msk [vmem:[%s3563_s30 + $0x78] sm:$0xf] %vm2320_vm5, %v2758_v19  ;;  %v2065_v59 = vmax.f32 %v2008_v49, 0.0  ;;  %v1828_v25 = vadd.f32 %v1701_v56, %v421_v47  ;;  %v3797_v16 = vpop.f32.mrf.mxu1  ;;  %v427_v56 = vld [vmem:[#allocation2 + $0x140] sm:$0xff] }
 0x19c   : > { %v1945_v1 = vld [vmem:[#allocation2 + $0x100] sm:$0xff]  ;;  %v1439_v62 = vpop.f32.mrf.mxu0 }
 0x19d   : > { %v2759_v30 = vpack.c.bf16 %v2065_v59, %v2065_v59  ;;  %v2009_v31 = vadd.f32 %v3549_v22, %v1945_v1  ;;  %1886 = vst.msk [vmem:[#allocation2 + $0x110] sm:$0xff] %vm328_vm4, %v1828_v25  ;;  %v1704_v0 = vadd.f32 %v3741_v17, %v1439_v62  ;;  %v2922_v52 = vpop.f32.mrf.mxu1 }
 0x19e   : > { %v1441_v6 = vpop.f32.mrf.mxu0 }
 0x19f   : > { %2352 = vst.msk [vmem:[%s3563_s30 + $0x7c] sm:$0xf] %vm2320_vm5, %v2759_v30  ;;  %v2066_v34 = vmax.f32 %v2009_v31, 0.0  ;;  %v1829_v4 = vadd.f32 %v1704_v0, %v422_v27  ;;  %v3804_v28 = vpop.f32.mrf.mxu1  ;;  %v428_v0 = vld [vmem:[#allocation2 + $0x148] sm:$0xff] }
 0x1a0   : > { %v1946_v36 = vld [vmem:[#allocation2 + $0x108] sm:$0xff]  ;;  %v1444_v54 = vpop.f32.mrf.mxu0 }
 0x1a1   : > { %v2760_v41 = vpack.c.bf16 %v2066_v34, %v2066_v34  ;;  %v2010_v42 = vadd.f32 %v3549_v22, %v1946_v36  ;;  %1887 = vst.msk [vmem:[#allocation2 + $0x118] sm:$0xff] %vm328_vm4, %v1829_v4  ;;  %v1709_v12 = vadd.f32 %v3748_v50, %v1444_v54  ;;  %v2925_v63 = vpop.f32.mrf.mxu1  ;;  %v3830_v36 = vld [vmem:[%s3543_s26] ss:$0 sm:$0xff] }
 0x1a2   : > { %v1446_v17 = vpop.f32.mrf.mxu0 }
 0x1a3   : > { %2353 = vst.msk [vmem:[%s3563_s30 + $0x80] sm:$0xf] %vm2320_vm5, %v2760_v41  ;;  %v2067_v45 = vmax.f32 %v2010_v42, 0.0  ;;  %v1830_v46 = vadd.f32 %v1709_v12, %v423_v38  ;;  %v3811_v39 = vpop.f32.mrf.mxu1  ;;  %v429_v12 = vld [vmem:[#allocation2 + $0x150] sm:$0xff] }
 0x1a4   : > { %v1947_v14 = vld [vmem:[#allocation2 + $0x110] sm:$0xff]  ;;  %v1447_v23 = vpop.f32.mrf.mxu0 }
 0x1a5   : > { %v2761_v53 = vpack.c.bf16 %v2067_v45, %v2067_v45  ;;  %v2011_v55 = vadd.f32 %v3549_v22, %v1947_v14  ;;  %1888 = vst.msk [vmem:[#allocation2 + $0x120] sm:$0xff] %vm328_vm4, %v1830_v46  ;;  %v1712_v26 = vadd.f32 %v3755_v9, %v1447_v23  ;;  %v2926_v11 = vpop.f32.mrf.mxu1 }
 0x1a6   : > { %v1449_v50 = vpop.f32.mrf.mxu0 }
 0x1a7   : > { %2354 = vst.msk [vmem:[%s3563_s30 + $0x84] sm:$0xf] %vm2320_vm5, %v2761_v53  ;;  %v2068_v58 = vmax.f32 %v2011_v55, 0.0  ;;  %v1831_v60 = vadd.f32 %v1712_v26, %v424_v48  ;;  %v3818_v51 = vpop.f32.mrf.mxu1  ;;  %v430_v26 = vld [vmem:[#allocation2 + $0x158] sm:$0xff] }
 0x1a8   : > { %v1948_v24 = vld [vmem:[#allocation2 + $0x118] sm:$0xff]  ;;  %v1452_v33 = vpop.f32.mrf.mxu0 }
 0x1a9   : > { %v2762_v2 = vpack.c.bf16 %v2068_v58, %v2068_v58  ;;  %v2012_v3 = vadd.f32 %v3549_v22, %v1948_v24  ;;  %1889 = vst.msk [vmem:[#allocation2 + $0x128] sm:$0xff] %vm328_vm4, %v1831_v60  ;;  %v1717_v37 = vadd.f32 %v3762_v20, %v1452_v33  ;;  %v2929_v59 = vpop.f32.mrf.mxu1 }
 0x1aa   : > { %v1454_v9 = vpop.f32.mrf.mxu0 }
 0x1ab   : > { %2355 = vst.msk [vmem:[%s3563_s30 + $0x88] sm:$0xf] %vm2320_vm5, %v2762_v2  ;;  %v2069_v7 = vmax.f32 %v2012_v3, 0.0  ;;  %v1832_v8 = vadd.f32 %v1717_v37, %v425_v61  ;;  %v3825_v62 = vpop.f32.mrf.mxu1  ;;  %v431_v37 = vld [vmem:[#allocation2 + $0x160] sm:$0xff] }
 0x1ac   : > { %v1949_v35 = vld [vmem:[#allocation2 + $0x120] sm:$0xff]  ;;  %v1455_v44 = vpop.f32.mrf.mxu0 }
 0x1ad   : > { %v2763_v13 = vpack.c.bf16 %v2069_v7, %v2069_v7  ;;  %v2013_v15 = vadd.f32 %v3549_v22, %v1949_v35  ;;  %1890 = vst.msk [vmem:[#allocation2 + $0x130] sm:$0xff] %vm328_vm4, %v1832_v8  ;;  %v1720_v47 = vadd.f32 %v3769_v32, %v1455_v44  ;;  %v2930_v34 = vpop.f32.mrf.mxu1 }
 0x1ae   : > { %v1457_v20 = vpop.f32.mrf.mxu0 }
 0x1af   : > { %2356 = vst.msk [vmem:[%s3563_s30 + $0x8c] sm:$0xf] %vm2320_vm5, %v2763_v13  ;;  %v2070_v18 = vmax.f32 %v2013_v15, 0.0  ;;  %v1833_v19 = vadd.f32 %v1720_v47, %v426_v10  ;;  %v3835_v54 = vpop.f32.mrf.mxu1  ;;  %v432_v47 = vld [vmem:[#allocation2 + $0x168] sm:$0xff] }
 0x1b0   : > { %v1950_v49 = vld [vmem:[#allocation2 + $0x128] sm:$0xff]  ;;  %v1460_v57 = vpop.f32.mrf.mxu0 }
 0x1b1   : > { %v2764_v25 = vpack.c.bf16 %v2070_v18, %v2070_v18  ;;  %v2014_v1 = vadd.f32 %v3549_v22, %v1950_v49  ;;  %1891 = vst.msk [vmem:[#allocation2 + $0x138] sm:$0xff] %vm328_vm4, %v1833_v19  ;;  %v1725_v32 = vadd.f32 %v3776_v43, %v1460_v57  ;;  %v2933_v45 = vpop.f32.mrf.mxu1 }
 0x1b2   : > { %v1462_v27 = vpop.f32.mrf.mxu0 }
 0x1b3   : > { %2357 = vst.msk [vmem:[%s3563_s30 + $0x90] sm:$0xf] %vm2320_vm5, %v2764_v25  ;;  %v2071_v29 = vmax.f32 %v2014_v1, 0.0  ;;  %v1834_v30 = vadd.f32 %v1725_v32, %v427_v56  ;;  %v3842_v23 = vpop.f32.mrf.mxu1  ;;  %v433_v32 = vld [vmem:[#allocation2 + $0x170] sm:$0xff] }
 0x1b4   : > { %v1951_v31 = vld [vmem:[#allocation2 + $0x130] sm:$0xff]  ;;  %v1463_v6 = vpop.f32.mrf.mxu0 }
 0x1b5   : > { %v2765_v4 = vpack.c.bf16 %v2071_v29, %v2071_v29  ;;  %v2015_v22 = vadd.f32 %v3830_v36, %v1951_v31  ;;  %1892 = vst.msk [vmem:[#allocation2 + $0x140] sm:$0xff] %vm328_vm4, %v1834_v30  ;;  %v1728_v43 = vadd.f32 %v3783_v21, %v1463_v6  ;;  %v2934_v58 = vpop.f32.mrf.mxu1 }
 0x1b6   : > { %v1465_v38 = vpop.f32.mrf.mxu0 }
 0x1b7   : > { %2358 = vst.msk [vmem:[%s3563_s30 + $0x94] sm:$0xf] %vm2320_vm5, %v2765_v4  ;;  %v2072_v40 = vmax.f32 %v2015_v22, 0.0  ;;  %v1835_v41 = vadd.f32 %v1728_v43, %v428_v0  ;;  %v3849_v33 = vpop.f32.mrf.mxu1  ;;  %v434_v43 = vld [vmem:[#allocation2 + $0x178] sm:$0xff] }
 0x1b8   : > { %v1952_v42 = vld [vmem:[#allocation2 + $0x138] sm:$0xff]  ;;  %v1468_v17 = vpop.f32.mrf.mxu0 }
 0x1b9   : > { %v2766_v46 = vpack.c.bf16 %v2072_v40, %v2072_v40  ;;  %v2016_v14 = vadd.f32 %v3830_v36, %v1952_v42  ;;  %1893 = vst.msk [vmem:[#allocation2 + $0x148] sm:$0xff] %vm328_vm4, %v1835_v41  ;;  %v1733_v48 = vadd.f32 %v3790_v5, %v1468_v17  ;;  %v2937_v7 = vpop.f32.mrf.mxu1 }
 0x1ba   : > { %v1470_v21 = vpop.f32.mrf.mxu0 }
 0x1bb   : > { %2359 = vst.msk [vmem:[%s3563_s30 + $0x98] sm:$0xf] %vm2320_vm5, %v2766_v46  ;;  %v2073_v52 = vmax.f32 %v2016_v14, 0.0  ;;  %v1836_v53 = vadd.f32 %v1733_v48, %v429_v12  ;;  %v3856_v44 = vpop.f32.mrf.mxu1  ;;  %v435_v48 = vld [vmem:[#allocation2 + $0x180] sm:$0xff] }
 0x1bc   : > { %v1953_v55 = vld [vmem:[#allocation2 + $0x140] sm:$0xff]  ;;  %v1471_v50 = vpop.f32.mrf.mxu0 }
 0x1bd   : > { %v2767_v60 = vpack.c.bf16 %v2073_v52, %v2073_v52  ;;  %v2017_v24 = vadd.f32 %v3830_v36, %v1953_v55  ;;  %1894 = vst.msk [vmem:[#allocation2 + $0x150] sm:$0xff] %vm328_vm4, %v1836_v53  ;;  %v1736_v61 = vadd.f32 %v3797_v16, %v1471_v50  ;;  %v2938_v18 = vpop.f32.mrf.mxu1 }
 0x1be   : > { %v1473_v5 = vpop.f32.mrf.mxu0 }
 0x1bf   : > { %2360 = vst.msk [vmem:[%s3563_s30 + $0x9c] sm:$0xf] %vm2320_vm5, %v2767_v60  ;;  %v2074_v63 = vmax.f32 %v2017_v24, 0.0  ;;  %v1837_v2 = vadd.f32 %v1736_v61, %v430_v26  ;;  %v3863_v57 = vpop.f32.mrf.mxu1  ;;  %v436_v61 = vld [vmem:[#allocation2 + $0x188] sm:$0xff] }
 0x1c0   : > { %v1954_v3 = vld [vmem:[#allocation2 + $0x148] sm:$0xff]  ;;  %v1476_v9 = vpop.f32.mrf.mxu0 }
 0x1c1   : > { %v2768_v8 = vpack.c.bf16 %v2074_v63, %v2074_v63  ;;  %v2018_v35 = vadd.f32 %v3830_v36, %v1954_v3  ;;  %1895 = vst.msk [vmem:[#allocation2 + $0x158] sm:$0xff] %vm328_vm4, %v1837_v2  ;;  %v1741_v10 = vadd.f32 %v3804_v28, %v1476_v9  ;;  %v2941_v29 = vpop.f32.mrf.mxu1 }
 0x1c2   : > { %v1478_v16 = vpop.f32.mrf.mxu0 }
 0x1c3   : > { %2361 = vst.msk [vmem:[%s3563_s30 + $0xa0] sm:$0xf] %vm2320_vm5, %v2768_v8  ;;  %v2075_v11 = vmax.f32 %v2018_v35, 0.0  ;;  %v1838_v13 = vadd.f32 %v1741_v10, %v431_v37  ;;  %v3870_v6 = vpop.f32.mrf.mxu1  ;;  %v437_v10 = vld [vmem:[#allocation2 + $0x190] sm:$0xff] }
 0x1c4   : > { %v1955_v15 = vld [vmem:[#allocation2 + $0x150] sm:$0xff]  ;;  %v1479_v20 = vpop.f32.mrf.mxu0 }
 0x1c5   : > { %v2769_v19 = vpack.c.bf16 %v2075_v11, %v2075_v11  ;;  %v2019_v49 = vadd.f32 %v3830_v36, %v1955_v15  ;;  %1896 = vst.msk [vmem:[#allocation2 + $0x160] sm:$0xff] %vm328_vm4, %v1838_v13  ;;  %v1744_v56 = vadd.f32 %v3811_v39, %v1479_v20  ;;  %v2942_v40 = vpop.f32.mrf.mxu1 }
 0x1c6   : > { %v1481_v28 = vpop.f32.mrf.mxu0  ;;  %v440_v40 = vld [vmem:[#allocation2 + $0x1a8] sm:$0xff] }
 0x1c7   : > { %2362 = vst.msk [vmem:[%s3563_s30 + $0xa4] sm:$0xf] %vm2320_vm5, %v2769_v19  ;;  %v2076_v59 = vmax.f32 %v2019_v49, 0.0  ;;  %v1839_v25 = vadd.f32 %v1744_v56, %v432_v47  ;;  %v3877_v17 = vpop.f32.mrf.mxu1  ;;  %v438_v56 = vld [vmem:[#allocation2 + $0x198] sm:$0xff] }
 0x1c8   : > { %v1956_v1 = vld [vmem:[#allocation2 + $0x158] sm:$0xff]  ;;  %v1484_v27 = vpop.f32.mrf.mxu0 }
 0x1c9   : > { %v2770_v30 = vpack.c.bf16 %v2076_v59, %v2076_v59  ;;  %v2020_v31 = vadd.f32 %v3830_v36, %v1956_v1  ;;  %1897 = vst.msk [vmem:[#allocation2 + $0x168] sm:$0xff] %vm328_vm4, %v1839_v25  ;;  %v1749_v0 = vadd.f32 %v3818_v51, %v1484_v27  ;;  %v2945_v52 = vpop.f32.mrf.mxu1 }
 0x1ca   : > { %v1486_v39 = vpop.f32.mrf.mxu0 }
 0x1cb   : > { %2363 = vst.msk [vmem:[%s3563_s30 + $0xa8] sm:$0xf] %vm2320_vm5, %v2770_v30  ;;  %v2077_v34 = vmax.f32 %v2020_v31, 0.0  ;;  %v1840_v4 = vadd.f32 %v1749_v0, %v433_v32  ;;  %v3884_v50 = vpop.f32.mrf.mxu1  ;;  %v439_v31 = vld [vmem:[#allocation2 + $0x1a0] sm:$0xff] }
 0x1cc   : > { %v1957_v22 = vld [vmem:[#allocation2 + $0x160] sm:$0xff]  ;;  %v1487_v38 = vpop.f32.mrf.mxu0 }
 0x1cd   : > { %v2771_v41 = vpack.c.bf16 %v2077_v34, %v2077_v34  ;;  %v2021_v42 = vadd.f32 %v3830_v36, %v1957_v22  ;;  %1898 = vst.msk [vmem:[#allocation2 + $0x170] sm:$0xff] %vm328_vm4, %v1840_v4  ;;  %v1752_v12 = vadd.f32 %v3825_v62, %v1487_v38  ;;  %v2946_v63 = vpop.f32.mrf.mxu1 }
 0x1ce   : > { %v1489_v51 = vpop.f32.mrf.mxu0 }
 0x1cf   : > { %2364 = vst.msk [vmem:[%s3563_s30 + $0xac] sm:$0xf] %vm2320_vm5, %v2771_v41  ;;  %v2078_v45 = vmax.f32 %v2021_v42, 0.0  ;;  %v1841_v46 = vadd.f32 %v1752_v12, %v434_v43  ;;  %v3891_v9 = vpop.f32.mrf.mxu1 }
 0x1d0   : > { %v1958_v14 = vld [vmem:[#allocation2 + $0x168] sm:$0xff]  ;;  %v1492_v21 = vpop.f32.mrf.mxu0 }
 0x1d1   : > { %v2772_v53 = vpack.c.bf16 %v2078_v45, %v2078_v45  ;;  %v2022_v55 = vadd.f32 %v3830_v36, %v1958_v14  ;;  %1899 = vst.msk [vmem:[#allocation2 + $0x178] sm:$0xff] %vm328_vm4, %v1841_v46  ;;  %v1757_v26 = vadd.f32 %v3835_v54, %v1492_v21  ;;  %v2949_v11 = vpop.f32.mrf.mxu1 }
 0x1d2   : > { %v1494_v62 = vpop.f32.mrf.mxu0 }
 0x1d3   : > { %2365 = vst.msk [vmem:[%s3563_s30 + $0xb0] sm:$0xf] %vm2320_vm5, %v2772_v53  ;;  %v2079_v58 = vmax.f32 %v2022_v55, 0.0  ;;  %v1842_v60 = vadd.f32 %v1757_v26, %v435_v48  ;;  %v1791_v20 = vpop.f32.mrf.mxu1  ;;  %v441_v48 = vld [vmem:[#allocation2 + $0x1b0] sm:$0xff] }
 0x1d4   : > { %v1959_v24 = vld [vmem:[#allocation2 + $0x170] sm:$0xff]  ;;  %v1495_v5 = vpop.f32.mrf.mxu0 }
 0x1d5   : > { %v2773_v2 = vpack.c.bf16 %v2079_v58, %v2079_v58  ;;  %v2023_v3 = vadd.f32 %v3830_v36, %v1959_v24  ;;  %1900 = vst.msk [vmem:[#allocation2 + $0x180] sm:$0xff] %vm328_vm4, %v1842_v60  ;;  %v1760_v37 = vadd.f32 %v3842_v23, %v1495_v5  ;;  %v2950_v59 = vpop.f32.mrf.mxu1  ;;  %v442_v60 = vld [vmem:[#allocation2 + $0x1b8] sm:$0xff] }
 0x1d6   : > { %v1497_v54 = vpop.f32.mrf.mxu0 }
 0x1d7   : > { %2366 = vst.msk [vmem:[%s3563_s30 + $0xb4] sm:$0xf] %vm2320_vm5, %v2773_v2  ;;  %v2080_v7 = vmax.f32 %v2023_v3, 0.0  ;;  %v1843_v8 = vadd.f32 %v1760_v37, %v436_v61  ;;  %v443_v54 = vld [vmem:[#allocation2 + $0x1c0] sm:$0x3] }
 0x1d8   : > { %v1960_v35 = vld [vmem:[#allocation2 + $0x178] sm:$0xff]  ;;  %v1500_v16 = vpop.f32.mrf.mxu0 }
 0x1d9   : > { %v2774_v13 = vpack.c.bf16 %v2080_v7, %v2080_v7  ;;  %v2024_v15 = vadd.f32 %v3830_v36, %v1960_v35  ;;  %1901 = vst.msk [vmem:[#allocation2 + $0x188] sm:$0xff] %vm328_vm4, %v1843_v8  ;;  %v1765_v23 = vadd.f32 %v3849_v33, %v1500_v16 }
 0x1da   : > { %v1502_v47 = vpop.f32.mrf.mxu0 }
 0x1db   : > { %2367 = vst.msk [vmem:[%s3563_s30 + $0xb8] sm:$0xf] %vm2320_vm5, %v2774_v13  ;;  %v2081_v18 = vmax.f32 %v2024_v15, 0.0  ;;  %v1844_v19 = vadd.f32 %v1765_v23, %v437_v10 }
 0x1dc   : > { %v1961_v49 = vld [vmem:[#allocation2 + $0x180] sm:$0xff]  ;;  %v1503_v28 = vpop.f32.mrf.mxu0 }
 0x1dd   : > { %v2775_v25 = vpack.c.bf16 %v2081_v18, %v2081_v18  ;;  %v2025_v1 = vadd.f32 %v3830_v36, %v1961_v49  ;;  %1902 = vst.msk [vmem:[#allocation2 + $0x190] sm:$0xff] %vm328_vm4, %v1844_v19  ;;  %v1768_v32 = vadd.f32 %v3856_v44, %v1503_v28 }
 0x1de   : > { %v1505_v27 = vpop.f32.mrf.mxu0 }
 0x1df   : > { %2368 = vst.msk [vmem:[%s3563_s30 + $0xbc] sm:$0xf] %vm2320_vm5, %v2775_v25  ;;  %v2082_v33 = vmax.f32 %v2025_v1, 0.0  ;;  %v1845_v29 = vadd.f32 %v1768_v32, %v438_v56 }
 0x1e0   : > { %v1962_v30 = vld [vmem:[#allocation2 + $0x188] sm:$0xff]  ;;  %v1508_v0 = vpop.f32.mrf.mxu0 }
 0x1e1   : > { %v2776_v39 = vpack.c.bf16 %v2082_v33, %v2082_v33  ;;  %v2026_v34 = vadd.f32 %v3830_v36, %v1962_v30  ;;  %1903 = vst.msk [vmem:[#allocation2 + $0x198] sm:$0xff] %vm328_vm4, %v1845_v29  ;;  %v1773_v4 = vadd.f32 %v3863_v57, %v1508_v0 }
 0x1e2   : > { %v1510_v22 = vpop.f32.mrf.mxu0 }
 0x1e3   : > { %2369 = vst.msk [vmem:[%s3563_s30 + $0xc0] sm:$0xf] %vm2320_vm5, %v2776_v39  ;;  %v2083_v44 = vmax.f32 %v2026_v34, 0.0  ;;  %v1846_v43 = vadd.f32 %v1773_v4, %v439_v31 }
 0x1e4   : > { %v1963_v38 = vld [vmem:[#allocation2 + $0x190] sm:$0xff]  ;;  %v1511_v41 = vpop.f32.mrf.mxu0 }
 0x1e5   : > { %v2777_v42 = vpack.c.bf16 %v2083_v44, %v2083_v44  ;;  %v2027_v12 = vadd.f32 %v3830_v36, %v1963_v38  ;;  %1904 = vst.msk [vmem:[#allocation2 + $0x1a0] sm:$0xff] %vm328_vm4, %v1846_v43  ;;  %v1776_v51 = vadd.f32 %v3870_v6, %v1511_v41 }
 0x1e6   : > { %v1513_v45 = vpop.f32.mrf.mxu0 }
 0x1e7   : > { %2370 = vst.msk [vmem:[%s3563_s30 + $0xc4] sm:$0xf] %vm2320_vm5, %v2777_v42  ;;  %v2084_v57 = vmax.f32 %v2027_v12, 0.0  ;;  %v1847_v46 = vadd.f32 %v1776_v51, %v440_v40 }
 0x1e8   : > { %v1964_v14 = vld [vmem:[#allocation2 + $0x198] sm:$0xff]  ;;  %v1516_v21 = vpop.f32.mrf.mxu0 }
 0x1e9   : > { %v2778_v52 = vpack.c.bf16 %v2084_v57, %v2084_v57  ;;  %v2028_v53 = vadd.f32 %v3830_v36, %v1964_v14  ;;  %1905 = vst.msk [vmem:[#allocation2 + $0x1a8] sm:$0xff] %vm328_vm4, %v1847_v46  ;;  %v1781_v55 = vadd.f32 %v3877_v17, %v1516_v21 }
 0x1ea   : > { %v1518_v26 = vpop.f32.mrf.mxu0 }
 0x1eb   : > { %2371 = vst.msk [vmem:[%s3563_s30 + $0xc8] sm:$0xf] %vm2320_vm5, %v2778_v52  ;;  %v2085_v6 = vmax.f32 %v2028_v53, 0.0  ;;  %v1848_v62 = vadd.f32 %v1781_v55, %v441_v48 }
 0x1ec   : > { %v1965_v58 = vld [vmem:[#allocation2 + $0x1a0] sm:$0xff]  ;;  %v1519_v24 = vpop.f32.mrf.mxu0 }
 0x1ed   : > { %v2779_v61 = vpack.c.bf16 %v2085_v6, %v2085_v6  ;;  %v2029_v5 = vadd.f32 %v3830_v36, %v1965_v58  ;;  %1906 = vst.msk [vmem:[#allocation2 + $0x1b0] sm:$0xff] %vm328_vm4, %v1848_v62  ;;  %v1784_v63 = vadd.f32 %v3884_v50, %v1519_v24 }
 0x1ee   : > { %v1521_v2 = vpop.f32.mrf.mxu0 }
 0x1ef   : > { %2372 = vst.msk [vmem:[%s3563_s30 + $0xcc] sm:$0xf] %vm2320_vm5, %v2779_v61  ;;  %v2086_v17 = vmax.f32 %v2029_v5, 0.0  ;;  %v1849_v3 = vadd.f32 %v1784_v63, %v442_v60 }
 0x1f0   : > { %v1966_v37 = vld [vmem:[#allocation2 + $0x1a8] sm:$0xff]  ;;  %v1524_v7 = vpop.f32.mrf.mxu0 }
 0x1f1   : > { %v2780_v8 = vpack.c.bf16 %v2086_v17, %v2086_v17  ;;  %v2030_v35 = vadd.f32 %v3830_v36, %v1966_v37  ;;  %1907 = vst.msk [vmem:[#allocation2 + $0x1b8] sm:$0xff] %vm328_vm4, %v1849_v3  ;;  %v1789_v10 = vadd.f32 %v3891_v9, %v1524_v7 }
 0x1f2   : > { %v1526_v16 = vpop.f32.mrf.mxu0 }
 0x1f3   : > { %2373 = vst.msk [vmem:[%s3563_s30 + $0xd0] sm:$0xf] %vm2320_vm5, %v2780_v8  ;;  %v2087_v50 = vmax.f32 %v2030_v35, 0.0  ;;  %v1850_v11 = vadd.f32 %v1789_v10, %v443_v54 }
 0x1f4   : > { %v1967_v13 = vld [vmem:[#allocation2 + $0x1b0] sm:$0xff]  ;;  %v1527_v15 = vpop.f32.mrf.mxu0 }
 0x1f5   : > { %v2781_v23 = vpack.c.bf16 %v2087_v50, %v2087_v50  ;;  %v2031_v47 = vadd.f32 %v3830_v36, %v1967_v13  ;;  %1909 = vst.msk [vmem:[#allocation2 + $0x1c0] sm:$0x3] %vm385_vm6, %v1850_v11 }
 0x1f6   : > { %v1528_v20 = vpop.f32.mrf.mxu0 }
 0x1f7   : > { %2374 = vst.msk [vmem:[%s3563_s30 + $0xd4] sm:$0xf] %vm2320_vm5, %v2781_v23  ;;  %v2088_v18 = vmax.f32 %v2031_v47, 0.0 }
 0x1f8   : > { %v1968_v9 = vld [vmem:[#allocation2 + $0x1b8] sm:$0xff] }
 0x1f9   : > { %v2782_v19 = vpack.c.bf16 %v2088_v18, %v2088_v18  ;;  %v2032_v49 = vadd.f32 %v3830_v36, %v1968_v9 }
 0x1fb   : > { %2375 = vst.msk [vmem:[%s3563_s30 + $0xd8] sm:$0xf] %vm2320_vm5, %v2782_v19  ;;  %v2089_v56 = vmax.f32 %v2032_v49, 0.0 }
 0x1fc   : > { %v1969_v28 = vld [vmem:[#allocation2 + $0x1c0] sm:$0x3] }
 0x1fd   : > { %v2783_v59 = vpack.c.bf16 %v2089_v56, %v2089_v56  ;;  %v2033_v25 = vadd.f32 %v3830_v36, %v1969_v28 }
 0x1ff   : > { %2376 = vst.msk [vmem:[%s3563_s30 + $0xdc] sm:$0xf] %vm2320_vm5, %v2783_v59  ;;  %v2090_v1 = vmax.f32 %v2033_v25, 0.0 }
 0x201   : > { %v2784_v32 = vpack.c.bf16 %v2090_v1, %v2090_v1 }
 0x203   : > { %2378 = vst.msk [vmem:[%s3563_s30 + $0xe0] sm:$0x1] %vm2377_vm7, %v2784_v32 }
 0x204 PF: > { %s13_s14 = sadd.s32 1, %s3139_s14   ;;  %s3954_s12 = smov %s3135_s13 }
 0x205   : > { %p10_p5 = scmp.ge.s32.totalorder %s13_s14, 4   ;;  %s3955_s13 = smov %s3957_s15 }
 0x207   :  { %12 = sbr.rel (!%p10_p5) target bundleno = 2 (0x2), region = 76 }

// kernel: goturn_forward.10
= control target key start
LH: loop header
LB: loop body
LE: loop exit
PB: predicated region body
PF: predicated region fallthrough
CT: control target
= control target key end

     0   :  { %s1135_s12 = smov 0   ;;  %s1137_s13 = smov 0   ;;  %s1324_s0 = inlined_call_operand.vmem [shape: bf16[4,98,200], index: 0, kind: input, shape index: {}]   ;;  %s1325_s1 = inlined_call_operand.vmem [shape: bf16[4,200,16], index: 1, kind: input, shape index: {}]   ;;  %s1326_s2 = inlined_call_operand.vmem [shape: f32[4,1,16], index: 2, kind: input, shape index: {}]   ;;  %s1327_s3 = inlined_call_operand.vmem [shape: bf16[4,98,16], index: 3, kind: output, shape index: {}]  }
   0x1   :  { %s1139_s14 = smov 0  }
   0x2 LB: > { %s39_s15 = sadd.s32 1, %s1107_s13  ;;  %p934_p0 = scmp.ge.s32.totalorder %s1111_s14, 1  ;;  %s1111_s14 = sphi %s1139_s14, %s13_s14   ;;  %s1107_s13 = sphi %s1137_s13, %s1329_s13   ;;  %s1103_s12 = sphi %s1135_s12, %s1328_s12  }
   0x3   : > { %p41_p1 = scmp.ge.s32.totalorder %s39_s15, 4  ;;  %p217_p2 = scmp.lt.s32.totalorder %s1111_s14, 5 }
   0x5   : > { %s1331_s15 = smov (%p41_p1, %s39_s15), 0  ;;  %p218_p3 = pnand %p934_p0, %p217_p2 }
   0x6   : > { %p277_p4 = scmp.lt.s32.totalorder (!%p218_p3), %s1103_s12, 3 }
   0x7   : > { %221 = sbr.rel (%p218_p3) target bundleno = 306 (0x132), region = 32 }
   0xc   : > { %vm328_vm0 = vcmask 130048   ;;  %v1113_v0 = vmov 0   ;;  %s1333_s12 = smov (!%p277_p4, %s1103_s12), 3  ;;  %v1114_v1 = vmov 0.0   ;;  %vm529_vm1 = vcmask 588800  }
   0xd   : > { %555 = vmatprep.subr.bf16.mxu0 %v1113_v0  ;;  %1001 = vmatprep.subr.bf16.mxu1 %v1113_v0  ;;  %329 = vst.msk [vmem:[#allocation2] sm:$0xff] %vm328_vm0, %v1114_v1  ;;  %330 = vst.msk [vmem:[#allocation2 + $0x8] sm:$0xff] %vm328_vm0, %v1114_v1  ;;  %s1028_s16 = smul.u32 100, %s1333_s12  ;;  %vm551_vm2 = vcmask 1043456   ;;  %vm341_vm3 = vcmask 123904   ;;  %s309_s26 = scalar_lea.vmem %s1326_s2, %s1333_s12  ;;  %vm773_vm4 = vcmask 125952  }
   0xe   : > { %331 = vst.msk [vmem:[#allocation2 + $0x10] sm:$0xff] %vm328_vm0, %v1114_v1  ;;  %332 = vst.msk [vmem:[#allocation2 + $0x18] sm:$0xff] %vm328_vm0, %v1114_v1  ;;  %s1027_s20 = smul.u32 104, %s1333_s12  ;;  %v1260_v49 = vld [vmem:[%s309_s26] ss:$0 sm:$0xff]  ;;  %vm786_vm5 = vcmask 122880  }
   0xf   : > { %333 = vst.msk [vmem:[#allocation2 + $0x20] sm:$0xff] %vm328_vm0, %v1114_v1  ;;  %334 = vst.msk [vmem:[#allocation2 + $0x28] sm:$0xff] %vm328_vm0, %v1114_v1  ;;  %s1185_s19 = scalar_lea.vmem %s1325_s1, %s1028_s16  ;;  %s1029_s27 = smul.u32 52, %s1333_s12 }
  0x10   : > { %335 = vst.msk [vmem:[#allocation2 + $0x30] sm:$0xff] %vm328_vm0, %v1114_v1  ;;  %336 = vst.msk [vmem:[#allocation2 + $0x38] sm:$0xff] %vm328_vm0, %v1114_v1  ;;  %v1056_v2 = vld [vmem:[%s1185_s19 + $0x38] sm:$0xff]   ;;  %v1057_v3 = vld [vmem:[%s1185_s19 + $0x30] sm:$0xff]   ;;  %s1199_s23 = scalar_lea.vmem %s1324_s0, %s1027_s20 }
  0x11   : > { %337 = vst.msk [vmem:[#allocation2 + $0x40] sm:$0xff] %vm328_vm0, %v1114_v1  ;;  %338 = vst.msk [vmem:[#allocation2 + $0x48] sm:$0xff] %vm328_vm0, %v1114_v1  ;;  %556 = vmatpush1.bf16.msra.mxu0 %v1056_v2  ;;  %1014 = vmatpush1.bf16.msra.mxu1 %v1056_v2  ;;  %v1058_v4 = vld [vmem:[%s1185_s19 + $0x28] sm:$0xff]   ;;  %v1059_v5 = vld [vmem:[%s1185_s19 + $0x20] sm:$0xff]   ;;  %s1270_s30 = scalar_lea.vmem %s1327_s3, %s1029_s27 }
  0x12   : > { %339 = vst.msk [vmem:[#allocation2 + $0x50] sm:$0xff] %vm328_vm0, %v1114_v1  ;;  %340 = vst.msk [vmem:[#allocation2 + $0x58] sm:$0xff] %vm328_vm0, %v1114_v1  ;;  %557 = vmatprep.subr.bf16.mxu0 %v1113_v0  ;;  %1002 = vmatprep.subr.bf16.mxu1 %v1113_v0  ;;  %v1071_v6 = vld [vmem:[%s1199_s23 + $0x4] ss:$8 sps:$4 sm:$0xff]   ;;  %v1060_v7 = vld [vmem:[%s1185_s19 + $0x18] sm:$0xff]  }
  0x13   : > { %v1074_v8 = vld [vmem:[%s1199_s23 + $0x44] ss:$8 sps:$4 sm:$0xff]   ;;  %965 = vmatprep.mubr.msk.bf16.mxu0 %vm529_vm1, %v1071_v6  ;;  %v1061_v9 = vld [vmem:[%s1185_s19 + $0x10] sm:$0xff]   ;;  %v1064_v12 = vld [vmem:[%s1185_s19 + $0x60] ss:$0 sps:$4 sm:$0xff]  }
  0x14   : > { %969 = vmatprep.mubr.msk.bf16.mxu1 %vm529_vm1, %v1074_v8  ;;  %v1062_v10 = vld [vmem:[%s1185_s19 + $0x8] sm:$0xff]   ;;  %v1063_v11 = vld [vmem:[%s1185_s19] sm:$0xff]   ;;  %v553_v13 = vsel %vm551_vm2, %v1064_v12, 0  ;;  %v1065_v14 = vld [vmem:[%s1185_s19 + $0x58] sm:$0xff]   ;;  %342 = vst.msk [vmem:[#allocation2 + $0x60] sm:$0x3] %vm341_vm3, %v1114_v1 }
  0x15   : > { %558 = vmatpush1.bf16.msra.mxu0 %v1057_v3  ;;  %1015 = vmatpush1.bf16.msra.mxu1 %v1057_v3  ;;  %v1066_v15 = vld [vmem:[%s1185_s19 + $0x50] sm:$0xff]   ;;  %v1067_v16 = vld [vmem:[%s1185_s19 + $0x48] sm:$0xff]   ;;  %v1068_v17 = vld [vmem:[%s1185_s19 + $0x40] sm:$0xff]  }
  0x16   : > { %559 = vmatprep.subr.bf16.mxu0 %v1113_v0  ;;  %1003 = vmatprep.subr.bf16.mxu1 %v1113_v0  ;;  %v1069_v18 = vld [vmem:[%s1199_s23] ss:$8 sps:$4 sm:$0xff]   ;;  %v1075_v20 = vld [vmem:[%s1199_s23 + $0x14] ss:$8 sps:$4 sm:$0xff]   ;;  %v1077_v23 = vld [vmem:[%s1199_s23 + $0x10] ss:$8 sps:$4 sm:$0xff]  }
  0x17   : > { %v1072_v19 = vld [vmem:[%s1199_s23 + $0x40] ss:$8 sps:$4 sm:$0xff]   ;;  %v1078_v21 = vld [vmem:[%s1199_s23 + $0x54] ss:$8 sps:$4 sm:$0xff]   ;;  %v1080_v24 = vld [vmem:[%s1199_s23 + $0x50] ss:$8 sps:$4 sm:$0xff]  }
  0x18   : > { %v368_v22 = vld [vmem:[%s1199_s23 + $0x60] sm:$0x11]  ;;  %v1086_v29 = vld [vmem:[%s1199_s23 + $0x34] ss:$8 sps:$4 sm:$0xff]   ;;  %v1088_v30 = vld [vmem:[%s1199_s23 + $0x30] ss:$8 sps:$4 sm:$0xff]  }
  0x19   : > { %560 = vmatpush1.bf16.msra.mxu0 %v1058_v4  ;;  %1016 = vmatpush1.bf16.msra.mxu1 %v1058_v4  ;;  %v1081_v25 = vld [vmem:[%s1199_s23 + $0x24] ss:$8 sps:$4 sm:$0xff]   ;;  %v951_v26 = vcombine.high %v368_v22, %v368_v22  ;;  %v1083_v27 = vld [vmem:[%s1199_s23 + $0x20] ss:$8 sps:$4 sm:$0xff]   ;;  %v950_v28 = vcombine.low %v368_v22, %v368_v22  ;;  %v345_v46 = vld [vmem:[#allocation2 + $0x10] sm:$0xff] }
  0x1a   : > { %561 = vmatprep.subr.bf16.mxu0 %v1113_v0  ;;  %1004 = vmatprep.subr.bf16.mxu1 %v1113_v0  ;;  %v343_v31 = vld [vmem:[#allocation2] sm:$0xff]  ;;  %v344_v38 = vld [vmem:[#allocation2 + $0x8] sm:$0xff]  ;;  %v353_v48 = vld [vmem:[#allocation2 + $0x50] sm:$0xff] }
  0x1b   : > { %v351_v32 = vld [vmem:[#allocation2 + $0x40] sm:$0xff]  ;;  %v352_v40 = vld [vmem:[#allocation2 + $0x48] sm:$0xff]  ;;  %v346_v53 = vld [vmem:[#allocation2 + $0x18] sm:$0xff] }
  0x1c   : > { %v354_v59 = vld [vmem:[#allocation2 + $0x58] sm:$0xff]  ;;  %v347_v3 = vld [vmem:[#allocation2 + $0x20] sm:$0xff] }
  0x1d   : > { %562 = vmatpush1.bf16.msra.mxu0 %v1059_v5  ;;  %1017 = vmatpush1.bf16.msra.mxu1 %v1059_v5 }
  0x1e   : > { %563 = vmatprep.subr.bf16.mxu0 %v1113_v0  ;;  %1005 = vmatprep.subr.bf16.mxu1 %v1113_v0 }
  0x21   : > { %564 = vmatpush1.bf16.msra.mxu0 %v1060_v7  ;;  %1018 = vmatpush1.bf16.msra.mxu1 %v1060_v7 }
  0x22   : > { %565 = vmatprep.subr.bf16.mxu0 %v1113_v0  ;;  %1006 = vmatprep.subr.bf16.mxu1 %v1113_v0 }
  0x25   : > { %566 = vmatpush1.bf16.msra.mxu0 %v1061_v9  ;;  %1019 = vmatpush1.bf16.msra.mxu1 %v1061_v9  ;;  %v355_v9 = vld [vmem:[#allocation2 + $0x60] sm:$0x3] }
  0x26   : > { %567 = vmatprep.subr.bf16.mxu0 %v1113_v0  ;;  %1007 = vmatprep.subr.bf16.mxu1 %v1113_v0 }
  0x29   : > { %568 = vmatpush1.bf16.msra.mxu0 %v1062_v10  ;;  %1020 = vmatpush1.bf16.msra.mxu1 %v1062_v10 }
  0x2a   : > { %569 = vmatprep.subr.bf16.mxu0 %v1113_v0  ;;  %1008 = vmatprep.subr.bf16.mxu1 %v1113_v0 }
  0x2d   : > { %570 = vmatpush1.bf16.msra.mxu0 %v1063_v11  ;;  %1021 = vmatpush1.bf16.msra.mxu1 %v1063_v11 }
  0x2e   : > { %577 = vmatprep.subr.bf16.mxu0 %v1113_v0  ;;  %1009 = vmatprep.subr.bf16.mxu1 %v1113_v0 }
  0x31   : > { %578 = vmatpush2.bf16.msra.mxu0 %v553_v13  ;;  %1022 = vmatpush2.bf16.msra.mxu1 %v553_v13 }
  0x32   : > { %579 = vmatprep.subr.bf16.mxu0 %v1113_v0  ;;  %1010 = vmatprep.subr.bf16.mxu1 %v1113_v0 }
  0x35   : > { %580 = vmatpush2.bf16.msra.mxu0 %v1065_v14  ;;  %1023 = vmatpush2.bf16.msra.mxu1 %v1065_v14 }
  0x36   : > { %581 = vmatprep.subr.bf16.mxu0 %v1113_v0  ;;  %1011 = vmatprep.subr.bf16.mxu1 %v1113_v0 }
  0x39   : > { %582 = vmatpush2.bf16.msra.mxu0 %v1066_v15  ;;  %1024 = vmatpush2.bf16.msra.mxu1 %v1066_v15 }
  0x3a   : > { %583 = vmatprep.subr.bf16.mxu0 %v1113_v0  ;;  %1012 = vmatprep.subr.bf16.mxu1 %v1113_v0 }
  0x3d   : > { %584 = vmatpush2.bf16.msra.mxu0 %v1067_v16  ;;  %1025 = vmatpush2.bf16.msra.mxu1 %v1067_v16 }
  0x3e   : > { %585 = vmatprep.subr.bf16.mxu0 %v1113_v0  ;;  %1013 = vmatprep.subr.bf16.mxu1 %v1113_v0 }
  0x41   : > { %586 = vmatpush2.bf16.msra.mxu0 %v1068_v17  ;;  %1026 = vmatpush2.bf16.msra.mxu1 %v1068_v17 }
  0x44   : > { %588 = vmatmul.mubr.bf16.vlgmr.msra.gmra.mxu0 %v1069_v18  ;;  %620 = vmatmul.mubr.bf16.vlgmr.msra.gmra.mxu1 %v1072_v19 }
  0x45   : > { %966 = vmatprep.mubr.msk.bf16.mxu0 %vm529_vm1, %v1075_v20  ;;  %970 = vmatprep.mubr.msk.bf16.mxu1 %vm529_vm1, %v1078_v21 }
  0x4c   : > { %596 = vmatmul.mubr.bf16.gmra.mxu0 %v1077_v23  ;;  %628 = vmatmul.mubr.bf16.gmra.mxu1 %v1080_v24  ;;  %v348_v23 = vld [vmem:[#allocation2 + $0x28] sm:$0xff] }
  0x4d   : > { %967 = vmatprep.mubr.msk.bf16.mxu0 %vm529_vm1, %v1081_v25  ;;  %971 = vmatprep.mubr.msk.bf16.mxu1 %vm529_vm1, %v951_v26 }
  0x54   : > { %604 = vmatmul.mubr.bf16.gmra.mxu0 %v1083_v27  ;;  %636 = vmatmul.mubr.bf16.gmra.mxu1 %v950_v28 }
  0x55   : > { %968 = vmatprep.mubr.msk.bf16.mxu0 %vm529_vm1, %v1086_v29 }
  0x5c   : > { %612 = vmatmul.mubr.bf16.gmra.mxu0 %v1088_v30 }
 0x104   : > { %v589_v33 = vpop.f32.mrf.mxu0  ;;  %v621_v34 = vpop.f32.mrf.mxu1 }
 0x105   : > { %v643_v35 = vadd.f32 %v589_v33, %v343_v31  ;;  %v651_v36 = vadd.f32 %v621_v34, %v351_v32 }
 0x106   : > { %v591_v37 = vpop.f32.mrf.mxu0  ;;  %v623_v39 = vpop.f32.mrf.mxu1 }
 0x107   : > { %657 = vst.msk [vmem:[#allocation2] sm:$0xff] %vm328_vm0, %v643_v35  ;;  %665 = vst.msk [vmem:[#allocation2 + $0x40] sm:$0xff] %vm328_vm0, %v651_v36  ;;  %v349_v37 = vld [vmem:[#allocation2 + $0x30] sm:$0xff] }
 0x108   : > { %v592_v41 = vpop.f32.mrf.mxu0  ;;  %v624_v42 = vpop.f32.mrf.mxu1 }
 0x109   : > { %v644_v43 = vadd.f32 %v592_v41, %v344_v38  ;;  %v652_v44 = vadd.f32 %v624_v42, %v352_v40 }
 0x10a   : > { %v594_v45 = vpop.f32.mrf.mxu0  ;;  %v626_v47 = vpop.f32.mrf.mxu1 }
 0x10b   : > { %658 = vst.msk [vmem:[#allocation2 + $0x8] sm:$0xff] %vm328_vm0, %v644_v43  ;;  %666 = vst.msk [vmem:[#allocation2 + $0x48] sm:$0xff] %vm328_vm0, %v652_v44 }
 0x10c   : > { %v597_v50 = vpop.f32.mrf.mxu0  ;;  %v629_v51 = vpop.f32.mrf.mxu1 }
 0x10d   : > { %v645_v52 = vadd.f32 %v597_v50, %v345_v46  ;;  %v653_v54 = vadd.f32 %v629_v51, %v353_v48  ;;  %v350_v51 = vld [vmem:[#allocation2 + $0x38] sm:$0xff] }
 0x10e   : > { %v674_v55 = vld [vmem:[#allocation2] sm:$0xff]  ;;  %v599_v57 = vpop.f32.mrf.mxu0  ;;  %v631_v58 = vpop.f32.mrf.mxu1 }
 0x10f   : > { %v682_v56 = vld [vmem:[#allocation2 + $0x40] sm:$0xff]  ;;  %v694_v60 = vadd.f32 %v1260_v49, %v674_v55  ;;  %659 = vst.msk [vmem:[#allocation2 + $0x10] sm:$0xff] %vm328_vm0, %v645_v52  ;;  %667 = vst.msk [vmem:[#allocation2 + $0x50] sm:$0xff] %vm328_vm0, %v653_v54 }
 0x110   : > { %v702_v61 = vadd.f32 %v1260_v49, %v682_v56  ;;  %v600_v62 = vpop.f32.mrf.mxu0  ;;  %v632_v63 = vpop.f32.mrf.mxu1 }
 0x111   : > { %v707_v0 = vmax.f32 %v694_v60, 0.0  ;;  %v646_v2 = vadd.f32 %v600_v62, %v346_v53  ;;  %v654_v4 = vadd.f32 %v632_v63, %v354_v59 }
 0x112   : > { %v715_v1 = vmax.f32 %v702_v61, 0.0  ;;  %v675_v5 = vld [vmem:[#allocation2 + $0x8] sm:$0xff]  ;;  %v602_v7 = vpop.f32.mrf.mxu0  ;;  %v634_v8 = vpop.f32.mrf.mxu1 }
 0x113   : > { %v683_v6 = vld [vmem:[#allocation2 + $0x48] sm:$0xff]  ;;  %v988_v10 = vpack.c.bf16 %v707_v0, %v707_v0  ;;  %v695_v11 = vadd.f32 %v1260_v49, %v675_v5  ;;  %660 = vst.msk [vmem:[#allocation2 + $0x18] sm:$0xff] %vm328_vm0, %v646_v2  ;;  %668 = vst.msk [vmem:[#allocation2 + $0x58] sm:$0xff] %vm328_vm0, %v654_v4 }
 0x114   : > { %v996_v12 = vpack.c.bf16 %v715_v1, %v715_v1  ;;  %v703_v13 = vadd.f32 %v1260_v49, %v683_v6  ;;  %v605_v14 = vpop.f32.mrf.mxu0  ;;  %v637_v15 = vpop.f32.mrf.mxu1 }
 0x115   : > { %774 = vst.msk [vmem:[%s1270_s30] sm:$0xf] %vm773_vm4, %v988_v10  ;;  %v708_v16 = vmax.f32 %v695_v11, 0.0  ;;  %v647_v18 = vadd.f32 %v605_v14, %v347_v3  ;;  %v655_v19 = vadd.f32 %v637_v15, %v355_v9 }
 0x116   : > { %782 = vst.msk [vmem:[%s1270_s30 + $0x20] sm:$0xf] %vm773_vm4, %v996_v12  ;;  %v716_v17 = vmax.f32 %v703_v13, 0.0  ;;  %v676_v20 = vld [vmem:[#allocation2 + $0x10] sm:$0xff]  ;;  %v607_v22 = vpop.f32.mrf.mxu0  ;;  %v639_v24 = vpop.f32.mrf.mxu1 }
 0x117   : > { %v684_v21 = vld [vmem:[#allocation2 + $0x50] sm:$0xff]  ;;  %v989_v25 = vpack.c.bf16 %v708_v16, %v708_v16  ;;  %v696_v26 = vadd.f32 %v1260_v49, %v676_v20  ;;  %661 = vst.msk [vmem:[#allocation2 + $0x20] sm:$0xff] %vm328_vm0, %v647_v18 }
 0x118   : > { %v997_v27 = vpack.c.bf16 %v716_v17, %v716_v17  ;;  %v704_v28 = vadd.f32 %v1260_v49, %v684_v21  ;;  %670 = vst.msk [vmem:[#allocation2 + $0x60] sm:$0x3] %vm341_vm3, %v655_v19  ;;  %v608_v29 = vpop.f32.mrf.mxu0  ;;  %v640_v30 = vpop.f32.mrf.mxu1 }
 0x119   : > { %775 = vst.msk [vmem:[%s1270_s30 + $0x4] sm:$0xf] %vm773_vm4, %v989_v25  ;;  %v709_v31 = vmax.f32 %v696_v26, 0.0  ;;  %v648_v33 = vadd.f32 %v608_v29, %v348_v23 }
 0x11a   : > { %783 = vst.msk [vmem:[%s1270_s30 + $0x24] sm:$0xf] %vm773_vm4, %v997_v27  ;;  %v717_v32 = vmax.f32 %v704_v28, 0.0  ;;  %v677_v34 = vld [vmem:[#allocation2 + $0x18] sm:$0xff]  ;;  %v610_v36 = vpop.f32.mrf.mxu0  ;;  %v641_v38 = vpop.f32.mrf.mxu1 }
 0x11b   : > { %v685_v35 = vld [vmem:[#allocation2 + $0x58] sm:$0xff]  ;;  %v990_v39 = vpack.c.bf16 %v709_v31, %v709_v31  ;;  %v697_v40 = vadd.f32 %v1260_v49, %v677_v34  ;;  %662 = vst.msk [vmem:[#allocation2 + $0x28] sm:$0xff] %vm328_vm0, %v648_v33 }
 0x11c   : > { %v998_v41 = vpack.c.bf16 %v717_v32, %v717_v32  ;;  %v705_v42 = vadd.f32 %v1260_v49, %v685_v35  ;;  %v613_v43 = vpop.f32.mrf.mxu0 }
 0x11d   : > { %776 = vst.msk [vmem:[%s1270_s30 + $0x8] sm:$0xf] %vm773_vm4, %v990_v39  ;;  %v710_v44 = vmax.f32 %v697_v40, 0.0  ;;  %v649_v46 = vadd.f32 %v613_v43, %v349_v37 }
 0x11e   : > { %784 = vst.msk [vmem:[%s1270_s30 + $0x28] sm:$0xf] %vm773_vm4, %v998_v41  ;;  %v718_v45 = vmax.f32 %v705_v42, 0.0  ;;  %v678_v47 = vld [vmem:[#allocation2 + $0x20] sm:$0xff]  ;;  %v615_v50 = vpop.f32.mrf.mxu0 }
 0x11f   : > { %v686_v48 = vld [vmem:[#allocation2 + $0x60] sm:$0x3]  ;;  %v991_v52 = vpack.c.bf16 %v710_v44, %v710_v44  ;;  %v698_v53 = vadd.f32 %v1260_v49, %v678_v47  ;;  %663 = vst.msk [vmem:[#allocation2 + $0x30] sm:$0xff] %vm328_vm0, %v649_v46 }
 0x120   : > { %v999_v54 = vpack.c.bf16 %v718_v45, %v718_v45  ;;  %v706_v55 = vadd.f32 %v1260_v49, %v686_v48  ;;  %v616_v56 = vpop.f32.mrf.mxu0 }
 0x121   : > { %777 = vst.msk [vmem:[%s1270_s30 + $0xc] sm:$0xf] %vm773_vm4, %v991_v52  ;;  %v711_v57 = vmax.f32 %v698_v53, 0.0  ;;  %v650_v59 = vadd.f32 %v616_v56, %v350_v51 }
 0x122   : > { %785 = vst.msk [vmem:[%s1270_s30 + $0x2c] sm:$0xf] %vm773_vm4, %v999_v54  ;;  %v719_v58 = vmax.f32 %v706_v55, 0.0  ;;  %v679_v60 = vld [vmem:[#allocation2 + $0x28] sm:$0xff]  ;;  %v618_v61 = vpop.f32.mrf.mxu0 }
 0x123   : > { %v992_v62 = vpack.c.bf16 %v711_v57, %v711_v57  ;;  %v699_v63 = vadd.f32 %v1260_v49, %v679_v60  ;;  %664 = vst.msk [vmem:[#allocation2 + $0x38] sm:$0xff] %vm328_vm0, %v650_v59 }
 0x124   : > { %v1000_v0 = vpack.c.bf16 %v719_v58, %v719_v58 }
 0x125   : > { %778 = vst.msk [vmem:[%s1270_s30 + $0x10] sm:$0xf] %vm773_vm4, %v992_v62  ;;  %v712_v1 = vmax.f32 %v699_v63, 0.0 }
 0x126   : > { %787 = vst.msk [vmem:[%s1270_s30 + $0x30] sm:$0x1] %vm786_vm5, %v1000_v0  ;;  %v680_v2 = vld [vmem:[#allocation2 + $0x30] sm:$0xff] }
 0x127   : > { %v993_v3 = vpack.c.bf16 %v712_v1, %v712_v1  ;;  %v700_v4 = vadd.f32 %v1260_v49, %v680_v2 }
 0x129   : > { %779 = vst.msk [vmem:[%s1270_s30 + $0x14] sm:$0xf] %vm773_vm4, %v993_v3  ;;  %v713_v5 = vmax.f32 %v700_v4, 0.0 }
 0x12a   : > { %v681_v6 = vld [vmem:[#allocation2 + $0x38] sm:$0xff] }
 0x12b   : > { %v994_v7 = vpack.c.bf16 %v713_v5, %v713_v5  ;;  %v701_v8 = vadd.f32 %v1260_v49, %v681_v6 }
 0x12d   : > { %780 = vst.msk [vmem:[%s1270_s30 + $0x18] sm:$0xf] %vm773_vm4, %v994_v7  ;;  %v714_v9 = vmax.f32 %v701_v8, 0.0 }
 0x12f   : > { %v995_v10 = vpack.c.bf16 %v714_v9, %v714_v9 }
 0x131   : > { %781 = vst.msk [vmem:[%s1270_s30 + $0x1c] sm:$0xf] %vm773_vm4, %v995_v10 }
 0x132 PF: > { %s13_s14 = sadd.s32 1, %s1111_s14   ;;  %s1328_s12 = smov %s1107_s13 }
 0x133   : > { %p10_p5 = scmp.ge.s32.totalorder %s13_s14, 6   ;;  %s1329_s13 = smov %s1331_s15 }
 0x135   :  { %12 = sbr.rel (!%p10_p5) target bundleno = 2 (0x2), region = 76 }

// kernel: goturn_forward.11
= control target key start
LH: loop header
LB: loop body
LE: loop exit
PB: predicated region body
PF: predicated region fallthrough
CT: control target
= control target key end

     0   :  { %s982_s12 = smov 0   ;;  %s984_s13 = smov 0   ;;  %s1053_s0 = inlined_call_operand.vmem [shape: bf16[2,18,288], index: 0, kind: input, shape index: {}]   ;;  %s1054_s1 = inlined_call_operand.vmem [shape: bf16[2,288,48], index: 1, kind: input, shape index: {}]   ;;  %s1055_s2 = inlined_call_operand.vmem [shape: f32[2,1,48], index: 2, kind: input, shape index: {}]   ;;  %s1056_s3 = inlined_call_operand.vmem [shape: bf16[2,18,48], index: 3, kind: output, shape index: {}]  }
   0x1   :  { %s986_s14 = smov 0  }
   0x2 LB: > { %s39_s15 = sadd.s32 1, %s955_s13  ;;  %p805_p0 = scmp.ge.s32.totalorder %s959_s14, 1  ;;  %s959_s14 = sphi %s986_s14, %s13_s14   ;;  %s955_s13 = sphi %s984_s13, %s1058_s13   ;;  %s951_s12 = sphi %s982_s12, %s1057_s12  }
   0x3   : > { %p41_p1 = scmp.ge.s32.totalorder %s39_s15, 2  ;;  %p217_p2 = scmp.lt.s32.totalorder %s959_s14, 3 }
   0x5   : > { %s1060_s15 = smov (%p41_p1, %s39_s15), 0  ;;  %p218_p3 = pnand %p805_p0, %p217_p2 }
   0x6   : > { %p277_p4 = scmp.lt.s32.totalorder (!%p218_p3), %s951_s12, 1 }
   0x7   : > { %221 = sbr.rel (%p218_p3) target bundleno = 273 (0x111), region = 32 }
   0xc   : > { %s1062_s12 = smov (!%p277_p4, %s951_s12), 1  ;;  %vm511_vm0 = vcmask 261120   ;;  %vm328_vm1 = vcmask 392192   ;;  %v961_v25 = vmov 0.0   ;;  %vm331_vm2 = vcmask 386048  }
   0xd   : > { %s885_s16 = smul.u32 144, %s1062_s12  ;;  %329 = vst.msk [vmem:[#allocation2] sm:$0xff] %vm328_vm1, %v961_v25  ;;  %330 = vst.msk [vmem:[#allocation2 + $0x8] sm:$0xff] %vm328_vm1, %v961_v25  ;;  %s309_s26 = scalar_lea.vmem %s1055_s2, %s1062_s12  ;;  %vm654_vm3 = vcmask 388096   ;;  %vm657_vm4 = vcmask 385024  }
   0xe   : > { %s884_s20 = smul.u32 36, %s1062_s12  ;;  %332 = vst.msk [vmem:[#allocation2 + $0x10] sm:$0x3] %vm331_vm2, %v961_v25  ;;  %v835_v48 = vld [vmem:[%s309_s26] ss:$0 sm:$0xff] }
   0xf   : > { %s1006_s19 = scalar_lea.vmem %s1054_s1, %s885_s16  ;;  %s886_s27 = smul.u32 12, %s1062_s12 }
  0x10   : > { %v912_v0 = vld [vmem:[%s1006_s19 + $0x78] sm:$0xff]   ;;  %v914_v2 = vld [vmem:[%s1006_s19 + $0x70] sm:$0xff]   ;;  %v916_v4 = vld [vmem:[%s1006_s19 + $0x68] sm:$0xff]   ;;  %s288_s23 = scalar_lea.vmem %s1053_s0, %s884_s20 }
  0x11   : > { %v913_v1 = vld [vmem:[%s1006_s19 + $0x38] sm:$0xff]   ;;  %844 = vmatprep.subr.bf16.mxu0 %v912_v0  ;;  %v915_v3 = vld [vmem:[%s1006_s19 + $0x30] sm:$0xff]   ;;  %v917_v5 = vld [vmem:[%s1006_s19 + $0x28] sm:$0xff]   ;;  %s321_s30 = scalar_lea.vmem %s1056_s3, %s886_s27 }
  0x12   : > { %845 = vmatpush3.bf16.msra.mxu0 %v913_v1  ;;  %v918_v6 = vld [vmem:[%s1006_s19 + $0x60] sm:$0xff]   ;;  %v920_v8 = vld [vmem:[%s1006_s19 + $0x58] sm:$0xff]   ;;  %v925_v9 = vld [vmem:[%s1006_s19 + $0x88] sm:$0xff]  }
  0x13   : > { %846 = vmatprep.subr.bf16.mxu0 %v914_v2  ;;  %v919_v7 = vld [vmem:[%s1006_s19 + $0x20] sm:$0xff]   ;;  %v921_v10 = vld [vmem:[%s1006_s19 + $0x18] sm:$0xff]   ;;  %v922_v11 = vld [vmem:[%s1006_s19 + $0x50] sm:$0xff]   ;;  %876 = vmatprep.subr.bf16.mxu1 %v925_v9 }
  0x14   : > { %877 = vmatpush3.bf16.msra.mxu1 %v925_v9  ;;  %v928_v12 = vld [vmem:[%s1006_s19 + $0x80] sm:$0xff]   ;;  %v923_v13 = vld [vmem:[%s1006_s19 + $0x10] sm:$0xff]   ;;  %v924_v15 = vld [vmem:[%s1006_s19 + $0x48] sm:$0xff]  }
  0x15   : > { %878 = vmatprep.subr.bf16.mxu1 %v928_v12  ;;  %v932_v14 = vld [vmem:[%s288_s23 + $0x4] ss:$12 sps:$4 sm:$0xff]   ;;  %v933_v16 = vld [vmem:[%s288_s23 + $0x8] ss:$12 sps:$4 sm:$0xff]   ;;  %v340_v21 = vld [vmem:[%s288_s23 + $0x18] sm:$0x11] }
  0x16   : > { %847 = vmatpush3.bf16.msra.mxu0 %v915_v3  ;;  %550 = vmatprep.mubr.bf16.mxu0 %v932_v14  ;;  %v934_v17 = vld [vmem:[%s288_s23 + $0x20] ss:$0 sps:$4 sm:$0x11]   ;;  %v926_v18 = vld [vmem:[%s1006_s19 + $0x8] sm:$0xff]   ;;  %v813_v23 = vcombine.high %v340_v21, %v340_v21  ;;  %v812_v24 = vcombine.low %v340_v21, %v340_v21  ;;  %v335_v45 = vld [vmem:[#allocation2 + $0x10] sm:$0x3] }
  0x17   : > { %848 = vmatprep.subr.bf16.mxu0 %v916_v4  ;;  %880 = vmatprep.mubr.msk.bf16.mxu1 %vm511_vm0, %v933_v16  ;;  %v927_v19 = vld [vmem:[%s1006_s19 + $0x40] sm:$0xff]   ;;  %v334_v38 = vld [vmem:[#allocation2 + $0x8] sm:$0xff] }
  0x18   : > { %879 = vmatpush3.bf16.msra.mxu1 %v928_v12  ;;  %v929_v20 = vld [vmem:[%s1006_s19] sm:$0xff]  }
  0x19   : > { %v930_v22 = vld [vmem:[%s288_s23] ss:$12 sps:$4 sm:$0xff]  }
  0x1a   : > { %849 = vmatpush3.bf16.msra.mxu0 %v917_v5  ;;  %v333_v32 = vld [vmem:[#allocation2] sm:$0xff] }
  0x1b   : > { %850 = vmatprep.subr.bf16.mxu0 %v918_v6  ;;  %881 = vmatmul.mubr.msk.bf16.vlgmr.msra.gmra.mxu1 %vm511_vm0, %v934_v17 }
  0x1e   : > { %851 = vmatpush3.bf16.msra.mxu0 %v919_v7 }
  0x1f   : > { %852 = vmatprep.subr.bf16.mxu0 %v920_v8 }
  0x22   : > { %853 = vmatpush3.bf16.msra.mxu0 %v921_v10 }
  0x23   : > { %854 = vmatprep.subr.bf16.mxu0 %v922_v11 }
  0x26   : > { %855 = vmatpush3.bf16.msra.mxu0 %v923_v13 }
  0x27   : > { %856 = vmatprep.subr.bf16.mxu0 %v924_v15 }
  0x2a   : > { %857 = vmatpush3.bf16.msra.mxu0 %v926_v18 }
  0x2b   : > { %858 = vmatprep.subr.bf16.mxu0 %v927_v19 }
  0x2e   : > { %859 = vmatpush3.bf16.msra.mxu0 %v929_v20 }
  0x31   : > { %551 = vmatmul.mubr.bf16.vlgmr.msra.gmra.mxu0 %v930_v22 }
  0x32   : > { %558 = vmatprep.mubr.bf16.mxu0 %v813_v23 }
  0x39   : > { %559 = vmatmul.mubr.bf16.gmra.mxu0 %v812_v24 }
  0xdb   : > { %v882_v26 = vpop.f32.mrf.mxu1 }
  0xdd   : > { %v600_v27 = vpop.f32.mrf.mxu1 }
  0xdf   : > { %v883_v28 = vpop.f32.mrf.mxu1 }
  0xe1   : > { %v603_v39 = vpop.f32.mrf.mxu1 }
  0xf1   : > { %v860_v29 = vpop.f32.mrf.mxu0 }
  0xf3   : > { %v861_v30 = vpop.f32.mrf.mxu0 }
  0xf4   : > { %v862_v31 = vadd.f32 %v861_v30, %v860_v29 }
  0xf5   : > { %v863_v33 = vpop.f32.mrf.mxu0 }
  0xf6   : > { %v601_v34 = vadd.f32 %v862_v31, %v600_v27 }
  0xf7   : > { %v864_v35 = vpop.f32.mrf.mxu0 }
  0xf8   : > { %v614_v36 = vadd.f32 %v601_v34, %v333_v32  ;;  %v865_v37 = vadd.f32 %v864_v35, %v863_v33 }
  0xf9   : > { %v866_v40 = vpop.f32.mrf.mxu0 }
  0xfa   : > { %618 = vst.msk [vmem:[#allocation2] sm:$0xff] %vm328_vm1, %v614_v36  ;;  %v604_v41 = vadd.f32 %v865_v37, %v603_v39 }
  0xfb   : > { %v867_v42 = vpop.f32.mrf.mxu0 }
  0xfc   : > { %v615_v43 = vadd.f32 %v604_v41, %v334_v38  ;;  %v868_v44 = vadd.f32 %v867_v42, %v866_v40 }
  0xfd   : > { %v869_v46 = vpop.f32.mrf.mxu0 }
  0xfe   : > { %619 = vst.msk [vmem:[#allocation2 + $0x8] sm:$0xff] %vm328_vm1, %v615_v43  ;;  %v609_v47 = vadd.f32 %v882_v26, %v868_v44 }
  0xff   : > { %v870_v49 = vpop.f32.mrf.mxu0 }
 0x100   : > { %v616_v50 = vadd.f32 %v609_v47, %v335_v45 }
 0x101   : > { %v625_v51 = vld [vmem:[#allocation2] sm:$0xff] }
 0x102   : > { %v635_v52 = vadd.f32 %v835_v48, %v625_v51  ;;  %621 = vst.msk [vmem:[#allocation2 + $0x10] sm:$0x3] %vm331_vm2, %v616_v50 }
 0x104   : > { %v638_v53 = vmax.f32 %v635_v52, 0.0 }
 0x105   : > { %v626_v54 = vld [vmem:[#allocation2 + $0x8] sm:$0xff] }
 0x106   : > { %v841_v55 = vpack.c.bf16 %v638_v53, %v638_v53  ;;  %v636_v56 = vadd.f32 %v835_v48, %v626_v54 }
 0x108   : > { %655 = vst.msk [vmem:[%s321_s30] sm:$0xf] %vm654_vm3, %v841_v55  ;;  %v639_v57 = vmax.f32 %v636_v56, 0.0 }
 0x109   : > { %v627_v58 = vld [vmem:[#allocation2 + $0x10] sm:$0x3] }
 0x10a   : > { %v842_v59 = vpack.c.bf16 %v639_v57, %v639_v57  ;;  %v637_v60 = vadd.f32 %v835_v48, %v627_v58 }
 0x10c   : > { %656 = vst.msk [vmem:[%s321_s30 + $0x4] sm:$0xf] %vm654_vm3, %v842_v59  ;;  %v640_v61 = vmax.f32 %v637_v60, 0.0 }
 0x10e   : > { %v843_v62 = vpack.c.bf16 %v640_v61, %v640_v61 }
 0x110   : > { %658 = vst.msk [vmem:[%s321_s30 + $0x8] sm:$0x1] %vm657_vm4, %v843_v62 }
 0x111 PF: > { %s13_s14 = sadd.s32 1, %s959_s14   ;;  %s1057_s12 = smov %s955_s13 }
 0x112   : > { %p10_p5 = scmp.ge.s32.totalorder %s13_s14, 4   ;;  %s1058_s13 = smov %s1060_s15 }
 0x114   :  { %12 = sbr.rel (!%p10_p5) target bundleno = 2 (0x2), region = 76 }

// kernel: goturn_forward.12
= control target key start
LH: loop header
LB: loop body
LE: loop exit
PB: predicated region body
PF: predicated region fallthrough
CT: control target
= control target key end

     0   :  { %s867_s12 = smov 0   ;;  %s869_s13 = smov 0   ;;  %s968_s0 = inlined_call_operand.vmem [shape: bf16[4,18,216], index: 0, kind: input, shape index: {}]   ;;  %s969_s1 = inlined_call_operand.vmem [shape: bf16[4,216,24], index: 1, kind: input, shape index: {}]   ;;  %s970_s2 = inlined_call_operand.vmem [shape: f32[4,1,24], index: 2, kind: input, shape index: {}]   ;;  %s971_s3 = inlined_call_operand.vmem [shape: bf16[4,18,24], index: 3, kind: output, shape index: {}]  }
   0x1   :  { %s871_s14 = smov 0  }
   0x2 LB: > { %s39_s15 = sadd.s32 1, %s839_s13  ;;  %p712_p0 = scmp.ge.s32.totalorder %s843_s14, 1  ;;  %s843_s14 = sphi %s871_s14, %s13_s14   ;;  %s839_s13 = sphi %s869_s13, %s973_s13   ;;  %s835_s12 = sphi %s867_s12, %s972_s12  }
   0x3   : > { %p41_p1 = scmp.ge.s32.totalorder %s39_s15, 4  ;;  %p217_p2 = scmp.lt.s32.totalorder %s843_s14, 5 }
   0x5   : > { %s975_s15 = smov (%p41_p1, %s39_s15), 0  ;;  %p218_p3 = pnand %p712_p0, %p217_p2 }
   0x6   : > { %p277_p4 = scmp.lt.s32.totalorder (!%p218_p3), %s835_s12, 3 }
   0x7   : > { %221 = sbr.rel (%p218_p3) target bundleno = 286 (0x11e), region = 32 }
   0xc   : > { %vm328_vm0 = vcmask 195584   ;;  %v845_v0 = vmov 0   ;;  %s977_s12 = smov (!%p277_p4, %s835_s12), 3  ;;  %v846_v1 = vmov 0.0   ;;  %vm462_vm1 = vcmask 719872  }
   0xd   : > { %473 = vmatprep.subr.bf16.mxu0 %v845_v0  ;;  %745 = vmatprep.subr.bf16.mxu1 %v845_v0  ;;  %329 = vst.msk [vmem:[#allocation2] sm:$0xff] %vm328_vm0, %v846_v1  ;;  %330 = vst.msk [vmem:[#allocation2 + $0x8] sm:$0xff] %vm328_vm0, %v846_v1  ;;  %s774_s16 = smul.u32 108, %s977_s12  ;;  %vm469_vm2 = vcmask 1043456   ;;  %vm331_vm3 = vcmask 189440   ;;  %s309_s26 = scalar_lea.vmem %s970_s2, %s977_s12  ;;  %vm561_vm4 = vcmask 191488  }
   0xe   : > { %s773_s20 = smul.u32 24, %s977_s12  ;;  %332 = vst.msk [vmem:[#allocation2 + $0x10] sm:$0x3] %vm331_vm3, %v846_v1  ;;  %v736_v36 = vld [vmem:[%s309_s26] ss:$0 sm:$0xff]  ;;  %vm564_vm5 = vcmask 188416  }
   0xf   : > { %s897_s19 = scalar_lea.vmem %s969_s1, %s774_s16  ;;  %s775_s27 = smul.u32 12, %s977_s12 }
  0x10   : > { %v802_v2 = vld [vmem:[%s897_s19 + $0x38] sm:$0xff]   ;;  %v803_v3 = vld [vmem:[%s897_s19 + $0x30] sm:$0xff]   ;;  %v804_v4 = vld [vmem:[%s897_s19 + $0x28] sm:$0xff]   ;;  %s913_s23 = scalar_lea.vmem %s968_s0, %s773_s20 }
  0x11   : > { %474 = vmatpush1.bf16.msra.mxu0 %v802_v2  ;;  %759 = vmatpush1.bf16.msra.mxu1 %v802_v2  ;;  %v805_v5 = vld [vmem:[%s897_s19 + $0x20] sm:$0xff]   ;;  %v806_v6 = vld [vmem:[%s897_s19 + $0x18] sm:$0xff]   ;;  %v338_v8 = vld [vmem:[%s913_s23 + $0x10] sm:$0x11]  ;;  %s321_s30 = scalar_lea.vmem %s971_s3, %s775_s27 }
  0x12   : > { %475 = vmatprep.subr.bf16.mxu0 %v845_v0  ;;  %746 = vmatprep.subr.bf16.mxu1 %v845_v0  ;;  %v818_v7 = vld [vmem:[%s913_s23 + $0x4] ss:$8 sps:$4 sm:$0xff]   ;;  %v719_v9 = vcombine.high %v338_v8, %v338_v8  ;;  %v807_v10 = vld [vmem:[%s897_s19 + $0x10] sm:$0xff]   ;;  %v810_v13 = vld [vmem:[%s897_s19 + $0x68] ss:$0 sps:$4 sm:$0xff]   ;;  %v718_v21 = vcombine.low %v338_v8, %v338_v8 }
  0x13   : > { %734 = vmatprep.mubr.msk.bf16.mxu0 %vm462_vm1, %v818_v7  ;;  %v808_v11 = vld [vmem:[%s897_s19 + $0x8] sm:$0xff]   ;;  %v809_v12 = vld [vmem:[%s897_s19] sm:$0xff]   ;;  %v471_v14 = vsel %vm469_vm2, %v810_v13, 0  ;;  %v812_v16 = vld [vmem:[%s897_s19 + $0x58] sm:$0xff]  }
  0x14   : > { %735 = vmatprep.mubr.msk.bf16.mxu1 %vm462_vm1, %v719_v9  ;;  %v811_v15 = vld [vmem:[%s897_s19 + $0x60] sm:$0xff]   ;;  %v813_v17 = vld [vmem:[%s897_s19 + $0x50] sm:$0xff]   ;;  %v814_v18 = vld [vmem:[%s897_s19 + $0x48] sm:$0xff]  }
  0x15   : > { %476 = vmatpush1.bf16.msra.mxu0 %v803_v3  ;;  %760 = vmatpush1.bf16.msra.mxu1 %v803_v3  ;;  %v815_v19 = vld [vmem:[%s897_s19 + $0x40] sm:$0xff]   ;;  %v335_v23 = vld [vmem:[#allocation2 + $0x10] sm:$0x3]  ;;  %v334_v30 = vld [vmem:[#allocation2 + $0x8] sm:$0xff] }
  0x16   : > { %477 = vmatprep.subr.bf16.mxu0 %v845_v0  ;;  %747 = vmatprep.subr.bf16.mxu1 %v845_v0  ;;  %v816_v20 = vld [vmem:[%s913_s23] ss:$8 sps:$4 sm:$0xff]  }
  0x17   : > { %v333_v22 = vld [vmem:[#allocation2] sm:$0xff] }
  0x19   : > { %478 = vmatpush1.bf16.msra.mxu0 %v804_v4  ;;  %761 = vmatpush1.bf16.msra.mxu1 %v804_v4 }
  0x1a   : > { %479 = vmatprep.subr.bf16.mxu0 %v845_v0  ;;  %748 = vmatprep.subr.bf16.mxu1 %v845_v0 }
  0x1d   : > { %480 = vmatpush1.bf16.msra.mxu0 %v805_v5  ;;  %762 = vmatpush1.bf16.msra.mxu1 %v805_v5 }
  0x1e   : > { %481 = vmatprep.subr.bf16.mxu0 %v845_v0  ;;  %749 = vmatprep.subr.bf16.mxu1 %v845_v0 }
  0x21   : > { %482 = vmatpush1.bf16.msra.mxu0 %v806_v6  ;;  %763 = vmatpush1.bf16.msra.mxu1 %v806_v6 }
  0x22   : > { %483 = vmatprep.subr.bf16.mxu0 %v845_v0  ;;  %750 = vmatprep.subr.bf16.mxu1 %v845_v0 }
  0x25   : > { %484 = vmatpush1.bf16.msra.mxu0 %v807_v10  ;;  %764 = vmatpush1.bf16.msra.mxu1 %v807_v10 }
  0x26   : > { %485 = vmatprep.subr.bf16.mxu0 %v845_v0  ;;  %751 = vmatprep.subr.bf16.mxu1 %v845_v0 }
  0x29   : > { %486 = vmatpush1.bf16.msra.mxu0 %v808_v11  ;;  %765 = vmatpush1.bf16.msra.mxu1 %v808_v11 }
  0x2a   : > { %487 = vmatprep.subr.bf16.mxu0 %v845_v0  ;;  %752 = vmatprep.subr.bf16.mxu1 %v845_v0 }
  0x2d   : > { %488 = vmatpush1.bf16.msra.mxu0 %v809_v12  ;;  %766 = vmatpush1.bf16.msra.mxu1 %v809_v12 }
  0x2e   : > { %493 = vmatprep.subr.bf16.mxu0 %v845_v0  ;;  %753 = vmatprep.subr.bf16.mxu1 %v845_v0 }
  0x31   : > { %494 = vmatpush2.bf16.msra.mxu0 %v471_v14  ;;  %767 = vmatpush2.bf16.msra.mxu1 %v471_v14 }
  0x32   : > { %495 = vmatprep.subr.bf16.mxu0 %v845_v0  ;;  %754 = vmatprep.subr.bf16.mxu1 %v845_v0 }
  0x35   : > { %496 = vmatpush2.bf16.msra.mxu0 %v811_v15  ;;  %768 = vmatpush2.bf16.msra.mxu1 %v811_v15 }
  0x36   : > { %497 = vmatprep.subr.bf16.mxu0 %v845_v0  ;;  %755 = vmatprep.subr.bf16.mxu1 %v845_v0 }
  0x39   : > { %498 = vmatpush2.bf16.msra.mxu0 %v812_v16  ;;  %769 = vmatpush2.bf16.msra.mxu1 %v812_v16 }
  0x3a   : > { %499 = vmatprep.subr.bf16.mxu0 %v845_v0  ;;  %756 = vmatprep.subr.bf16.mxu1 %v845_v0 }
  0x3d   : > { %500 = vmatpush2.bf16.msra.mxu0 %v813_v17  ;;  %770 = vmatpush2.bf16.msra.mxu1 %v813_v17 }
  0x3e   : > { %501 = vmatprep.subr.bf16.mxu0 %v845_v0  ;;  %757 = vmatprep.subr.bf16.mxu1 %v845_v0 }
  0x41   : > { %502 = vmatpush2.bf16.msra.mxu0 %v814_v18  ;;  %771 = vmatpush2.bf16.msra.mxu1 %v814_v18 }
  0x42   : > { %503 = vmatprep.subr.bf16.mxu0 %v845_v0  ;;  %758 = vmatprep.subr.bf16.mxu1 %v845_v0 }
  0x45   : > { %504 = vmatpush2.bf16.msra.mxu0 %v815_v19  ;;  %772 = vmatpush2.bf16.msra.mxu1 %v815_v19 }
  0x48   : > { %506 = vmatmul.mubr.bf16.vlgmr.msra.gmra.mxu0 %v816_v20  ;;  %514 = vmatmul.mubr.bf16.vlgmr.msra.gmra.mxu1 %v718_v21 }
 0x108   : > { %v507_v24 = vpop.f32.mrf.mxu0  ;;  %v515_v25 = vpop.f32.mrf.mxu1 }
 0x109   : > { %v521_v26 = vadd.f32 %v507_v24, %v333_v22  ;;  %v523_v27 = vadd.f32 %v515_v25, %v335_v23 }
 0x10a   : > { %v509_v28 = vpop.f32.mrf.mxu0  ;;  %v517_v29 = vpop.f32.mrf.mxu1 }
 0x10b   : > { %525 = vst.msk [vmem:[#allocation2] sm:$0xff] %vm328_vm0, %v521_v26 }
 0x10c   : > { %528 = vst.msk [vmem:[#allocation2 + $0x10] sm:$0x3] %vm331_vm3, %v523_v27  ;;  %v510_v31 = vpop.f32.mrf.mxu0  ;;  %v518_v32 = vpop.f32.mrf.mxu1 }
 0x10d   : > { %v522_v33 = vadd.f32 %v510_v31, %v334_v30 }
 0x10e   : > { %v512_v34 = vpop.f32.mrf.mxu0  ;;  %v519_v35 = vpop.f32.mrf.mxu1 }
 0x10f   : > { %526 = vst.msk [vmem:[#allocation2 + $0x8] sm:$0xff] %vm328_vm0, %v522_v33 }
 0x112   : > { %v532_v37 = vld [vmem:[#allocation2] sm:$0xff] }
 0x113   : > { %v534_v38 = vld [vmem:[#allocation2 + $0x10] sm:$0x3]  ;;  %v542_v39 = vadd.f32 %v736_v36, %v532_v37 }
 0x114   : > { %v544_v40 = vadd.f32 %v736_v36, %v534_v38 }
 0x115   : > { %v545_v41 = vmax.f32 %v542_v39, 0.0 }
 0x116   : > { %v547_v42 = vmax.f32 %v544_v40, 0.0  ;;  %v533_v43 = vld [vmem:[#allocation2 + $0x8] sm:$0xff] }
 0x117   : > { %v742_v44 = vpack.c.bf16 %v545_v41, %v545_v41  ;;  %v543_v46 = vadd.f32 %v736_v36, %v533_v43 }
 0x118   : > { %v744_v45 = vpack.c.bf16 %v547_v42, %v547_v42 }
 0x119   : > { %562 = vst.msk [vmem:[%s321_s30] sm:$0xf] %vm561_vm4, %v742_v44  ;;  %v546_v47 = vmax.f32 %v543_v46, 0.0 }
 0x11a   : > { %565 = vst.msk [vmem:[%s321_s30 + $0x8] sm:$0x1] %vm564_vm5, %v744_v45 }
 0x11b   : > { %v743_v48 = vpack.c.bf16 %v546_v47, %v546_v47 }
 0x11d   : > { %563 = vst.msk [vmem:[%s321_s30 + $0x4] sm:$0xf] %vm561_vm4, %v743_v48 }
 0x11e PF: > { %s13_s14 = sadd.s32 1, %s843_s14   ;;  %s972_s12 = smov %s839_s13 }
 0x11f   : > { %p10_p5 = scmp.ge.s32.totalorder %s13_s14, 6   ;;  %s973_s13 = smov %s975_s15 }
 0x121   :  { %12 = sbr.rel (!%p10_p5) target bundleno = 2 (0x2), region = 76 }

// kernel: goturn_forward.13
= control target key start
LH: loop header
LB: loop body
LE: loop exit
PB: predicated region body
PF: predicated region fallthrough
CT: control target
= control target key end

     0   :  { %s867_s12 = smov 0   ;;  %s869_s13 = smov 0   ;;  %s968_s0 = inlined_call_operand.vmem [shape: bf16[4,18,216], index: 0, kind: input, shape index: {}]   ;;  %s969_s1 = inlined_call_operand.vmem [shape: bf16[4,216,16], index: 1, kind: input, shape index: {}]   ;;  %s970_s2 = inlined_call_operand.vmem [shape: f32[4,1,16], index: 2, kind: input, shape index: {}]   ;;  %s971_s3 = inlined_call_operand.vmem [shape: bf16[4,18,16], index: 3, kind: output, shape index: {}]  }
   0x1   :  { %s871_s14 = smov 0  }
   0x2 LB: > { %s39_s15 = sadd.s32 1, %s839_s13  ;;  %p712_p0 = scmp.ge.s32.totalorder %s843_s14, 1  ;;  %s843_s14 = sphi %s871_s14, %s13_s14   ;;  %s839_s13 = sphi %s869_s13, %s973_s13   ;;  %s835_s12 = sphi %s867_s12, %s972_s12  }
   0x3   : > { %p41_p1 = scmp.ge.s32.totalorder %s39_s15, 4  ;;  %p217_p2 = scmp.lt.s32.totalorder %s843_s14, 5 }
   0x5   : > { %s975_s15 = smov (%p41_p1, %s39_s15), 0  ;;  %p218_p3 = pnand %p712_p0, %p217_p2 }
   0x6   : > { %p277_p4 = scmp.lt.s32.totalorder (!%p218_p3), %s835_s12, 3 }
   0x7   : > { %221 = sbr.rel (%p218_p3) target bundleno = 286 (0x11e), region = 32 }
   0xc   : > { %vm328_vm0 = vcmask 130048   ;;  %v845_v0 = vmov 0   ;;  %s977_s12 = smov (!%p277_p4, %s835_s12), 3  ;;  %v846_v1 = vmov 0.0   ;;  %vm462_vm1 = vcmask 719872  }
   0xd   : > { %473 = vmatprep.subr.bf16.mxu0 %v845_v0  ;;  %745 = vmatprep.subr.bf16.mxu1 %v845_v0  ;;  %329 = vst.msk [vmem:[#allocation2] sm:$0xff] %vm328_vm0, %v846_v1  ;;  %330 = vst.msk [vmem:[#allocation2 + $0x8] sm:$0xff] %vm328_vm0, %v846_v1  ;;  %s774_s16 = smul.u32 108, %s977_s12  ;;  %vm469_vm2 = vcmask 1043456   ;;  %vm331_vm3 = vcmask 123904   ;;  %s309_s26 = scalar_lea.vmem %s970_s2, %s977_s12  ;;  %vm561_vm4 = vcmask 125952  }
   0xe   : > { %s773_s20 = smul.u32 24, %s977_s12  ;;  %332 = vst.msk [vmem:[#allocation2 + $0x10] sm:$0x3] %vm331_vm3, %v846_v1  ;;  %v736_v36 = vld [vmem:[%s309_s26] ss:$0 sm:$0xff]  ;;  %vm564_vm5 = vcmask 122880  }
   0xf   : > { %s897_s19 = scalar_lea.vmem %s969_s1, %s774_s16  ;;  %s775_s27 = smul.u32 12, %s977_s12 }
  0x10   : > { %v802_v2 = vld [vmem:[%s897_s19 + $0x38] sm:$0xff]   ;;  %v803_v3 = vld [vmem:[%s897_s19 + $0x30] sm:$0xff]   ;;  %v804_v4 = vld [vmem:[%s897_s19 + $0x28] sm:$0xff]   ;;  %s913_s23 = scalar_lea.vmem %s968_s0, %s773_s20 }
  0x11   : > { %474 = vmatpush1.bf16.msra.mxu0 %v802_v2  ;;  %759 = vmatpush1.bf16.msra.mxu1 %v802_v2  ;;  %v805_v5 = vld [vmem:[%s897_s19 + $0x20] sm:$0xff]   ;;  %v806_v6 = vld [vmem:[%s897_s19 + $0x18] sm:$0xff]   ;;  %v338_v8 = vld [vmem:[%s913_s23 + $0x10] sm:$0x11]  ;;  %s321_s30 = scalar_lea.vmem %s971_s3, %s775_s27 }
  0x12   : > { %475 = vmatprep.subr.bf16.mxu0 %v845_v0  ;;  %746 = vmatprep.subr.bf16.mxu1 %v845_v0  ;;  %v818_v7 = vld [vmem:[%s913_s23 + $0x4] ss:$8 sps:$4 sm:$0xff]   ;;  %v719_v9 = vcombine.high %v338_v8, %v338_v8  ;;  %v807_v10 = vld [vmem:[%s897_s19 + $0x10] sm:$0xff]   ;;  %v810_v13 = vld [vmem:[%s897_s19 + $0x68] ss:$0 sps:$4 sm:$0xff]   ;;  %v718_v21 = vcombine.low %v338_v8, %v338_v8 }
  0x13   : > { %734 = vmatprep.mubr.msk.bf16.mxu0 %vm462_vm1, %v818_v7  ;;  %v808_v11 = vld [vmem:[%s897_s19 + $0x8] sm:$0xff]   ;;  %v809_v12 = vld [vmem:[%s897_s19] sm:$0xff]   ;;  %v471_v14 = vsel %vm469_vm2, %v810_v13, 0  ;;  %v812_v16 = vld [vmem:[%s897_s19 + $0x58] sm:$0xff]  }
  0x14   : > { %735 = vmatprep.mubr.msk.bf16.mxu1 %vm462_vm1, %v719_v9  ;;  %v811_v15 = vld [vmem:[%s897_s19 + $0x60] sm:$0xff]   ;;  %v813_v17 = vld [vmem:[%s897_s19 + $0x50] sm:$0xff]   ;;  %v814_v18 = vld [vmem:[%s897_s19 + $0x48] sm:$0xff]  }
  0x15   : > { %476 = vmatpush1.bf16.msra.mxu0 %v803_v3  ;;  %760 = vmatpush1.bf16.msra.mxu1 %v803_v3  ;;  %v815_v19 = vld [vmem:[%s897_s19 + $0x40] sm:$0xff]   ;;  %v335_v23 = vld [vmem:[#allocation2 + $0x10] sm:$0x3]  ;;  %v334_v30 = vld [vmem:[#allocation2 + $0x8] sm:$0xff] }
  0x16   : > { %477 = vmatprep.subr.bf16.mxu0 %v845_v0  ;;  %747 = vmatprep.subr.bf16.mxu1 %v845_v0  ;;  %v816_v20 = vld [vmem:[%s913_s23] ss:$8 sps:$4 sm:$0xff]  }
  0x17   : > { %v333_v22 = vld [vmem:[#allocation2] sm:$0xff] }
  0x19   : > { %478 = vmatpush1.bf16.msra.mxu0 %v804_v4  ;;  %761 = vmatpush1.bf16.msra.mxu1 %v804_v4 }
  0x1a   : > { %479 = vmatprep.subr.bf16.mxu0 %v845_v0  ;;  %748 = vmatprep.subr.bf16.mxu1 %v845_v0 }
  0x1d   : > { %480 = vmatpush1.bf16.msra.mxu0 %v805_v5  ;;  %762 = vmatpush1.bf16.msra.mxu1 %v805_v5 }
  0x1e   : > { %481 = vmatprep.subr.bf16.mxu0 %v845_v0  ;;  %749 = vmatprep.subr.bf16.mxu1 %v845_v0 }
  0x21   : > { %482 = vmatpush1.bf16.msra.mxu0 %v806_v6  ;;  %763 = vmatpush1.bf16.msra.mxu1 %v806_v6 }
  0x22   : > { %483 = vmatprep.subr.bf16.mxu0 %v845_v0  ;;  %750 = vmatprep.subr.bf16.mxu1 %v845_v0 }
  0x25   : > { %484 = vmatpush1.bf16.msra.mxu0 %v807_v10  ;;  %764 = vmatpush1.bf16.msra.mxu1 %v807_v10 }
  0x26   : > { %485 = vmatprep.subr.bf16.mxu0 %v845_v0  ;;  %751 = vmatprep.subr.bf16.mxu1 %v845_v0 }
  0x29   : > { %486 = vmatpush1.bf16.msra.mxu0 %v808_v11  ;;  %765 = vmatpush1.bf16.msra.mxu1 %v808_v11 }
  0x2a   : > { %487 = vmatprep.subr.bf16.mxu0 %v845_v0  ;;  %752 = vmatprep.subr.bf16.mxu1 %v845_v0 }
  0x2d   : > { %488 = vmatpush1.bf16.msra.mxu0 %v809_v12  ;;  %766 = vmatpush1.bf16.msra.mxu1 %v809_v12 }
  0x2e   : > { %493 = vmatprep.subr.bf16.mxu0 %v845_v0  ;;  %753 = vmatprep.subr.bf16.mxu1 %v845_v0 }
  0x31   : > { %494 = vmatpush2.bf16.msra.mxu0 %v471_v14  ;;  %767 = vmatpush2.bf16.msra.mxu1 %v471_v14 }
  0x32   : > { %495 = vmatprep.subr.bf16.mxu0 %v845_v0  ;;  %754 = vmatprep.subr.bf16.mxu1 %v845_v0 }
  0x35   : > { %496 = vmatpush2.bf16.msra.mxu0 %v811_v15  ;;  %768 = vmatpush2.bf16.msra.mxu1 %v811_v15 }
  0x36   : > { %497 = vmatprep.subr.bf16.mxu0 %v845_v0  ;;  %755 = vmatprep.subr.bf16.mxu1 %v845_v0 }
  0x39   : > { %498 = vmatpush2.bf16.msra.mxu0 %v812_v16  ;;  %769 = vmatpush2.bf16.msra.mxu1 %v812_v16 }
  0x3a   : > { %499 = vmatprep.subr.bf16.mxu0 %v845_v0  ;;  %756 = vmatprep.subr.bf16.mxu1 %v845_v0 }
  0x3d   : > { %500 = vmatpush2.bf16.msra.mxu0 %v813_v17  ;;  %770 = vmatpush2.bf16.msra.mxu1 %v813_v17 }
  0x3e   : > { %501 = vmatprep.subr.bf16.mxu0 %v845_v0  ;;  %757 = vmatprep.subr.bf16.mxu1 %v845_v0 }
  0x41   : > { %502 = vmatpush2.bf16.msra.mxu0 %v814_v18  ;;  %771 = vmatpush2.bf16.msra.mxu1 %v814_v18 }
  0x42   : > { %503 = vmatprep.subr.bf16.mxu0 %v845_v0  ;;  %758 = vmatprep.subr.bf16.mxu1 %v845_v0 }
  0x45   : > { %504 = vmatpush2.bf16.msra.mxu0 %v815_v19  ;;  %772 = vmatpush2.bf16.msra.mxu1 %v815_v19 }
  0x48   : > { %506 = vmatmul.mubr.bf16.vlgmr.msra.gmra.mxu0 %v816_v20  ;;  %514 = vmatmul.mubr.bf16.vlgmr.msra.gmra.mxu1 %v718_v21 }
 0x108   : > { %v507_v24 = vpop.f32.mrf.mxu0  ;;  %v515_v25 = vpop.f32.mrf.mxu1 }
 0x109   : > { %v521_v26 = vadd.f32 %v507_v24, %v333_v22  ;;  %v523_v27 = vadd.f32 %v515_v25, %v335_v23 }
 0x10a   : > { %v509_v28 = vpop.f32.mrf.mxu0  ;;  %v517_v29 = vpop.f32.mrf.mxu1 }
 0x10b   : > { %525 = vst.msk [vmem:[#allocation2] sm:$0xff] %vm328_vm0, %v521_v26 }
 0x10c   : > { %528 = vst.msk [vmem:[#allocation2 + $0x10] sm:$0x3] %vm331_vm3, %v523_v27  ;;  %v510_v31 = vpop.f32.mrf.mxu0  ;;  %v518_v32 = vpop.f32.mrf.mxu1 }
 0x10d   : > { %v522_v33 = vadd.f32 %v510_v31, %v334_v30 }
 0x10e   : > { %v512_v34 = vpop.f32.mrf.mxu0  ;;  %v519_v35 = vpop.f32.mrf.mxu1 }
 0x10f   : > { %526 = vst.msk [vmem:[#allocation2 + $0x8] sm:$0xff] %vm328_vm0, %v522_v33 }
 0x112   : > { %v532_v37 = vld [vmem:[#allocation2] sm:$0xff] }
 0x113   : > { %v534_v38 = vld [vmem:[#allocation2 + $0x10] sm:$0x3]  ;;  %v542_v39 = vadd.f32 %v736_v36, %v532_v37 }
 0x114   : > { %v544_v40 = vadd.f32 %v736_v36, %v534_v38 }
 0x115   : > { %v545_v41 = vmax.f32 %v542_v39, 0.0 }
 0x116   : > { %v547_v42 = vmax.f32 %v544_v40, 0.0  ;;  %v533_v43 = vld [vmem:[#allocation2 + $0x8] sm:$0xff] }
 0x117   : > { %v742_v44 = vpack.c.bf16 %v545_v41, %v545_v41  ;;  %v543_v46 = vadd.f32 %v736_v36, %v533_v43 }
 0x118   : > { %v744_v45 = vpack.c.bf16 %v547_v42, %v547_v42 }
 0x119   : > { %562 = vst.msk [vmem:[%s321_s30] sm:$0xf] %vm561_vm4, %v742_v44  ;;  %v546_v47 = vmax.f32 %v543_v46, 0.0 }
 0x11a   : > { %565 = vst.msk [vmem:[%s321_s30 + $0x8] sm:$0x1] %vm564_vm5, %v744_v45 }
 0x11b   : > { %v743_v48 = vpack.c.bf16 %v546_v47, %v546_v47 }
 0x11d   : > { %563 = vst.msk [vmem:[%s321_s30 + $0x4] sm:$0xf] %vm561_vm4, %v743_v48 }
 0x11e PF: > { %s13_s14 = sadd.s32 1, %s843_s14   ;;  %s972_s12 = smov %s839_s13 }
 0x11f   : > { %p10_p5 = scmp.ge.s32.totalorder %s13_s14, 6   ;;  %s973_s13 = smov %s975_s15 }
 0x121   :  { %12 = sbr.rel (!%p10_p5) target bundleno = 2 (0x2), region = 76 }

// kernel: goturn_forward.15
= control target key start
LH: loop header
LB: loop body
LE: loop exit
PB: predicated region body
PF: predicated region fallthrough
CT: control target
= control target key end

     0   :  { %s997_s12 = smov 0   ;;  %s999_s13 = smov 0   ;;  %s1155_s0 = inlined_call_operand.vmem [shape: bf16[1,2,256], index: 0, kind: input, shape index: {}]   ;;  %s1156_s1 = inlined_call_operand.vmem [shape: bf16[1,256,256], index: 1, kind: input, shape index: {}]   ;;  %s1157_s2 = inlined_call_operand.vmem [shape: f32[1,1,256], index: 2, kind: input, shape index: {}]   ;;  %s1158_s3 = inlined_call_operand.vmem [shape: bf16[1,2,256], index: 3, kind: output, shape index: {}]  }
   0x1   :  { %s1001_s14 = smov 0   ;;  %s1003_s15 = smov 0  }
   0x2   :  { %s1005_s16 = smov 0  }
   0x3 LB: > { %s31_s17 = sadd.s32 1, %s969_s15  ;;  %p87_p1 = scmp.ne.s32.totalorder %s961_s13, %s957_s12  ;;  %s973_s16 = sphi %s1005_s16, %s13_s16   ;;  %s969_s15 = sphi %s1003_s15, %s1162_s15   ;;  %s965_s14 = sphi %s1001_s14, %s1161_s14   ;;  %s961_s13 = sphi %s999_s13, %s1160_s13   ;;  %s957_s12 = sphi %s997_s12, %s1159_s12  }
   0x4   : > { %p33_p0 = scmp.ge.s32.totalorder %s31_s17, 2  ;;  %p88_p2 = scmp.eq.s32.totalorder %s973_s16, 0 }
   0x5   : > { %s80_s19 = sadd.s32 1, %s961_s13  ;;  %p830_p5 = scmp.ge.s32.totalorder %s973_s16, 2 }
   0x6   : > { %s1164_s17 = smov (%p33_p0, %s31_s17), 0  ;;  %p89_p3 = por %p88_p2, %p87_p1 }
   0x7   : > { %s76_s18 = ssub.s32 %s969_s15, %s1164_s17  ;;  %187 = sbr.rel (%p830_p5) target bundleno = 37 (0x25), region = 20 }
   0x8   : > { %p78_p4 = scmp.eq.s32.totalorder %s76_s18, 0 }
   0xa   : > { %s1032_s20 = scalar_select %p78_p4, %s961_s13, %s80_s19  }
   0xc   : > { %190 = sbr.rel (!%p89_p3) target bundleno = 37 (0x25), region = 24  ;;  %s192_s21 = sand.u32 (%p89_p3), 1, %s961_s13  }
   0xd   : > { %s832_s22 = sshll.u32 (%p89_p3), %s969_s15, 2  ;;  %s831_s23 = sshll.u32 (%p89_p3), %s192_s21, 7 }
   0xe   : > { %s1040_s26 = scalar_lea.vmem (%p89_p3), %s1156_s1, %s832_s22  ;;  %s1044_s27 = scalar_lea.vmem (%p89_p3), [#allocation3], %s831_s23 }
   0xf   : > { %v218_v0 = vld [vmem:[%s1040_s26] sm:$0xf] (%p89_p3)  ;;  %v220_v1 = vld [vmem:[%s1040_s26 + $0x8] sm:$0xf] (%p89_p3)  ;;  %v222_v2 = vld [vmem:[%s1040_s26 + $0x10] sm:$0xf] (%p89_p3) }
  0x10   : > { %219 = vst [vmem:[%s1044_s27] sm:$0xf] (%p89_p3), %v218_v0  ;;  %221 = vst [vmem:[%s1044_s27 + $0x4] sm:$0xf] (%p89_p3), %v220_v1  ;;  %v224_v3 = vld [vmem:[%s1040_s26 + $0x18] sm:$0xf] (%p89_p3) }
  0x11   : > { %v226_v4 = vld [vmem:[%s1040_s26 + $0x20] sm:$0xf]  ;;  %223 = vst [vmem:[%s1044_s27 + $0x8] sm:$0xf] %v222_v2  ;;  %225 = vst [vmem:[%s1044_s27 + $0xc] sm:$0xf] %v224_v3 }
  0x12   : > { %227 = vst [vmem:[%s1044_s27 + $0x10] sm:$0xf] %v226_v4  ;;  %v228_v5 = vld [vmem:[%s1040_s26 + $0x28] sm:$0xf]  ;;  %v230_v6 = vld [vmem:[%s1040_s26 + $0x30] sm:$0xf] }
  0x13   : > { %v232_v7 = vld [vmem:[%s1040_s26 + $0x38] sm:$0xf]  ;;  %229 = vst [vmem:[%s1044_s27 + $0x14] sm:$0xf] %v228_v5  ;;  %231 = vst [vmem:[%s1044_s27 + $0x18] sm:$0xf] %v230_v6 }
  0x14   : > { %233 = vst [vmem:[%s1044_s27 + $0x1c] sm:$0xf] %v232_v7  ;;  %v234_v8 = vld [vmem:[%s1040_s26 + $0x40] sm:$0xf]  ;;  %v236_v9 = vld [vmem:[%s1040_s26 + $0x48] sm:$0xf] }
  0x15   : > { %v238_v10 = vld [vmem:[%s1040_s26 + $0x50] sm:$0xf]  ;;  %235 = vst [vmem:[%s1044_s27 + $0x20] sm:$0xf] %v234_v8  ;;  %237 = vst [vmem:[%s1044_s27 + $0x24] sm:$0xf] %v236_v9 }
  0x16   : > { %239 = vst [vmem:[%s1044_s27 + $0x28] sm:$0xf] %v238_v10  ;;  %v240_v11 = vld [vmem:[%s1040_s26 + $0x58] sm:$0xf]  ;;  %v242_v12 = vld [vmem:[%s1040_s26 + $0x60] sm:$0xf] }
  0x17   : > { %v244_v13 = vld [vmem:[%s1040_s26 + $0x68] sm:$0xf]  ;;  %241 = vst [vmem:[%s1044_s27 + $0x2c] sm:$0xf] %v240_v11  ;;  %243 = vst [vmem:[%s1044_s27 + $0x30] sm:$0xf] %v242_v12 }
  0x18   : > { %245 = vst [vmem:[%s1044_s27 + $0x34] sm:$0xf] %v244_v13  ;;  %v246_v14 = vld [vmem:[%s1040_s26 + $0x70] sm:$0xf]  ;;  %v248_v15 = vld [vmem:[%s1040_s26 + $0x78] sm:$0xf] }
  0x19   : > { %v250_v16 = vld [vmem:[%s1040_s26 + $0x80] sm:$0xf]  ;;  %247 = vst [vmem:[%s1044_s27 + $0x38] sm:$0xf] %v246_v14  ;;  %249 = vst [vmem:[%s1044_s27 + $0x3c] sm:$0xf] %v248_v15 }
  0x1a   : > { %251 = vst [vmem:[%s1044_s27 + $0x40] sm:$0xf] %v250_v16  ;;  %v252_v17 = vld [vmem:[%s1040_s26 + $0x88] sm:$0xf]  ;;  %v254_v18 = vld [vmem:[%s1040_s26 + $0x90] sm:$0xf] }
  0x1b   : > { %v256_v19 = vld [vmem:[%s1040_s26 + $0x98] sm:$0xf]  ;;  %253 = vst [vmem:[%s1044_s27 + $0x44] sm:$0xf] %v252_v17  ;;  %255 = vst [vmem:[%s1044_s27 + $0x48] sm:$0xf] %v254_v18 }
  0x1c   : > { %257 = vst [vmem:[%s1044_s27 + $0x4c] sm:$0xf] %v256_v19  ;;  %v258_v20 = vld [vmem:[%s1040_s26 + $0xa0] sm:$0xf]  ;;  %v260_v21 = vld [vmem:[%s1040_s26 + $0xa8] sm:$0xf] }
  0x1d   : > { %v262_v22 = vld [vmem:[%s1040_s26 + $0xb0] sm:$0xf]  ;;  %259 = vst [vmem:[%s1044_s27 + $0x50] sm:$0xf] %v258_v20  ;;  %261 = vst [vmem:[%s1044_s27 + $0x54] sm:$0xf] %v260_v21 }
  0x1e   : > { %263 = vst [vmem:[%s1044_s27 + $0x58] sm:$0xf] %v262_v22  ;;  %v264_v23 = vld [vmem:[%s1040_s26 + $0xb8] sm:$0xf]  ;;  %v266_v24 = vld [vmem:[%s1040_s26 + $0xc0] sm:$0xf] }
  0x1f   : > { %v268_v25 = vld [vmem:[%s1040_s26 + $0xc8] sm:$0xf]  ;;  %265 = vst [vmem:[%s1044_s27 + $0x5c] sm:$0xf] %v264_v23  ;;  %267 = vst [vmem:[%s1044_s27 + $0x60] sm:$0xf] %v266_v24 }
  0x20   : > { %269 = vst [vmem:[%s1044_s27 + $0x64] sm:$0xf] %v268_v25  ;;  %v270_v26 = vld [vmem:[%s1040_s26 + $0xd0] sm:$0xf]  ;;  %v272_v27 = vld [vmem:[%s1040_s26 + $0xd8] sm:$0xf] }
  0x21   : > { %v274_v28 = vld [vmem:[%s1040_s26 + $0xe0] sm:$0xf]  ;;  %271 = vst [vmem:[%s1044_s27 + $0x68] sm:$0xf] %v270_v26  ;;  %273 = vst [vmem:[%s1044_s27 + $0x6c] sm:$0xf] %v272_v27 }
  0x22   : > { %275 = vst [vmem:[%s1044_s27 + $0x70] sm:$0xf] %v274_v28  ;;  %v276_v29 = vld [vmem:[%s1040_s26 + $0xe8] sm:$0xf]  ;;  %v278_v30 = vld [vmem:[%s1040_s26 + $0xf0] sm:$0xf] }
  0x23   : > { %v280_v31 = vld [vmem:[%s1040_s26 + $0xf8] sm:$0xf]  ;;  %277 = vst [vmem:[%s1044_s27 + $0x74] sm:$0xf] %v276_v29  ;;  %279 = vst [vmem:[%s1044_s27 + $0x78] sm:$0xf] %v278_v30 }
  0x24   : > { %281 = vst [vmem:[%s1044_s27 + $0x7c] sm:$0xf] %v280_v31 }
  0x25 PF: > { %p833_p6 = scmp.ge.s32.totalorder %s973_s16, 1  ;;  %p378_p7 = scmp.lt.s32.totalorder %s973_s16, 3 }
  0x27   : > { %p379_p8 = pnand %p833_p6, %p378_p7 }
  0x28   : > { %s385_s28 = sand.u32 (!%p379_p8), 1, %s957_s12   ;;  %p449_p9 = scmp.lt.s32.totalorder (!%p379_p8), %s965_s14, 1 }
  0x29   : > { %382 = sbr.rel (%p379_p8) target bundleno = 294 (0x126), region = 69  ;;  %s834_s4 = sshll.u32 (!%p379_p8), %s385_s28, 7 }
  0x2a   : > { %s1114_s5 = scalar_lea.vmem (!%p379_p8), [#allocation3], %s834_s4 }
  0x2e   : > { %v835_v32 = vld.sshfl [vmem:[%s1155_s0] sm:$0x11 pattern:$0x75316420]  ;;  %v517_v33 = vlaneseq  ;;  %v975_v34 = vmov 1966171168  }
  0x2f   : > { %v515_v35 = vunpack.c.l.s4 %v975_v34  ;;  %v919_v37 = vld [vmem:[%s1114_s5 + $0x78] sm:$0xff]   ;;  %v513_v39 = vcombine.high %v835_v32, %v835_v32  ;;  %v921_v41 = vld [vmem:[%s1114_s5 + $0x70] sm:$0xff]   ;;  %v923_v44 = vld [vmem:[%s1114_s5 + $0x68] sm:$0xff]   ;;  %v976_v58 = vmov 0.0   ;;  %s1166_s14 = smov (!%p449_p9, %s965_s14), 1 }
  0x30   : > { %v518_v36 = vshrl.u32 %v517_v33, 7  ;;  %v920_v38 = vld [vmem:[%s1114_s5 + $0x38] sm:$0xff]   ;;  %855 = vmatprep.subr.bf16.mxu0 %v919_v37  ;;  %v922_v42 = vld [vmem:[%s1114_s5 + $0x30] sm:$0xff]   ;;  %v924_v46 = vld [vmem:[%s1114_s5 + $0x28] sm:$0xff]   ;;  %470 = vst [vmem:[#allocation2] sm:$0x3] %v976_v58  ;;  %s453_s8 = scalar_lea.vmem %s1157_s2, %s1166_s14  ;;  %s464_s11 = scalar_lea.vmem %s1158_s3, %s1166_s14 }
  0x31   : > { %v516_v40 = vunpack.c.0.s8 %v515_v35  ;;  %856 = vmatpush3.bf16.msra.mxu0 %v920_v38  ;;  %v925_v47 = vld [vmem:[%s1114_s5 + $0x60] sm:$0xff]   ;;  %v927_v49 = vld [vmem:[%s1114_s5 + $0x58] sm:$0xff]   ;;  %v929_v51 = vld [vmem:[%s1114_s5 + $0x50] sm:$0xff]  }
  0x32   : > { %857 = vmatprep.subr.bf16.mxu0 %v921_v41  ;;  %v926_v48 = vld [vmem:[%s1114_s5 + $0x20] sm:$0xff]   ;;  %v928_v50 = vld [vmem:[%s1114_s5 + $0x18] sm:$0xff]   ;;  %v930_v52 = vld [vmem:[%s1114_s5 + $0x10] sm:$0xff]  }
  0x33   : > { %v519_v43 = vsub.s32 %v516_v40, %v518_v36  ;;  %v931_v53 = vld [vmem:[%s1114_s5 + $0x48] sm:$0xff]   ;;  %v933_v55 = vld [vmem:[%s1114_s5 + $0x40] sm:$0xff]   ;;  %v852_v2 = vld [vmem:[%s453_s8] ss:$0 sm:$0xff] }
  0x34   : > { %v932_v54 = vld [vmem:[%s1114_s5 + $0x8] sm:$0xff]   ;;  %v934_v56 = vld [vmem:[%s1114_s5] sm:$0xff]  }
  0x35   : > { %v527_v45 = vrot.slane %v513_v39, %v519_v43  ;;  %858 = vmatpush3.bf16.msra.mxu0 %v922_v42  ;;  %v520_v57 = vrot.slane %v835_v32, %v519_v43 }
  0x36   : > { %859 = vmatprep.subr.bf16.mxu0 %v923_v44 }
  0x37   : > { %658 = vmatprep.mubr.bf16.mxu0 %v527_v45  ;;  %v471_v60 = vld [vmem:[#allocation2] sm:$0x3] }
  0x39   : > { %860 = vmatpush3.bf16.msra.mxu0 %v924_v46 }
  0x3a   : > { %861 = vmatprep.subr.bf16.mxu0 %v925_v47 }
  0x3d   : > { %862 = vmatpush3.bf16.msra.mxu0 %v926_v48 }
  0x3e   : > { %863 = vmatprep.subr.bf16.mxu0 %v927_v49 }
  0x41   : > { %864 = vmatpush3.bf16.msra.mxu0 %v928_v50 }
  0x42   : > { %865 = vmatprep.subr.bf16.mxu0 %v929_v51 }
  0x45   : > { %866 = vmatpush3.bf16.msra.mxu0 %v930_v52 }
  0x46   : > { %867 = vmatprep.subr.bf16.mxu0 %v931_v53 }
  0x49   : > { %868 = vmatpush3.bf16.msra.mxu0 %v932_v54 }
  0x4a   : > { %869 = vmatprep.subr.bf16.mxu0 %v933_v55 }
  0x4d   : > { %870 = vmatpush3.bf16.msra.mxu0 %v934_v56 }
  0x50   : > { %659 = vmatmul.mubr.bf16.vlgmr.msra.gmra.mxu0 %v520_v57 }
 0x110   : > { %v871_v59 = vpop.f32.mrf.mxu0 }
 0x112   : > { %v872_v61 = vpop.f32.mrf.mxu0 }
 0x113   : > { %v873_v62 = vadd.f32 %v872_v61, %v871_v59 }
 0x114   : > { %v874_v63 = vpop.f32.mrf.mxu0 }
 0x115   : > { %v666_v0 = vadd.f32 %v873_v62, %v471_v60 }
 0x116   : > { %v875_v1 = vpop.f32.mrf.mxu0 }
 0x117   : > { %667 = vst [vmem:[#allocation2] sm:$0x3] %v666_v0 }
 0x11e   : > { %v671_v3 = vld [vmem:[#allocation2] sm:$0x3] }
 0x11f   : > { %v679_v4 = vadd.f32 %v852_v2, %v671_v3 }
 0x121   : > { %v680_v5 = vmax.f32 %v679_v4, 0.0 }
 0x123   : > { %v681_v6 = vpack.c.bf16 %v680_v5, %v680_v5 }
 0x125   : > { %682 = vst [vmem:[%s464_s11] sm:$0x1] %v681_v6 }
 0x126 PF: > { %s13_s16 = sadd.s32 1, %s973_s16   ;;  %s1159_s12 = smov %s961_s13 }
 0x127   : > { %p10_p10 = scmp.ge.s32.totalorder %s13_s16, 4   ;;  %s1160_s13 = smov %s1032_s20 }
 0x128   : > { %s1161_s14 = smov %s969_s15  ;;  %s1162_s15 = smov %s1164_s17 }
 0x129   :  { %12 = sbr.rel (!%p10_p10) target bundleno = 3 (0x3), region = 122 }

// kernel: goturn_forward.14
= control target key start
LH: loop header
LB: loop body
LE: loop exit
PB: predicated region body
PF: predicated region fallthrough
CT: control target
= control target key end

     0   :  { %s738_s12 = smov 0   ;;  %s740_s13 = smov 0   ;;  %s810_s0 = inlined_call_operand.vmem [shape: bf16[1,2,64], index: 0, kind: input, shape index: {}]   ;;  %s811_s1 = inlined_call_operand.vmem [shape: bf16[1,64,256], index: 1, kind: input, shape index: {}]   ;;  %s812_s2 = inlined_call_operand.vmem [shape: f32[1,1,256], index: 2, kind: input, shape index: {}]   ;;  %s813_s3 = inlined_call_operand.vmem [shape: bf16[1,2,256], index: 3, kind: output, shape index: {}]  }
   0x1   :  { %s742_s14 = smov 0   ;;  %s744_s15 = smov 0  }
   0x2   :  { %s746_s16 = smov 0  }
   0x3 LB: > { %s31_s17 = sadd.s32 1, %s710_s15  ;;  %p87_p1 = scmp.ne.s32.totalorder %s702_s13, %s698_s12  ;;  %s714_s16 = sphi %s746_s16, %s13_s16   ;;  %s710_s15 = sphi %s744_s15, %s817_s15   ;;  %s706_s14 = sphi %s742_s14, %s816_s14   ;;  %s702_s13 = sphi %s740_s13, %s815_s13   ;;  %s698_s12 = sphi %s738_s12, %s814_s12  }
   0x4   : > { %p33_p0 = scmp.ge.s32.totalorder %s31_s17, 2  ;;  %p88_p2 = scmp.eq.s32.totalorder %s714_s16, 0 }
   0x5   : > { %s80_s19 = sadd.s32 1, %s702_s13  ;;  %p600_p5 = scmp.ge.s32.totalorder %s714_s16, 2 }
   0x6   : > { %s819_s17 = smov (%p33_p0, %s31_s17), 0  ;;  %p89_p3 = por %p88_p2, %p87_p1 }
   0x7   : > { %s76_s18 = ssub.s32 %s710_s15, %s819_s17  ;;  %183 = sbr.rel (%p600_p5) target bundleno = 21 (0x15), region = 20 }
   0x8   : > { %p78_p4 = scmp.eq.s32.totalorder %s76_s18, 0 }
   0xa   : > { %s773_s20 = scalar_select %p78_p4, %s702_s13, %s80_s19  }
   0xc   : > { %186 = sbr.rel (!%p89_p3) target bundleno = 21 (0x15), region = 24  ;;  %s188_s21 = sand.u32 (%p89_p3), 1, %s702_s13  }
   0xd   : > { %s602_s22 = sshll.u32 (%p89_p3), %s710_s15, 2  ;;  %s601_s23 = sshll.u32 (%p89_p3), %s188_s21, 5 }
   0xe   : > { %s197_s26 = scalar_lea.vmem (%p89_p3), %s811_s1, %s602_s22  ;;  %s190_s27 = scalar_lea.vmem (%p89_p3), [#allocation3], %s601_s23 }
   0xf   : > { %v214_v0 = vld [vmem:[%s197_s26] sm:$0xf] (%p89_p3)  ;;  %v216_v1 = vld [vmem:[%s197_s26 + $0x8] sm:$0xf] (%p89_p3)  ;;  %v218_v2 = vld [vmem:[%s197_s26 + $0x10] sm:$0xf] (%p89_p3) }
  0x10   : > { %215 = vst [vmem:[%s190_s27] sm:$0xf] (%p89_p3), %v214_v0  ;;  %217 = vst [vmem:[%s190_s27 + $0x4] sm:$0xf] (%p89_p3), %v216_v1  ;;  %v220_v3 = vld [vmem:[%s197_s26 + $0x18] sm:$0xf] (%p89_p3) }
  0x11   : > { %v222_v4 = vld [vmem:[%s197_s26 + $0x20] sm:$0xf]  ;;  %219 = vst [vmem:[%s190_s27 + $0x8] sm:$0xf] %v218_v2  ;;  %221 = vst [vmem:[%s190_s27 + $0xc] sm:$0xf] %v220_v3 }
  0x12   : > { %223 = vst [vmem:[%s190_s27 + $0x10] sm:$0xf] %v222_v4  ;;  %v224_v5 = vld [vmem:[%s197_s26 + $0x28] sm:$0xf]  ;;  %v226_v6 = vld [vmem:[%s197_s26 + $0x30] sm:$0xf] }
  0x13   : > { %v228_v7 = vld [vmem:[%s197_s26 + $0x38] sm:$0xf]  ;;  %225 = vst [vmem:[%s190_s27 + $0x14] sm:$0xf] %v224_v5  ;;  %227 = vst [vmem:[%s190_s27 + $0x18] sm:$0xf] %v226_v6 }
  0x14   : > { %229 = vst [vmem:[%s190_s27 + $0x1c] sm:$0xf] %v228_v7 }
  0x15 PF: > { %p603_p6 = scmp.ge.s32.totalorder %s714_s16, 1  ;;  %p278_p7 = scmp.lt.s32.totalorder %s714_s16, 3 }
  0x17   : > { %p279_p8 = pnand %p603_p6, %p278_p7 }
  0x18   : > { %s285_s28 = sand.u32 (!%p279_p8), 1, %s698_s12   ;;  %p342_p9 = scmp.lt.s32.totalorder (!%p279_p8), %s706_s14, 1 }
  0x19   : > { %282 = sbr.rel (%p279_p8) target bundleno = 257 (0x101), region = 69  ;;  %s604_s29 = sshll.u32 (!%p279_p8), %s285_s28, 5 }
  0x1a   : > { %s287_s30 = scalar_lea.vmem (!%p279_p8), [#allocation3], %s604_s29 }
  0x1e   : > { %v716_v8 = vmov 0.0   ;;  %vm717_vm0 = vmmov 0   ;;  %v672_v9 = vld [vmem:[%s287_s30 + $0x18] sm:$0xff]   ;;  %v673_v10 = vld [vmem:[%s287_s30 + $0x10] sm:$0xff]   ;;  %v674_v11 = vld [vmem:[%s287_s30 + $0x8] sm:$0xff]   ;;  %vm398_vm1 = vcmask 523264  }
  0x1f   : > { %618 = vmatprep.subr.bf16.mxu0 %v716_v8  ;;  %363 = vst [vmem:[#allocation2] sm:$0x3] %v716_v8  ;;  %626 = vmatprep.mubr.msk.bf16.mxu0 %vm717_vm0, %v716_v8  ;;  %v675_v12 = vld [vmem:[%s287_s30] sm:$0xff]   ;;  %v365_v13 = vld [vmem:[%s810_s0] sm:$0x1]  ;;  %s821_s14 = smov (!%p342_p9, %s706_s14), 1 }
  0x20   : > { %619 = vmatpush3.bf16.msra.mxu0 %v672_v9  ;;  %s346_s8 = scalar_lea.vmem %s812_s2, %s821_s14  ;;  %s357_s11 = scalar_lea.vmem %s813_s3, %s821_s14 }
  0x21   : > { %620 = vmatprep.subr.bf16.mxu0 %v716_v8  ;;  %v610_v20 = vld [vmem:[%s346_s8] ss:$0 sm:$0xff] }
  0x24   : > { %621 = vmatpush3.bf16.msra.mxu0 %v673_v10 }
  0x25   : > { %622 = vmatprep.subr.bf16.mxu0 %v716_v8 }
  0x26   : > { %v364_v14 = vld [vmem:[#allocation2] sm:$0x3] }
  0x28   : > { %623 = vmatpush3.bf16.msra.mxu0 %v674_v11 }
  0x29   : > { %624 = vmatprep.subr.bf16.mxu0 %v716_v8 }
  0x2c   : > { %625 = vmatpush3.bf16.msra.mxu0 %v675_v12 }
  0x2f   : > { %627 = vmatmul.mubr.msk.bf16.vlgmr.msra.gmra.mxu0 %vm398_vm1, %v365_v13 }
  0xef   : > { %v436_v15 = vpop.f32.mrf.mxu0 }
  0xf0   : > { %v442_v16 = vadd.f32 %v436_v15, %v364_v14 }
  0xf1   : > { %v628_v17 = vpop.f32.mrf.mxu0 }
  0xf2   : > { %443 = vst [vmem:[#allocation2] sm:$0x3] %v442_v16 }
  0xf3   : > { %v439_v18 = vpop.f32.mrf.mxu0 }
  0xf5   : > { %v629_v19 = vpop.f32.mrf.mxu0 }
  0xf9   : > { %v447_v21 = vld [vmem:[#allocation2] sm:$0x3] }
  0xfa   : > { %v455_v22 = vadd.f32 %v610_v20, %v447_v21 }
  0xfc   : > { %v456_v23 = vmax.f32 %v455_v22, 0.0 }
  0xfe   : > { %v457_v24 = vpack.c.bf16 %v456_v23, %v456_v23 }
 0x100   : > { %458 = vst [vmem:[%s357_s11] sm:$0x1] %v457_v24 }
 0x101 PF: > { %s13_s16 = sadd.s32 1, %s714_s16   ;;  %s814_s12 = smov %s702_s13 }
 0x102   : > { %p10_p10 = scmp.ge.s32.totalorder %s13_s16, 4   ;;  %s815_s13 = smov %s773_s20 }
 0x103   : > { %s816_s14 = smov %s710_s15  ;;  %s817_s15 = smov %s819_s17 }
 0x104   :  { %12 = sbr.rel (!%p10_p10) target bundleno = 3 (0x3), region = 122 }

// kernel: goturn_forward.17
= control target key start
LH: loop header
LB: loop body
LE: loop exit
PB: predicated region body
PF: predicated region fallthrough
CT: control target
= control target key end

     0   :  { %v68_v9 = vlaneseq  ;;  %v328_v13 = vmov 1966171168   ;;  %s411_s0 = inlined_call_operand.vmem [shape: bf16[1,2,256], index: 0, kind: input, shape index: {}]   ;;  %s412_s1 = inlined_call_operand.vmem [shape: bf16[1,256,4], index: 1, kind: input, shape index: {}]   ;;  %s413_s2 = inlined_call_operand.vmem [shape: f32[1,1,4], index: 2, kind: input, shape index: {}]   ;;  %s414_s3 = inlined_call_operand.hbm [shape: f32[1,2,4], index: 3, kind: output, shape index: {}]  }
   0x1   :  { %v290_v0 = vld [vmem:[%s412_s1 + $0x78] sm:$0xff]   ;;  %v292_v2 = vld [vmem:[%s412_s1 + $0x70] sm:$0xff]   ;;  %v294_v4 = vld [vmem:[%s412_s1 + $0x68] sm:$0xff]   ;;  %v66_v14 = vunpack.c.l.s4 %v328_v13 }
   0x2   :  { %v291_v1 = vld [vmem:[%s412_s1 + $0x38] sm:$0xff]   ;;  %265 = vmatprep.subr.bf16.mxu0 %v290_v0  ;;  %v293_v3 = vld [vmem:[%s412_s1 + $0x30] sm:$0xff]   ;;  %v295_v5 = vld [vmem:[%s412_s1 + $0x28] sm:$0xff]   ;;  %v69_v15 = vshrl.u32 %v68_v9, 7 }
   0x3   :  { %266 = vmatpush3.bf16.msra.mxu0 %v291_v1  ;;  %v296_v6 = vld [vmem:[%s412_s1 + $0x60] sm:$0xff]   ;;  %v298_v8 = vld [vmem:[%s412_s1 + $0x58] sm:$0xff]   ;;  %v300_v11 = vld [vmem:[%s412_s1 + $0x50] sm:$0xff]  }
   0x4   :  { %267 = vmatprep.subr.bf16.mxu0 %v292_v2  ;;  %v297_v7 = vld [vmem:[%s412_s1 + $0x20] sm:$0xff]   ;;  %v299_v10 = vld [vmem:[%s412_s1 + $0x18] sm:$0xff]  }
   0x5   :  { %v247_v12 = vld.sshfl [vmem:[%s411_s0] sm:$0x11 pattern:$0x75316420] }
   0x7   :  { %268 = vmatpush3.bf16.msra.mxu0 %v293_v3 }
   0x8   :  { %269 = vmatprep.subr.bf16.mxu0 %v294_v4 }
   0xb   :  { %270 = vmatpush3.bf16.msra.mxu0 %v295_v5 }
   0xc   :  { %271 = vmatprep.subr.bf16.mxu0 %v296_v6 }
   0xf   :  { %272 = vmatpush3.bf16.msra.mxu0 %v297_v7 }
  0x10   :  { %273 = vmatprep.subr.bf16.mxu0 %v298_v8 }
  0x11   :  { %8 = vsyncpa [#allocation4], 0  ;;  %v301_v16 = vld [vmem:[%s412_s1 + $0x10] sm:$0xff]   ;;  %v64_v17 = vcombine.high %v247_v12, %v247_v12  ;;  %v67_v18 = vunpack.c.0.s8 %v66_v14  ;;  %v302_v19 = vld [vmem:[%s412_s1 + $0x48] sm:$0xff]   ;;  %vm20_vm0 = vcmask 25600   ;;  %v329_v26 = vmov 0.0  }
  0x12   :  { %v303_v21 = vld [vmem:[%s412_s1 + $0x8] sm:$0xff]   ;;  %v304_v23 = vld [vmem:[%s412_s1 + $0x40] sm:$0xff]   ;;  %21 = vst.msk [vmem:[#allocation2] sm:$0x3] %vm20_vm0, %v329_v26 }
  0x13   :  { %274 = vmatpush3.bf16.msra.mxu0 %v299_v10  ;;  %v70_v20 = vsub.s32 %v67_v18, %v69_v15  ;;  %v305_v24 = vld [vmem:[%s412_s1] sm:$0xff]   ;;  %s330_s1 = smov [#allocation3]  }
  0x14   :  { %275 = vmatprep.subr.bf16.mxu0 %v300_v11  ;;  %v264_v34 = vld [vmem:[%s413_s2] ss:$0 sm:$0xff]  ;;  %s239_s20 = sshll.u32 %s330_s1, 4  ;;  %s240_s20 = int_to_ptr.vmem [resolvable:$true] %s239_s20 }
  0x15   :  { %v78_v22 = vrot.slane %v64_v17, %v70_v20  ;;  %v71_v25 = vrot.slane %v247_v12, %v70_v20  ;;  %s306_s21 = scalar_lea.vmem %s240_s20, 32  ;;  %p311_p1 = scmp.lt.s32.totalorder %s240_s20, %s240_s20 }
  0x16   :  { %p307_p0 = scmp.ne.s32.totalorder %s240_s20, %s306_s21  ;;  %p312_p2 = scmp.lt.s32.totalorder %s306_s21, %s306_s21 }
  0x17   :  { %276 = vmatpush3.bf16.msra.mxu0 %v301_v16  ;;  %209 = vmatprep.mubr.bf16.mxu0 %v78_v22 }
  0x18   :  { %277 = vmatprep.subr.bf16.mxu0 %v302_v19  ;;  %p313_p3 = por %p312_p2, %p311_p1 }
  0x19   :  { %v22_v28 = vld [vmem:[#allocation2] sm:$0x3] }
  0x1a   :  { %p314_p4 = pnand %p313_p3, %p307_p0 }
  0x1b   :  { %278 = vmatpush3.bf16.msra.mxu0 %v303_v21 }
  0x1c   :  { %279 = vmatprep.subr.bf16.mxu0 %v304_v23 }
  0x1f   :  { %280 = vmatpush3.bf16.msra.mxu0 %v305_v24 }
  0x22   :  { %210 = vmatmul.mubr.bf16.vlgmr.msra.gmra.mxu0 %v71_v25 }
  0xe2   :  { %v281_v27 = vpop.f32.mrf.mxu0 }
  0xe4   :  { %v282_v29 = vpop.f32.mrf.mxu0 }
  0xe5   :  { %v283_v30 = vadd.f32 %v282_v29, %v281_v27 }
  0xe6   :  { %v284_v31 = vpop.f32.mrf.mxu0 }
  0xe7   :  { %v217_v32 = vadd.f32 %v283_v30, %v22_v28 }
  0xe8   :  { %v285_v33 = vpop.f32.mrf.mxu0 }
  0xe9   :  { %219 = vst.msk [vmem:[#allocation2] sm:$0x3] %vm20_vm0, %v217_v32 }
  0xf0   :  { %v223_v35 = vld [vmem:[#allocation2] sm:$0x3] }
  0xf1   :  { %v231_v36 = vadd.f32 %v264_v34, %v223_v35 }
  0xf3   :  { %232 = vst.msk [vmem:[#allocation3] sm:$0x3] %vm20_vm0, %v231_v36 }
  0xf4   :  { %317 = shalt.err (!%p314_p4)
}
  0xf5   :  { %242 = dma.vmem_to_hbm [thread:$0]  %s240_s20, 32, %s414_s3, [#allocation4]  }
  0xf6   :  { %326 = dma.done.wait [#allocation4], 32  }
  0xf7   :  { %327 = vsyncadd [#allocation4], 4294967264 }
  0xf8   :  { %246 = vsyncpa [#allocation4], 1 }

</bundles_post_ra>
